<compile_context>
chip_gen: v7x
topology: tpu7x:2x2x1
jax: 0.10.0
libtpu: 0.0.40
codegen_flags: <defaults>
</compile_context>

<pallas_src>
import jax
import jax.numpy as jnp
from jax.experimental import pallas as pl
from jax.experimental.pallas import tpu as pltpu

IN_FEATURES = 12288   # 3 * 64 * 64
H1 = 128
H2 = 64
OUT = 20
TB_MAX = 256          # per-tile batch rows; safe for f32 x streaming on v7x VMEM


def fcnn_kernel(x_ref, w1_ref, b1_ref, w2_ref, b2_ref, w3_ref, b3_ref, out_ref):
    """Fused 3-layer MLP; one grid step handles one batch tile end-to-end.

    x arrives as f32 and is cast to bf16 per tile for the layer-1 MXU feed
    (W1 is already bf16 and resident); all accumulation is f32 on the MXU.
    """
    x_bf16 = x_ref[...].astype(jnp.bfloat16)
    z1 = jnp.dot(x_bf16, w1_ref[...], preferred_element_type=jnp.float32)
    h1 = jnp.maximum(z1 + b1_ref[...], 0.0)                               # ReLU
    z2 = jnp.dot(h1, w2_ref[...], preferred_element_type=jnp.float32)
    h2 = jnp.maximum(z2 + b2_ref[...], 0.0)                               # ReLU
    z3 = jnp.dot(h2, w3_ref[...], preferred_element_type=jnp.float32)
    z3 = z3 + b3_ref[...]
    out_ref[...] = jax.nn.sigmoid(z3).astype(out_ref.dtype)               # Sigmoid


def _batch_tiling(B):
    """Balanced batch tiling: Bp ~= B, TB multiple of 16, >=2 tiles if B>16."""
    n_tiles = max(1, -(-B // TB_MAX))        # cdiv(B, TB_MAX)
    if B > 16:
        n_tiles = max(n_tiles, 2)            # occupy both TensorCores on v7x
    tb = -(-B // n_tiles)                    # cdiv(B, n_tiles)
    tb = ((tb + 15) // 16) * 16              # multiple of 16 (bf16 packing)
    bp = n_tiles * tb
    return tb, bp, n_tiles


def prepare_params(params):
    """One-time parameter prep: W1 stored bf16 (the only large operand)."""
    w1, b1, w2, b2, w3, b3 = params
    return (w1.astype(jnp.bfloat16), b1, w2, b2, w3, b3)


def fcnn_forward(x_nchw, prepared_params):
    w1_bf16, b1, w2, b2, w3, b3 = prepared_params
    B = x_nchw.shape[0]
    x = x_nchw.reshape(B, -1)  # row-major flatten == torch .view(B, -1)
    assert x.shape[1] == IN_FEATURES

    TB, Bp, n_tiles = _batch_tiling(B)
    if Bp != B:
        x = jnp.pad(x, ((0, Bp - B), (0, 0)))

    out = pl.pallas_call(
        fcnn_kernel,
        out_shape=jax.ShapeDtypeStruct((Bp, OUT), jnp.float32),
        grid_spec=pltpu.PrefetchScalarGridSpec(
            num_scalar_prefetch=0,
            grid=(n_tiles,),
            in_specs=[
                pl.BlockSpec((TB, IN_FEATURES), lambda b: (b, 0)),   # x tile (f32)
                pl.BlockSpec((IN_FEATURES, H1), lambda b: (0, 0)),   # W1 resident (bf16)
                pl.BlockSpec((1, H1), lambda b: (0, 0)),             # b1 resident
                pl.BlockSpec((H1, H2), lambda b: (0, 0)),            # W2 resident
                pl.BlockSpec((1, H2), lambda b: (0, 0)),             # b2 resident
                pl.BlockSpec((H2, OUT), lambda b: (0, 0)),           # W3 resident
                pl.BlockSpec((1, OUT), lambda b: (0, 0)),            # b3 resident
            ],
            out_specs=pl.BlockSpec((TB, OUT), lambda b: (b, 0)),
        ),
        compiler_params=pltpu.CompilerParams(
            dimension_semantics=("parallel",),
            vmem_limit_bytes=48 * 1024 * 1024),
    )(x, w1_bf16, b1, w2, b2, w3, b3)
    return out[:B]


def init_params(key):
    """Deterministic synthetic params (torch-Linear-like scale), (in, out) layout."""
    ks = jax.random.split(key, 6)

    def linear(kw, kb, fan_in, fan_out):
        bound = 1.0 / jnp.sqrt(fan_in)
        w = jax.random.uniform(kw, (fan_in, fan_out), jnp.float32, -bound, bound)
        b = jax.random.uniform(kb, (1, fan_out), jnp.float32, -bound, bound)
        return w, b

    w1, b1 = linear(ks[0], ks[1], IN_FEATURES, H1)
    w2, b2 = linear(ks[2], ks[3], H1, H2)
    w3, b3 = linear(ks[4], ks[5], H2, OUT)
    return (w1, b1, w2, b2, w3, b3)


def reference_forward_f32(x_nchw, params):
    """Full-f32 reference (matches the PyTorch module semantics)."""
    w1, b1, w2, b2, w3, b3 = params
    y = x_nchw.reshape(x_nchw.shape[0], -1)
    y = jnp.maximum(y @ w1 + b1, 0.0)
    y = jnp.maximum(y @ w2 + b2, 0.0)
    return jax.nn.sigmoid(y @ w3 + b3)


def reference_forward_bf16(x_nchw, params):
    """Reference with the same bf16 layer-1 operands / f32 accumulation as the kernel."""
    w1, b1, w2, b2, w3, b3 = params
    y = x_nchw.reshape(x_nchw.shape[0], -1).astype(jnp.bfloat16)
    z1 = jnp.dot(y, w1.astype(jnp.bfloat16), preferred_element_type=jnp.float32)
    h1 = jnp.maximum(z1 + b1, 0.0)
    h2 = jnp.maximum(h1 @ w2 + b2, 0.0)
    return jax.nn.sigmoid(h2 @ w3 + b3)


if __name__ == "__main__":
    key = jax.random.PRNGKey(0)
    k_x, k_p = jax.random.split(key)
    # Smallest shape consistent with the module: flattened dim must be 12288.
    x = jax.random.normal(k_x, (2, 3, 64, 64), dtype=jnp.float32)  # NCHW
    params = init_params(k_p)
    kernel_params = prepare_params(params)   # one-time bf16 cast of W1

    out = fcnn_forward(x, kernel_params)
    out = jax.block_until_ready(out)
    assert out.shape == (2, OUT)

    # Tight check vs a bf16-matched reference (same precision recipe).
    ref_bf16 = reference_forward_bf16(x, params)
    assert jnp.allclose(out, ref_bf16, atol=5e-4, rtol=5e-4), \
        "mismatch vs bf16-matched reference"

    # Sanity check vs the full-f32 module semantics (looser, bf16 weight stream).
    ref_f32 = reference_forward_f32(x, params)
    assert jnp.allclose(out, ref_f32, atol=2e-2, rtol=0.0), \
        "mismatch vs f32 reference"

    print("KERNEL_OK")
</pallas_src>

<mosaic_0001>
module attributes {stable_mosaic.version = 11 : i64} {
  func.func @fcnn_kernel(%arg0: i32, %arg1: memref<16x12288xf32, #tpu.memory_space<vmem>>, %arg2: memref<12288x128xbf16, #tpu.memory_space<vmem>>, %arg3: memref<1x128xf32, #tpu.memory_space<vmem>>, %arg4: memref<128x64xf32, #tpu.memory_space<vmem>>, %arg5: memref<1x64xf32, #tpu.memory_space<vmem>>, %arg6: memref<64x20xf32, #tpu.memory_space<vmem>>, %arg7: memref<1x20xf32, #tpu.memory_space<vmem>>, %arg8: memref<16x20xf32, #tpu.memory_space<vmem>>) attributes {dimension_semantics = [#tpu.dimension_semantics<parallel>], iteration_bounds = array<i64: 1>, scalar_prefetch = 0 : i64, scratch_operands = 0 : i64, tpu.core_type = #tpu.core_type<tc>, window_params = [{transform_indices = @transform_0, window_bounds = array<i64: 16, 12288>}, {pipeline_mode = #tpu.pipeline_mode<synchronous>, transform_indices = @transform_1, window_bounds = array<i64: 12288, 128>}, {pipeline_mode = #tpu.pipeline_mode<synchronous>, transform_indices = @transform_2, window_bounds = array<i64: 1, 128>}, {pipeline_mode = #tpu.pipeline_mode<synchronous>, transform_indices = @transform_3, window_bounds = array<i64: 128, 64>}, {pipeline_mode = #tpu.pipeline_mode<synchronous>, transform_indices = @transform_4, window_bounds = array<i64: 1, 64>}, {pipeline_mode = #tpu.pipeline_mode<synchronous>, transform_indices = @transform_5, window_bounds = array<i64: 64, 20>}, {pipeline_mode = #tpu.pipeline_mode<synchronous>, transform_indices = @transform_6, window_bounds = array<i64: 1, 20>}, {transform_indices = @transform_7, window_bounds = array<i64: 16, 20>}]} {
    %c0 = arith.constant 0 : index
    %c0_0 = arith.constant 0 : index
    %0 = vector.load %arg1[%c0, %c0_0] : memref<16x12288xf32, #tpu.memory_space<vmem>>, vector<16x12288xf32>
    %1 = arith.truncf %0 : vector<16x12288xf32> to vector<16x12288xbf16>
    %c0_1 = arith.constant 0 : index
    %c0_2 = arith.constant 0 : index
    %2 = vector.load %arg2[%c0_1, %c0_2] : memref<12288x128xbf16, #tpu.memory_space<vmem>>, vector<12288x128xbf16>
    %cst = arith.constant dense<0.000000e+00> : vector<16x128xf32>
    %3 = tpu.matmul %1, %2, %cst {dimension_numbers = #tpu.dot_dimension_numbers<[1], [0], [0], [1], [0, 0, 1, 1], [], []>} : vector<16x12288xbf16>, vector<12288x128xbf16>, vector<16x128xf32> -> vector<16x128xf32>
    %c0_3 = arith.constant 0 : index
    %c0_4 = arith.constant 0 : index
    %4 = vector.load %arg3[%c0_3, %c0_4] : memref<1x128xf32, #tpu.memory_space<vmem>>, vector<1x128xf32>
    %5 = vector.broadcast %4 : vector<1x128xf32> to vector<16x128xf32>
    %6 = arith.addf %3, %5 : vector<16x128xf32>
    %cst_5 = arith.constant 0.000000e+00 : f32
    %7 = vector.broadcast %cst_5 : f32 to vector<16x128xf32>
    %8 = arith.maximumf %6, %7 : vector<16x128xf32>
    %c0_6 = arith.constant 0 : index
    %c0_7 = arith.constant 0 : index
    %9 = vector.load %arg4[%c0_6, %c0_7] : memref<128x64xf32, #tpu.memory_space<vmem>>, vector<128x64xf32>
    %cst_8 = arith.constant dense<0.000000e+00> : vector<16x64xf32>
    %10 = tpu.matmul %8, %9, %cst_8 {dimension_numbers = #tpu.dot_dimension_numbers<[1], [0], [0], [1], [0, 0, 1, 1], [], []>} : vector<16x128xf32>, vector<128x64xf32>, vector<16x64xf32> -> vector<16x64xf32>
    %c0_9 = arith.constant 0 : index
    %c0_10 = arith.constant 0 : index
    %11 = vector.load %arg5[%c0_9, %c0_10] : memref<1x64xf32, #tpu.memory_space<vmem>>, vector<1x64xf32>
    %12 = vector.broadcast %11 : vector<1x64xf32> to vector<16x64xf32>
    %13 = arith.addf %10, %12 : vector<16x64xf32>
    %cst_11 = arith.constant 0.000000e+00 : f32
    %14 = vector.broadcast %cst_11 : f32 to vector<16x64xf32>
    %15 = arith.maximumf %13, %14 : vector<16x64xf32>
    %c0_12 = arith.constant 0 : index
    %c0_13 = arith.constant 0 : index
    %16 = vector.load %arg6[%c0_12, %c0_13] : memref<64x20xf32, #tpu.memory_space<vmem>>, vector<64x20xf32>
    %cst_14 = arith.constant dense<0.000000e+00> : vector<16x20xf32>
    %17 = tpu.matmul %15, %16, %cst_14 {dimension_numbers = #tpu.dot_dimension_numbers<[1], [0], [0], [1], [0, 0, 1, 1], [], []>} : vector<16x64xf32>, vector<64x20xf32>, vector<16x20xf32> -> vector<16x20xf32>
    %c0_15 = arith.constant 0 : index
    %c0_16 = arith.constant 0 : index
    %18 = vector.load %arg7[%c0_15, %c0_16] : memref<1x20xf32, #tpu.memory_space<vmem>>, vector<1x20xf32>
    %19 = vector.broadcast %18 : vector<1x20xf32> to vector<16x20xf32>
    %20 = arith.addf %17, %19 : vector<16x20xf32>
    %21 = arith.negf %20 : vector<16x20xf32>
    %22 = math.exp %21 : vector<16x20xf32>
    %cst_17 = arith.constant 1.000000e+00 : f32
    %23 = vector.broadcast %cst_17 : f32 to vector<16x20xf32>
    %24 = arith.addf %23, %22 : vector<16x20xf32>
    %25 = arith.divf %23, %24 : vector<16x20xf32>
    %c0_18 = arith.constant 0 : index
    %c0_19 = arith.constant 0 : index
    %26 = vector.load %arg8[%c0_18, %c0_19] : memref<16x20xf32, #tpu.memory_space<vmem>>, vector<16x20xf32>
    tpu.vector_store %arg8[%c0_18, %c0_19], %25 {strides = array<i32>} : memref<16x20xf32, #tpu.memory_space<vmem>>, vector<16x20xf32>,
    return
  }
  func.func @transform_0(%arg0: i32) -> (i32, i32) {
    %c0_i32 = arith.constant 0 : i32
    %c0_i32_0 = arith.constant 0 : i32
    return %arg0, %c0_i32 : i32, i32
  }
  func.func @transform_1(%arg0: i32) -> (i32, i32) {
    %c0_i32 = arith.constant 0 : i32
    %c0_i32_0 = arith.constant 0 : i32
    %c0_i32_1 = arith.constant 0 : i32
    return %c0_i32, %c0_i32_0 : i32, i32
  }
  func.func @transform_2(%arg0: i32) -> (i32, i32) {
    %c0_i32 = arith.constant 0 : i32
    %c0_i32_0 = arith.constant 0 : i32
    %c0_i32_1 = arith.constant 0 : i32
    return %c0_i32, %c0_i32_0 : i32, i32
  }
  func.func @transform_3(%arg0: i32) -> (i32, i32) {
    %c0_i32 = arith.constant 0 : i32
    %c0_i32_0 = arith.constant 0 : i32
    %c0_i32_1 = arith.constant 0 : i32
    return %c0_i32, %c0_i32_0 : i32, i32
  }
  func.func @transform_4(%arg0: i32) -> (i32, i32) {
    %c0_i32 = arith.constant 0 : i32
    %c0_i32_0 = arith.constant 0 : i32
    %c0_i32_1 = arith.constant 0 : i32
    return %c0_i32, %c0_i32_0 : i32, i32
  }
  func.func @transform_5(%arg0: i32) -> (i32, i32) {
    %c0_i32 = arith.constant 0 : i32
    %c0_i32_0 = arith.constant 0 : i32
    %c0_i32_1 = arith.constant 0 : i32
    return %c0_i32, %c0_i32_0 : i32, i32
  }
  func.func @transform_6(%arg0: i32) -> (i32, i32) {
    %c0_i32 = arith.constant 0 : i32
    %c0_i32_0 = arith.constant 0 : i32
    %c0_i32_1 = arith.constant 0 : i32
    return %c0_i32, %c0_i32_0 : i32, i32
  }
  func.func @transform_7(%arg0: i32) -> (i32, i32) {
    %c0_i32 = arith.constant 0 : i32
    %c0_i32_0 = arith.constant 0 : i32
    return %arg0, %c0_i32 : i32, i32
  }
}

</mosaic_0001>

<bundles_post_ra>
// kernel: tpu_custom_call.1
= control target key start
LH: loop header
LB: loop body
LE: loop exit
PB: predicated region body
PF: predicated region fallthrough
CT: control target
= control target key end

     0   :  { %12 = vsyncpa [#allocation3], 0  ;;  %s11917_s0 = inlined_call_operand.hbm [shape: f32[16,12288], index: 0, kind: input, shape index: {}]   ;;  %s11918_s1 = inlined_call_operand.hbm [shape: bf16[12288,128], index: 1, kind: input, shape index: {}]   ;;  %s11919_s2 = inlined_call_operand.hbm [shape: f32[1,128], index: 2, kind: input, shape index: {}]   ;;  %s11920_s3 = inlined_call_operand.vmem [shape: f32[128,64], index: 3, kind: input, shape index: {}]   ;;  %s11921_s4 = inlined_call_operand.hbm [shape: f32[1,64], index: 4, kind: input, shape index: {}]   ;;  %s11922_s5 = inlined_call_operand.vmem [shape: f32[64,20], index: 5, kind: input, shape index: {}]   ;;  %s11923_s6 = inlined_call_operand.hbm [shape: f32[1,20], index: 6, kind: input, shape index: {}]   ;;  %s11924_s7 = inlined_call_operand.hbm [shape: f32[16,20], index: 7, kind: output, shape index: {}]  }
   0x1   :  { %13 = vsyncpa [#allocation6], 0 }
   0x2   :  { %14 = vsyncpa [#allocation9], 0 }
   0x3   :  { %15 = vsyncpa [#allocation4], 0  ;;  %s11619_s24 = smov [#allocation5]   ;;  %s11479_s28 = scalar_lea.hbm %s11918_s1, 98304 }
   0x4   :  { %s33_s25 = sshll.u32 %s11619_s24, 4  ;;  %p11480_p0 = scmp.ne.s32.totalorder %s11918_s1, %s11479_s28  ;;  %s34_s25 = int_to_ptr.vmem [resolvable:$true] %s33_s25 }
   0x5   :  { %p11483_p1 = scmp.lt.u32.totalorder %s11479_s28, %s11918_s1 }
   0x7   :  { %p11485_p2 = pnand %p11483_p1, %p11480_p0 }
   0x9   :  { %11488 = shalt.err (!%p11485_p2)
}
   0xa   :  { %s11489_s10 = scalar_lea.vmem %s34_s25, 98304  ;;  %p11494_p4 = scmp.lt.s32.totalorder %s34_s25, %s34_s25 }
   0xb   :  { %p11490_p3 = scmp.ne.s32.totalorder %s34_s25, %s11489_s10  ;;  %p11495_p5 = scmp.lt.s32.totalorder %s11489_s10, %s11489_s10 }
   0xd   :  { %p11496_p6 = por %p11495_p5, %p11494_p4 }
   0xf   :  { %p11497_p7 = pnand %p11496_p6, %p11490_p3 }
  0x11   :  { %11500 = shalt.err (!%p11497_p7)
}
  0x12   :  { %s11620_s11 = smov 64   ;;  %s11621_s12 = smov 4  }
  0x13   :  { %39 = dma.hbm_to_vmem [thread:$0]  %s11918_s1, 98304, %s34_s25, [#allocation6], %s11620_s11, %s11620_s11, %s11621_s12  }
  0x14   :  { %s11622_s15 = smov [#allocation8]   ;;  %s11623_s17 = smov [#allocation2]  }
  0x15   :  { %s58_s16 = sshll.u32 %s11622_s15, 4  ;;  %s21_s18 = sshll.u32 %s11623_s17, 4  ;;  %s59_s16 = int_to_ptr.vmem [resolvable:$true] %s58_s16  ;;  %s22_s18 = int_to_ptr.vmem [resolvable:$true] %s21_s18 }
  0x16   :  { %s11501_s21 = scalar_lea.hbm %s11921_s4, 16 }
  0x17   :  { %p11502_p8 = scmp.ne.s32.totalorder %s11921_s4, %s11501_s21  ;;  %p11505_p9 = scmp.lt.u32.totalorder %s11501_s21, %s11921_s4 }
  0x19   :  { %p11507_p10 = pnand %p11505_p9, %p11502_p8 }
  0x1b   :  { %11510 = shalt.err (!%p11507_p10)
}
  0x1c   :  { %s11511_s1 = scalar_lea.vmem %s59_s16, 16  ;;  %s11515_s25 = scalar_lea.vmem %s59_s16, 32 }
  0x1d   :  { %p11512_p11 = scmp.ne.s32.totalorder %s59_s16, %s11511_s1  ;;  %p11516_p12 = scmp.lt.s32.totalorder %s59_s16, %s59_s16 }
  0x1e   :  { %p11517_p13 = scmp.lt.s32.totalorder %s11515_s25, %s11511_s1 }
  0x20   :  { %p11518_p0 = por %p11517_p13, %p11516_p12 }
  0x22   :  { %p11519_p1 = pnand %p11518_p0, %p11512_p11 }
  0x24   :  { %11522 = shalt.err (!%p11519_p1)
}
  0x25   :  { %61 = dma.hbm_to_vmem [thread:$0]  %s11921_s4, 16, %s59_s16, [#allocation9]  }
  0x26   :  { %s11523_s8 = scalar_lea.hbm %s11917_s0, 24576 }
  0x27   :  { %p11524_p2 = scmp.ne.s32.totalorder %s11917_s0, %s11523_s8  ;;  %p11527_p3 = scmp.lt.u32.totalorder %s11523_s8, %s11917_s0 }
  0x29   :  { %p11529_p4 = pnand %p11527_p3, %p11524_p2 }
  0x2b   :  { %11532 = shalt.err (!%p11529_p4)
}
  0x2c   :  { %s11533_s13 = scalar_lea.vmem %s22_s18, 24576  ;;  %p11538_p6 = scmp.lt.s32.totalorder %s22_s18, %s22_s18 }
  0x2d   :  { %p11534_p5 = scmp.ne.s32.totalorder %s22_s18, %s11533_s13  ;;  %p11539_p7 = scmp.lt.s32.totalorder %s11533_s13, %s11533_s13 }
  0x2f   :  { %p11540_p8 = por %p11539_p7, %p11538_p6 }
  0x31   :  { %p11541_p9 = pnand %p11540_p8, %p11534_p5 }
  0x33   :  { %11544 = shalt.err (!%p11541_p9)
}
  0x34   :  { %s11624_s4 = smov 12288   ;;  %s11625_s14 = smov 768  }
  0x35   :  { %27 = dma.hbm_to_vmem [thread:$0]  %s11917_s0, 24576, %s22_s18, [#allocation3], %s11624_s4, %s11624_s4, %s11625_s14  }
  0x36   :  { %s11626_s17 = smov [#allocation7]   ;;  %s11627_s20 = smov [#allocation10]  }
  0x37   :  { %s46_s19 = sshll.u32 %s11626_s17, 4  ;;  %s70_s21 = sshll.u32 %s11627_s20, 4  ;;  %s47_s19 = int_to_ptr.vmem [resolvable:$true] %s46_s19  ;;  %s71_s21 = int_to_ptr.vmem [resolvable:$true] %s70_s21 }
  0x38   :  { %s11545_s24 = scalar_lea.hbm %s11919_s2, 16 }
  0x39   :  { %p11546_p10 = scmp.ne.s32.totalorder %s11919_s2, %s11545_s24  ;;  %p11549_p11 = scmp.lt.u32.totalorder %s11545_s24, %s11919_s2 }
  0x3b   :  { %p11551_p12 = pnand %p11549_p11, %p11546_p10 }
  0x3d   :  { %11554 = shalt.err (!%p11551_p12)
}
  0x3e   :  { %s11555_s0 = scalar_lea.vmem %s47_s19, 16  ;;  %s11559_s18 = scalar_lea.vmem %s47_s19, 32 }
  0x3f   :  { %p11556_p13 = scmp.ne.s32.totalorder %s47_s19, %s11555_s0  ;;  %p11560_p0 = scmp.lt.s32.totalorder %s47_s19, %s47_s19 }
  0x40   :  { %p11561_p1 = scmp.lt.s32.totalorder %s11559_s18, %s11555_s0 }
  0x42   :  { %p11562_p2 = por %p11561_p1, %p11560_p0 }
  0x44   :  { %p11563_p3 = pnand %p11562_p2, %p11556_p13 }
  0x46   :  { %11566 = shalt.err (!%p11563_p3)
}
  0x47   :  { %49 = dma.hbm_to_vmem [thread:$0]  %s11919_s2, 16, %s47_s19, [#allocation6]  }
  0x48   :  { %s11567_s9 = scalar_lea.hbm %s11923_s6, 16 }
  0x49   :  { %p11568_p4 = scmp.ne.s32.totalorder %s11923_s6, %s11567_s9  ;;  %p11571_p5 = scmp.lt.u32.totalorder %s11567_s9, %s11923_s6 }
  0x4b   :  { %p11573_p6 = pnand %p11571_p5, %p11568_p4 }
  0x4d   :  { %11576 = shalt.err (!%p11573_p6)
}
  0x4e   :  { %s11577_s4 = scalar_lea.vmem %s71_s21, 16  ;;  %s11581_s14 = scalar_lea.vmem %s71_s21, 32 }
  0x4f   :  { %p11578_p7 = scmp.ne.s32.totalorder %s71_s21, %s11577_s4  ;;  %p11582_p8 = scmp.lt.s32.totalorder %s71_s21, %s71_s21 }
  0x50   :  { %p11583_p9 = scmp.lt.s32.totalorder %s11581_s14, %s11577_s4 }
  0x52   :  { %p11584_p10 = por %p11583_p9, %p11582_p8 }
  0x54   :  { %p11585_p11 = pnand %p11584_p10, %p11578_p7 }
  0x56   :  { %11588 = shalt.err (!%p11585_p11)
}
  0x57   :  { %73 = dma.hbm_to_vmem [thread:$0]  %s11923_s6, 16, %s71_s21, [#allocation9]  }
  0x58   :  { %11611 = dma.done.wait [#allocation3], 24576  }
  0x59   :  { %11612 = vsyncadd [#allocation3], 4294942720 }
  0x5a   :  { %11613 = dma.done.wait [#allocation6], 98320  }
  0x5b   :  { %11614 = vsyncadd [#allocation6], 4294868976 }
  0x5c   :  { %11615 = dma.done.wait [#allocation9], 32  }
  0x5d   :  { %11616 = vsyncadd [#allocation9], 4294967264  ;;  %v10703_v0 = vld [vmem:[#allocation5 + $0x40] sm:$0xff]   ;;  %v10707_v4 = vld [vmem:[#allocation5 + $0x48] sm:$0xff]   ;;  %vm8614_vm0 = vcmask 523264   ;;  %vm8708_vm1 = vcmask 162816  }
  0x5e   :  { %v10704_v1 = vld [vmem:[#allocation5 + $0xc0] sm:$0xff]   ;;  %9505 = vmatprep.subr.bf16.mxu0 %v10703_v0  ;;  %v10708_v5 = vld [vmem:[#allocation5 + $0xc8] sm:$0xff]   ;;  %v10711_v8 = vld [vmem:[#allocation5 + $0x50] sm:$0xff]  }
  0x5f   :  { %v10705_v2 = vld [vmem:[#allocation5] sm:$0xff]   ;;  %9527 = vmatprep.subr.bf16.mxu1 %v10704_v1  ;;  %v10709_v6 = vld [vmem:[#allocation5 + $0x8] sm:$0xff]   ;;  %v10712_v9 = vld [vmem:[#allocation5 + $0xd0] sm:$0xff]  }
  0x60   :  { %v10706_v3 = vld [vmem:[#allocation5 + $0x80] sm:$0xff]   ;;  %9506 = vmatpush3.bf16.msra.mxu0 %v10705_v2  ;;  %v10710_v7 = vld [vmem:[#allocation5 + $0x88] sm:$0xff]   ;;  %v10713_v10 = vld [vmem:[#allocation5 + $0x10] sm:$0xff]  }
  0x61   :  { %9528 = vmatpush3.bf16.msra.mxu1 %v10706_v3  ;;  %9507 = vmatprep.subr.bf16.mxu0 %v10707_v4  ;;  %v10714_v11 = vld [vmem:[#allocation5 + $0x90] sm:$0xff]   ;;  %v10715_v12 = vld [vmem:[#allocation5 + $0x58] sm:$0xff]   ;;  %v10719_v16 = vld [vmem:[#allocation5 + $0x60] sm:$0xff]  }
  0x62   :  { %9529 = vmatprep.subr.bf16.mxu1 %v10708_v5  ;;  %v10716_v13 = vld [vmem:[#allocation5 + $0xd8] sm:$0xff]   ;;  %v10720_v17 = vld [vmem:[#allocation5 + $0xe0] sm:$0xff]   ;;  %v10723_v20 = vld [vmem:[#allocation5 + $0x68] sm:$0xff]  }
  0x63   :  { %v10717_v14 = vld [vmem:[#allocation5 + $0x18] sm:$0xff]   ;;  %v10721_v18 = vld [vmem:[#allocation5 + $0x20] sm:$0xff]   ;;  %v10724_v21 = vld [vmem:[#allocation5 + $0xe8] sm:$0xff]  }
  0x64   :  { %9508 = vmatpush3.bf16.msra.mxu0 %v10709_v6  ;;  %v10718_v15 = vld [vmem:[#allocation5 + $0x98] sm:$0xff]   ;;  %v10722_v19 = vld [vmem:[#allocation5 + $0xa0] sm:$0xff]   ;;  %v10725_v22 = vld [vmem:[#allocation5 + $0x28] sm:$0xff]  }
  0x65   :  { %9530 = vmatpush3.bf16.msra.mxu1 %v10710_v7  ;;  %9509 = vmatprep.subr.bf16.mxu0 %v10711_v8  ;;  %v10726_v23 = vld [vmem:[#allocation5 + $0xa8] sm:$0xff]   ;;  %v10727_v24 = vld [vmem:[#allocation5 + $0x70] sm:$0xff]   ;;  %v10731_v28 = vld [vmem:[#allocation5 + $0x78] sm:$0xff]  }
  0x66   :  { %9531 = vmatprep.subr.bf16.mxu1 %v10712_v9  ;;  %v10728_v25 = vld [vmem:[#allocation5 + $0xf0] sm:$0xff]   ;;  %v10732_v29 = vld [vmem:[#allocation5 + $0xf8] sm:$0xff]   ;;  %v91_v32 = vld [vmem:[#allocation2 + $0x8] sm:$0xff] }
  0x67   :  { %v10729_v26 = vld [vmem:[#allocation5 + $0x30] sm:$0xff]   ;;  %v10733_v30 = vld [vmem:[#allocation5 + $0x38] sm:$0xff]   ;;  %v187_v33 = vld [vmem:[#allocation2 + $0x308] sm:$0xff] }
  0x68   :  { %9510 = vmatpush3.bf16.msra.mxu0 %v10713_v10  ;;  %v10730_v27 = vld [vmem:[#allocation5 + $0xb0] sm:$0xff]   ;;  %v10734_v31 = vld [vmem:[#allocation5 + $0xb8] sm:$0xff]   ;;  %v283_v35 = vpack.c.bf16 %v187_v33, %v91_v32  ;;  %v90_v37 = vld [vmem:[#allocation2] sm:$0xff] }
  0x69   :  { %9532 = vmatpush3.bf16.msra.mxu1 %v10714_v11  ;;  %9511 = vmatprep.subr.bf16.mxu0 %v10715_v12  ;;  %v93_v34 = vld [vmem:[#allocation2 + $0x18] sm:$0xff]  ;;  %v186_v38 = vld [vmem:[#allocation2 + $0x300] sm:$0xff]  ;;  %v92_v41 = vld [vmem:[#allocation2 + $0x10] sm:$0xff] }
  0x6a   :  { %9533 = vmatprep.subr.bf16.mxu1 %v10716_v13  ;;  %v189_v36 = vld [vmem:[#allocation2 + $0x318] sm:$0xff]  ;;  %v282_v40 = vpack.c.bf16 %v186_v38, %v90_v37  ;;  %v188_v42 = vld [vmem:[#allocation2 + $0x310] sm:$0xff]  ;;  %6561 = vmatprep.mubr.bf16.mxu0 %v283_v35  ;;  %v10735_v44 = vld [vmem:[#allocation5 + $0x140] sm:$0xff]  }
  0x6b   :  { %v285_v39 = vpack.c.bf16 %v189_v36, %v93_v34  ;;  %v284_v43 = vpack.c.bf16 %v188_v42, %v92_v41  ;;  %v10736_v45 = vld [vmem:[#allocation5 + $0x1c0] sm:$0xff]   ;;  %v10739_v48 = vld [vmem:[#allocation5 + $0x148] sm:$0xff]   ;;  %v10743_v52 = vld [vmem:[#allocation5 + $0x150] sm:$0xff]  }
  0x6c   :  { %9512 = vmatpush3.bf16.msra.mxu0 %v10717_v14  ;;  %v10737_v46 = vld [vmem:[#allocation5 + $0x100] sm:$0xff]   ;;  %v10740_v49 = vld [vmem:[#allocation5 + $0x1c8] sm:$0xff]   ;;  %v10744_v53 = vld [vmem:[#allocation5 + $0x1d0] sm:$0xff]  }
  0x6d   :  { %9534 = vmatpush3.bf16.msra.mxu1 %v10718_v15  ;;  %9513 = vmatprep.subr.bf16.mxu0 %v10719_v16  ;;  %v10738_v47 = vld [vmem:[#allocation5 + $0x180] sm:$0xff]   ;;  %v10741_v50 = vld [vmem:[#allocation5 + $0x108] sm:$0xff]   ;;  %v10745_v54 = vld [vmem:[#allocation5 + $0x110] sm:$0xff]  }
  0x6e   :  { %9535 = vmatprep.subr.bf16.mxu1 %v10720_v17  ;;  %6602 = vmatprep.mubr.bf16.mxu1 %v285_v39  ;;  %v10742_v51 = vld [vmem:[#allocation5 + $0x188] sm:$0xff]   ;;  %v10746_v55 = vld [vmem:[#allocation5 + $0x190] sm:$0xff]   ;;  %v10747_v56 = vld [vmem:[#allocation5 + $0x158] sm:$0xff]  }
  0x6f   :  { %v10748_v57 = vld [vmem:[#allocation5 + $0x1d8] sm:$0xff]   ;;  %v10751_v60 = vld [vmem:[#allocation5 + $0x160] sm:$0xff]   ;;  %v10755_v0 = vld [vmem:[#allocation5 + $0x168] sm:$0xff]  }
  0x70   :  { %9514 = vmatpush3.bf16.msra.mxu0 %v10721_v18  ;;  %v10749_v58 = vld [vmem:[#allocation5 + $0x118] sm:$0xff]   ;;  %v10752_v61 = vld [vmem:[#allocation5 + $0x1e0] sm:$0xff]   ;;  %v10756_v1 = vld [vmem:[#allocation5 + $0x1e8] sm:$0xff]  }
  0x71   :  { %9536 = vmatpush3.bf16.msra.mxu1 %v10722_v19  ;;  %9515 = vmatprep.subr.bf16.mxu0 %v10723_v20  ;;  %v10750_v59 = vld [vmem:[#allocation5 + $0x198] sm:$0xff]   ;;  %v10753_v62 = vld [vmem:[#allocation5 + $0x120] sm:$0xff]   ;;  %v10757_v2 = vld [vmem:[#allocation5 + $0x128] sm:$0xff]  }
  0x72   :  { %9537 = vmatprep.subr.bf16.mxu1 %v10724_v21  ;;  %v10754_v63 = vld [vmem:[#allocation5 + $0x1a0] sm:$0xff]   ;;  %v10758_v3 = vld [vmem:[#allocation5 + $0x1a8] sm:$0xff]   ;;  %v10759_v4 = vld [vmem:[#allocation5 + $0x170] sm:$0xff]  }
  0x73   :  { %v10760_v5 = vld [vmem:[#allocation5 + $0x1f0] sm:$0xff]   ;;  %v10763_v8 = vld [vmem:[#allocation5 + $0x178] sm:$0xff]   ;;  %v95_v12 = vld [vmem:[#allocation2 + $0x28] sm:$0xff] }
  0x74   :  { %9516 = vmatpush3.bf16.msra.mxu0 %v10725_v22  ;;  %v10761_v6 = vld [vmem:[#allocation5 + $0x130] sm:$0xff]   ;;  %v10764_v9 = vld [vmem:[#allocation5 + $0x1f8] sm:$0xff]   ;;  %v191_v13 = vld [vmem:[#allocation2 + $0x328] sm:$0xff] }
  0x75   :  { %9538 = vmatpush3.bf16.msra.mxu1 %v10726_v23  ;;  %9517 = vmatprep.subr.bf16.mxu0 %v10727_v24  ;;  %v10762_v7 = vld [vmem:[#allocation5 + $0x1b0] sm:$0xff]   ;;  %v10765_v10 = vld [vmem:[#allocation5 + $0x138] sm:$0xff]   ;;  %v287_v16 = vpack.c.bf16 %v191_v13, %v95_v12  ;;  %v94_v18 = vld [vmem:[#allocation2 + $0x20] sm:$0xff] }
  0x76   :  { %9539 = vmatprep.subr.bf16.mxu1 %v10728_v25  ;;  %v10766_v11 = vld [vmem:[#allocation5 + $0x1b8] sm:$0xff]   ;;  %v190_v19 = vld [vmem:[#allocation2 + $0x320] sm:$0xff]  ;;  %v96_v20 = vld [vmem:[#allocation2 + $0x30] sm:$0xff] }
  0x77   :  { %v97_v14 = vld [vmem:[#allocation2 + $0x38] sm:$0xff]  ;;  %v286_v21 = vpack.c.bf16 %v190_v19, %v94_v18  ;;  %v192_v22 = vld [vmem:[#allocation2 + $0x330] sm:$0xff]  ;;  %v10767_v24 = vld [vmem:[#allocation5 + $0x240] sm:$0xff]  }
  0x78   :  { %9518 = vmatpush3.bf16.msra.mxu0 %v10729_v26  ;;  %v193_v15 = vld [vmem:[#allocation2 + $0x338] sm:$0xff]  ;;  %v288_v23 = vpack.c.bf16 %v192_v22, %v96_v20  ;;  %v10768_v25 = vld [vmem:[#allocation5 + $0x2c0] sm:$0xff]   ;;  %v10775_v32 = vld [vmem:[#allocation5 + $0x250] sm:$0xff]  }
  0x79   :  { %9540 = vmatpush3.bf16.msra.mxu1 %v10730_v27  ;;  %9519 = vmatprep.subr.bf16.mxu0 %v10731_v28  ;;  %v289_v17 = vpack.c.bf16 %v193_v15, %v97_v14  ;;  %v10769_v26 = vld [vmem:[#allocation5 + $0x200] sm:$0xff]   ;;  %v10771_v28 = vld [vmem:[#allocation5 + $0x248] sm:$0xff]   ;;  %v10776_v33 = vld [vmem:[#allocation5 + $0x2d0] sm:$0xff]  }
  0x7a   :  { %9541 = vmatprep.subr.bf16.mxu1 %v10732_v29  ;;  %v10770_v27 = vld [vmem:[#allocation5 + $0x280] sm:$0xff]   ;;  %v10772_v29 = vld [vmem:[#allocation5 + $0x2c8] sm:$0xff]   ;;  %v10777_v34 = vld [vmem:[#allocation5 + $0x210] sm:$0xff]  }
  0x7b   :  { %v10778_v35 = vld [vmem:[#allocation5 + $0x290] sm:$0xff]   ;;  %v10779_v36 = vld [vmem:[#allocation5 + $0x258] sm:$0xff]   ;;  %v10784_v41 = vld [vmem:[#allocation5 + $0x2e0] sm:$0xff]  }
  0x7c   :  { %9520 = vmatpush3.bf16.msra.mxu0 %v10733_v30  ;;  %v10773_v30 = vld [vmem:[#allocation5 + $0x208] sm:$0xff]   ;;  %v10780_v37 = vld [vmem:[#allocation5 + $0x2d8] sm:$0xff]   ;;  %v10785_v42 = vld [vmem:[#allocation5 + $0x220] sm:$0xff]  }
  0x7d   :  { %9542 = vmatpush3.bf16.msra.mxu1 %v10734_v31  ;;  %9549 = vmatprep.subr.bf16.mxu0 %v10735_v44  ;;  %v10774_v31 = vld [vmem:[#allocation5 + $0x288] sm:$0xff]   ;;  %v10781_v38 = vld [vmem:[#allocation5 + $0x218] sm:$0xff]   ;;  %v10807_v12 = vld [vmem:[#allocation5 + $0x350] sm:$0xff]  }
  0x7e   :  { %9571 = vmatprep.subr.bf16.mxu1 %v10736_v45  ;;  %v10782_v39 = vld [vmem:[#allocation5 + $0x298] sm:$0xff]   ;;  %v10787_v44 = vld [vmem:[#allocation5 + $0x268] sm:$0xff]   ;;  %v10808_v13 = vld [vmem:[#allocation5 + $0x3d0] sm:$0xff]  }
  0x7f   :  { %6562 = vmatmul.mubr.bf16.vlgmr.msra.gmra.mrb[0].mxu0 %v282_v40  ;;  %v10783_v40 = vld [vmem:[#allocation5 + $0x260] sm:$0xff]   ;;  %v10788_v45 = vld [vmem:[#allocation5 + $0x2e8] sm:$0xff]   ;;  %v10809_v14 = vld [vmem:[#allocation5 + $0x310] sm:$0xff]  }
  0x80   :  { %6603 = vmatmul.mubr.bf16.vlgmr.msra.gmra.mrb[0].mxu1 %v284_v43  ;;  %9550 = vmatpush3.bf16.msra.mxu0 %v10737_v46  ;;  %v10786_v43 = vld [vmem:[#allocation5 + $0x2a0] sm:$0xff]   ;;  %v10789_v46 = vld [vmem:[#allocation5 + $0x228] sm:$0xff]   ;;  %v10810_v15 = vld [vmem:[#allocation5 + $0x390] sm:$0xff]  }
  0x81   :  { %9572 = vmatpush3.bf16.msra.mxu1 %v10738_v47  ;;  %9551 = vmatprep.subr.bf16.mxu0 %v10739_v48  ;;  %v10790_v47 = vld [vmem:[#allocation5 + $0x2a8] sm:$0xff]   ;;  %v10791_v48 = vld [vmem:[#allocation5 + $0x270] sm:$0xff]   ;;  %v10813_v18 = vld [vmem:[#allocation5 + $0x318] sm:$0xff]  }
  0x82   :  { %9573 = vmatprep.subr.bf16.mxu1 %v10740_v49  ;;  %6643 = vmatprep.mubr.bf16.mxu0 %v287_v16  ;;  %v10792_v49 = vld [vmem:[#allocation5 + $0x2f0] sm:$0xff]   ;;  %v10811_v16 = vld [vmem:[#allocation5 + $0x358] sm:$0xff]   ;;  %v10815_v20 = vld [vmem:[#allocation5 + $0x360] sm:$0xff]  }
  0x83   :  { %6684 = vmatprep.mubr.bf16.mxu1 %v289_v17  ;;  %v10812_v17 = vld [vmem:[#allocation5 + $0x3d8] sm:$0xff]   ;;  %v10817_v22 = vld [vmem:[#allocation5 + $0x320] sm:$0xff]  }
  0x84   :  { %9552 = vmatpush3.bf16.msra.mxu0 %v10741_v50  ;;  %v10793_v50 = vld [vmem:[#allocation5 + $0x230] sm:$0xff]   ;;  %v10814_v19 = vld [vmem:[#allocation5 + $0x398] sm:$0xff]  }
  0x85   :  { %9574 = vmatpush3.bf16.msra.mxu1 %v10742_v51  ;;  %9553 = vmatprep.subr.bf16.mxu0 %v10743_v52  ;;  %v10794_v51 = vld [vmem:[#allocation5 + $0x2b0] sm:$0xff]   ;;  %v10795_v52 = vld [vmem:[#allocation5 + $0x278] sm:$0xff]  }
  0x86   :  { %9575 = vmatprep.subr.bf16.mxu1 %v10744_v53  ;;  %v10796_v53 = vld [vmem:[#allocation5 + $0x2f8] sm:$0xff]  }
  0x88   :  { %9554 = vmatpush3.bf16.msra.mxu0 %v10745_v54  ;;  %v10797_v54 = vld [vmem:[#allocation5 + $0x238] sm:$0xff]  }
  0x89   :  { %9576 = vmatpush3.bf16.msra.mxu1 %v10746_v55  ;;  %9555 = vmatprep.subr.bf16.mxu0 %v10747_v56  ;;  %v10798_v55 = vld [vmem:[#allocation5 + $0x2b8] sm:$0xff]   ;;  %v99_v56 = vld [vmem:[#allocation2 + $0x48] sm:$0xff] }
  0x8a   :  { %9577 = vmatprep.subr.bf16.mxu1 %v10748_v57  ;;  %v195_v57 = vld [vmem:[#allocation2 + $0x348] sm:$0xff] }
  0x8c   :  { %9556 = vmatpush3.bf16.msra.mxu0 %v10749_v58  ;;  %v291_v58 = vpack.c.bf16 %v195_v57, %v99_v56  ;;  %v10839_v56 = vld [vmem:[#allocation5 + $0x450] sm:$0xff]  }
  0x8d   :  { %9578 = vmatpush3.bf16.msra.mxu1 %v10750_v59  ;;  %9557 = vmatprep.subr.bf16.mxu0 %v10751_v60  ;;  %v101_v59 = vld [vmem:[#allocation2 + $0x58] sm:$0xff]  ;;  %v10840_v57 = vld [vmem:[#allocation5 + $0x4d0] sm:$0xff]  }
  0x8e   :  { %9579 = vmatprep.subr.bf16.mxu1 %v10752_v61  ;;  %v197_v60 = vld [vmem:[#allocation2 + $0x358] sm:$0xff]  ;;  %v98_v61 = vld [vmem:[#allocation2 + $0x40] sm:$0xff] }
  0x90   :  { %9558 = vmatpush3.bf16.msra.mxu0 %v10753_v62  ;;  %v293_v62 = vpack.c.bf16 %v197_v60, %v101_v59  ;;  %v10842_v59 = vld [vmem:[#allocation5 + $0x490] sm:$0xff]   ;;  %v10843_v60 = vld [vmem:[#allocation5 + $0x458] sm:$0xff]  }
  0x91   :  { %9580 = vmatpush3.bf16.msra.mxu1 %v10754_v63  ;;  %9559 = vmatprep.subr.bf16.mxu0 %v10755_v0  ;;  %v194_v63 = vld [vmem:[#allocation2 + $0x340] sm:$0xff]  ;;  %v100_v0 = vld [vmem:[#allocation2 + $0x50] sm:$0xff] }
  0x92   :  { %9581 = vmatprep.subr.bf16.mxu1 %v10756_v1  ;;  %v196_v1 = vld [vmem:[#allocation2 + $0x350] sm:$0xff] }
  0x94   :  { %9560 = vmatpush3.bf16.msra.mxu0 %v10757_v2  ;;  %v290_v2 = vpack.c.bf16 %v194_v63, %v98_v61  ;;  %v10844_v61 = vld [vmem:[#allocation5 + $0x4d8] sm:$0xff]  }
  0x95   :  { %9582 = vmatpush3.bf16.msra.mxu1 %v10758_v3  ;;  %9561 = vmatprep.subr.bf16.mxu0 %v10759_v4  ;;  %v292_v3 = vpack.c.bf16 %v196_v1, %v100_v0  ;;  %v10799_v4 = vld [vmem:[#allocation5 + $0x340] sm:$0xff]   ;;  %v10846_v63 = vld [vmem:[#allocation5 + $0x498] sm:$0xff]  }
  0x96   :  { %9583 = vmatprep.subr.bf16.mxu1 %v10760_v5  ;;  %v10800_v5 = vld [vmem:[#allocation5 + $0x3c0] sm:$0xff]  }
  0x97   :  { %v10847_v0 = vld [vmem:[#allocation5 + $0x460] sm:$0xff]  }
  0x98   :  { %9562 = vmatpush3.bf16.msra.mxu0 %v10761_v6  ;;  %v10801_v6 = vld [vmem:[#allocation5 + $0x300] sm:$0xff]  }
  0x99   :  { %9584 = vmatpush3.bf16.msra.mxu1 %v10762_v7  ;;  %9563 = vmatprep.subr.bf16.mxu0 %v10763_v8  ;;  %v10802_v7 = vld [vmem:[#allocation5 + $0x380] sm:$0xff]   ;;  %v10803_v8 = vld [vmem:[#allocation5 + $0x348] sm:$0xff]  }
  0x9a   :  { %9585 = vmatprep.subr.bf16.mxu1 %v10764_v9  ;;  %v10804_v9 = vld [vmem:[#allocation5 + $0x3c8] sm:$0xff]   ;;  %v10848_v1 = vld [vmem:[#allocation5 + $0x4e0] sm:$0xff]  }
  0x9c   :  { %9564 = vmatpush3.bf16.msra.mxu0 %v10765_v10  ;;  %v10805_v10 = vld [vmem:[#allocation5 + $0x308] sm:$0xff]  }
  0x9d   :  { %9586 = vmatpush3.bf16.msra.mxu1 %v10766_v11  ;;  %9593 = vmatprep.subr.bf16.mxu0 %v10767_v24  ;;  %v10806_v11 = vld [vmem:[#allocation5 + $0x388] sm:$0xff]  }
  0x9e   :  { %9615 = vmatprep.subr.bf16.mxu1 %v10768_v25  ;;  %v10819_v24 = vld [vmem:[#allocation5 + $0x368] sm:$0xff]  }
  0x9f   :  { %6644 = vmatmul.mubr.bf16.vlgmr.msra.gmra.mrb[4].mxu0 %v286_v21  ;;  %v10816_v21 = vld [vmem:[#allocation5 + $0x3e0] sm:$0xff]   ;;  %v10820_v25 = vld [vmem:[#allocation5 + $0x3e8] sm:$0xff]  }
  0xa0   :  { %6685 = vmatmul.mubr.bf16.vlgmr.msra.gmra.mrb[4].mxu1 %v288_v23  ;;  %9594 = vmatpush3.bf16.msra.mxu0 %v10769_v26  ;;  %v10818_v23 = vld [vmem:[#allocation5 + $0x3a0] sm:$0xff]   ;;  %v10821_v26 = vld [vmem:[#allocation5 + $0x328] sm:$0xff]  }
  0xa1   :  { %9616 = vmatpush3.bf16.msra.mxu1 %v10770_v27  ;;  %9595 = vmatprep.subr.bf16.mxu0 %v10771_v28  ;;  %v10822_v27 = vld [vmem:[#allocation5 + $0x3a8] sm:$0xff]   ;;  %v10823_v28 = vld [vmem:[#allocation5 + $0x370] sm:$0xff]  }
  0xa2   :  { %9617 = vmatprep.subr.bf16.mxu1 %v10772_v29  ;;  %6725 = vmatprep.mubr.bf16.mxu0 %v291_v58  ;;  %v10824_v29 = vld [vmem:[#allocation5 + $0x3f0] sm:$0xff]  }
  0xa3   :  { %6766 = vmatprep.mubr.bf16.mxu1 %v293_v62  ;;  %v10841_v58 = vld [vmem:[#allocation5 + $0x410] sm:$0xff]   ;;  %v10845_v62 = vld [vmem:[#allocation5 + $0x418] sm:$0xff]  }
  0xa4   :  { %9596 = vmatpush3.bf16.msra.mxu0 %v10773_v30  ;;  %v10825_v30 = vld [vmem:[#allocation5 + $0x330] sm:$0xff]  }
  0xa5   :  { %9618 = vmatpush3.bf16.msra.mxu1 %v10774_v31  ;;  %9597 = vmatprep.subr.bf16.mxu0 %v10775_v32  ;;  %v10826_v31 = vld [vmem:[#allocation5 + $0x3b0] sm:$0xff]   ;;  %v10827_v32 = vld [vmem:[#allocation5 + $0x378] sm:$0xff]  }
  0xa6   :  { %9619 = vmatprep.subr.bf16.mxu1 %v10776_v33  ;;  %v10828_v33 = vld [vmem:[#allocation5 + $0x3f8] sm:$0xff]  }
  0xa8   :  { %9598 = vmatpush3.bf16.msra.mxu0 %v10777_v34  ;;  %v10829_v34 = vld [vmem:[#allocation5 + $0x338] sm:$0xff]  }
  0xa9   :  { %9620 = vmatpush3.bf16.msra.mxu1 %v10778_v35  ;;  %9599 = vmatprep.subr.bf16.mxu0 %v10779_v36  ;;  %v10830_v35 = vld [vmem:[#allocation5 + $0x3b8] sm:$0xff]   ;;  %v103_v36 = vld [vmem:[#allocation2 + $0x68] sm:$0xff] }
  0xaa   :  { %9621 = vmatprep.subr.bf16.mxu1 %v10780_v37  ;;  %v199_v37 = vld [vmem:[#allocation2 + $0x368] sm:$0xff] }
  0xac   :  { %9600 = vmatpush3.bf16.msra.mxu0 %v10781_v38  ;;  %v105_v38 = vld [vmem:[#allocation2 + $0x78] sm:$0xff] }
  0xad   :  { %9622 = vmatpush3.bf16.msra.mxu1 %v10782_v39  ;;  %9601 = vmatprep.subr.bf16.mxu0 %v10783_v40  ;;  %v295_v39 = vpack.c.bf16 %v199_v37, %v103_v36  ;;  %v201_v40 = vld [vmem:[#allocation2 + $0x378] sm:$0xff]  ;;  %v10871_v36 = vld [vmem:[#allocation5 + $0x550] sm:$0xff]  }
  0xae   :  { %9623 = vmatprep.subr.bf16.mxu1 %v10784_v41  ;;  %v102_v41 = vld [vmem:[#allocation2 + $0x60] sm:$0xff]  ;;  %v10872_v37 = vld [vmem:[#allocation5 + $0x5d0] sm:$0xff]  }
  0xb0   :  { %9602 = vmatpush3.bf16.msra.mxu0 %v10785_v42  ;;  %v198_v42 = vld [vmem:[#allocation2 + $0x360] sm:$0xff] }
  0xb1   :  { %9624 = vmatpush3.bf16.msra.mxu1 %v10786_v43  ;;  %9603 = vmatprep.subr.bf16.mxu0 %v10787_v44  ;;  %v297_v43 = vpack.c.bf16 %v201_v40, %v105_v38  ;;  %v294_v44 = vpack.c.bf16 %v198_v42, %v102_v41  ;;  %v10873_v38 = vld [vmem:[#allocation5 + $0x510] sm:$0xff]   ;;  %v10875_v40 = vld [vmem:[#allocation5 + $0x558] sm:$0xff]  }
  0xb2   :  { %9625 = vmatprep.subr.bf16.mxu1 %v10788_v45  ;;  %v104_v45 = vld [vmem:[#allocation2 + $0x70] sm:$0xff]  ;;  %v10876_v41 = vld [vmem:[#allocation5 + $0x5d8] sm:$0xff]  }
  0xb3   :  { %v10877_v42 = vld [vmem:[#allocation5 + $0x518] sm:$0xff]  }
  0xb4   :  { %9604 = vmatpush3.bf16.msra.mxu0 %v10789_v46  ;;  %v200_v46 = vld [vmem:[#allocation2 + $0x370] sm:$0xff] }
  0xb5   :  { %9626 = vmatpush3.bf16.msra.mxu1 %v10790_v47  ;;  %9605 = vmatprep.subr.bf16.mxu0 %v10791_v48  ;;  %v296_v47 = vpack.c.bf16 %v200_v46, %v104_v45  ;;  %v10831_v48 = vld [vmem:[#allocation5 + $0x440] sm:$0xff]  }
  0xb6   :  { %9627 = vmatprep.subr.bf16.mxu1 %v10792_v49  ;;  %v10832_v49 = vld [vmem:[#allocation5 + $0x4c0] sm:$0xff]  }
  0xb7   :  { %v10880_v45 = vld [vmem:[#allocation5 + $0x5e0] sm:$0xff]  }
  0xb8   :  { %9606 = vmatpush3.bf16.msra.mxu0 %v10793_v50  ;;  %v10833_v50 = vld [vmem:[#allocation5 + $0x400] sm:$0xff]  }
  0xb9   :  { %9628 = vmatpush3.bf16.msra.mxu1 %v10794_v51  ;;  %9607 = vmatprep.subr.bf16.mxu0 %v10795_v52  ;;  %v10834_v51 = vld [vmem:[#allocation5 + $0x480] sm:$0xff]   ;;  %v10835_v52 = vld [vmem:[#allocation5 + $0x448] sm:$0xff]  }
  0xba   :  { %9629 = vmatprep.subr.bf16.mxu1 %v10796_v53  ;;  %v10836_v53 = vld [vmem:[#allocation5 + $0x4c8] sm:$0xff]   ;;  %v10881_v46 = vld [vmem:[#allocation5 + $0x520] sm:$0xff]  }
  0xbc   :  { %9608 = vmatpush3.bf16.msra.mxu0 %v10797_v54  ;;  %v10837_v54 = vld [vmem:[#allocation5 + $0x408] sm:$0xff]  }
  0xbd   :  { %9630 = vmatpush3.bf16.msra.mxu1 %v10798_v55  ;;  %9637 = vmatprep.subr.bf16.mxu0 %v10799_v4  ;;  %v10838_v55 = vld [vmem:[#allocation5 + $0x488] sm:$0xff]  }
  0xbe   :  { %9659 = vmatprep.subr.bf16.mxu1 %v10800_v5  ;;  %v10851_v4 = vld [vmem:[#allocation5 + $0x468] sm:$0xff]  }
  0xbf   :  { %6726 = vmatmul.mubr.bf16.vlgmr.msra.gmra.mrb[8].mxu0 %v290_v2  ;;  %v10849_v2 = vld [vmem:[#allocation5 + $0x420] sm:$0xff]   ;;  %v10852_v5 = vld [vmem:[#allocation5 + $0x4e8] sm:$0xff]  }
  0xc0   :  { %6767 = vmatmul.mubr.bf16.vlgmr.msra.gmra.mrb[8].mxu1 %v292_v3  ;;  %9638 = vmatpush3.bf16.msra.mxu0 %v10801_v6  ;;  %v10850_v3 = vld [vmem:[#allocation5 + $0x4a0] sm:$0xff]   ;;  %v10853_v6 = vld [vmem:[#allocation5 + $0x428] sm:$0xff]  }
  0xc1   :  { %9660 = vmatpush3.bf16.msra.mxu1 %v10802_v7  ;;  %9639 = vmatprep.subr.bf16.mxu0 %v10803_v8  ;;  %v10854_v7 = vld [vmem:[#allocation5 + $0x4a8] sm:$0xff]   ;;  %v10855_v8 = vld [vmem:[#allocation5 + $0x470] sm:$0xff]  }
  0xc2   :  { %9661 = vmatprep.subr.bf16.mxu1 %v10804_v9  ;;  %6807 = vmatprep.mubr.bf16.mxu0 %v295_v39  ;;  %v10856_v9 = vld [vmem:[#allocation5 + $0x4f0] sm:$0xff]  }
  0xc3   :  { %6848 = vmatprep.mubr.bf16.mxu1 %v297_v43  ;;  %v10874_v39 = vld [vmem:[#allocation5 + $0x590] sm:$0xff]   ;;  %v10878_v43 = vld [vmem:[#allocation5 + $0x598] sm:$0xff]  }
  0xc4   :  { %9640 = vmatpush3.bf16.msra.mxu0 %v10805_v10  ;;  %v10857_v10 = vld [vmem:[#allocation5 + $0x430] sm:$0xff]  }
  0xc5   :  { %9662 = vmatpush3.bf16.msra.mxu1 %v10806_v11  ;;  %9641 = vmatprep.subr.bf16.mxu0 %v10807_v12  ;;  %v10858_v11 = vld [vmem:[#allocation5 + $0x4b0] sm:$0xff]   ;;  %v10859_v12 = vld [vmem:[#allocation5 + $0x478] sm:$0xff]  }
  0xc6   :  { %9663 = vmatprep.subr.bf16.mxu1 %v10808_v13  ;;  %v10860_v13 = vld [vmem:[#allocation5 + $0x4f8] sm:$0xff]  }
  0xc8   :  { %9642 = vmatpush3.bf16.msra.mxu0 %v10809_v14  ;;  %v10861_v14 = vld [vmem:[#allocation5 + $0x438] sm:$0xff]  }
  0xc9   :  { %9664 = vmatpush3.bf16.msra.mxu1 %v10810_v15  ;;  %9643 = vmatprep.subr.bf16.mxu0 %v10811_v16  ;;  %v10862_v15 = vld [vmem:[#allocation5 + $0x4b8] sm:$0xff]   ;;  %v107_v16 = vld [vmem:[#allocation2 + $0x88] sm:$0xff] }
  0xca   :  { %9665 = vmatprep.subr.bf16.mxu1 %v10812_v17  ;;  %v203_v17 = vld [vmem:[#allocation2 + $0x388] sm:$0xff] }
  0xcc   :  { %9644 = vmatpush3.bf16.msra.mxu0 %v10813_v18  ;;  %v109_v18 = vld [vmem:[#allocation2 + $0x98] sm:$0xff] }
  0xcd   :  { %9666 = vmatpush3.bf16.msra.mxu1 %v10814_v19  ;;  %9645 = vmatprep.subr.bf16.mxu0 %v10815_v20  ;;  %v205_v19 = vld [vmem:[#allocation2 + $0x398] sm:$0xff]  ;;  %v299_v20 = vpack.c.bf16 %v203_v17, %v107_v16  ;;  %v10903_v16 = vld [vmem:[#allocation5 + $0x650] sm:$0xff]  }
  0xce   :  { %9667 = vmatprep.subr.bf16.mxu1 %v10816_v21  ;;  %v301_v21 = vpack.c.bf16 %v205_v19, %v109_v18  ;;  %v10904_v17 = vld [vmem:[#allocation5 + $0x6d0] sm:$0xff]  }
  0xcf   :  { %v10905_v18 = vld [vmem:[#allocation5 + $0x610] sm:$0xff]  }
  0xd0   :  { %9646 = vmatpush3.bf16.msra.mxu0 %v10817_v22  ;;  %v106_v22 = vld [vmem:[#allocation2 + $0x80] sm:$0xff]  ;;  %v10906_v19 = vld [vmem:[#allocation5 + $0x690] sm:$0xff]  }
  0xd1   :  { %9668 = vmatpush3.bf16.msra.mxu1 %v10818_v23  ;;  %9647 = vmatprep.subr.bf16.mxu0 %v10819_v24  ;;  %v202_v23 = vld [vmem:[#allocation2 + $0x380] sm:$0xff]  ;;  %v108_v24 = vld [vmem:[#allocation2 + $0x90] sm:$0xff] }
  0xd2   :  { %9669 = vmatprep.subr.bf16.mxu1 %v10820_v25  ;;  %v298_v25 = vpack.c.bf16 %v202_v23, %v106_v22  ;;  %v10909_v22 = vld [vmem:[#allocation5 + $0x618] sm:$0xff]  }
  0xd3   :  { %v10910_v23 = vld [vmem:[#allocation5 + $0x698] sm:$0xff]  }
  0xd4   :  { %9648 = vmatpush3.bf16.msra.mxu0 %v10821_v26  ;;  %v204_v26 = vld [vmem:[#allocation2 + $0x390] sm:$0xff] }
  0xd5   :  { %9670 = vmatpush3.bf16.msra.mxu1 %v10822_v27  ;;  %9649 = vmatprep.subr.bf16.mxu0 %v10823_v28  ;;  %v300_v27 = vpack.c.bf16 %v204_v26, %v108_v24  ;;  %v10863_v28 = vld [vmem:[#allocation5 + $0x540] sm:$0xff]  }
  0xd6   :  { %9671 = vmatprep.subr.bf16.mxu1 %v10824_v29  ;;  %v10864_v29 = vld [vmem:[#allocation5 + $0x5c0] sm:$0xff]  }
  0xd7   :  { %v10911_v24 = vld [vmem:[#allocation5 + $0x660] sm:$0xff]  }
  0xd8   :  { %9650 = vmatpush3.bf16.msra.mxu0 %v10825_v30  ;;  %v10865_v30 = vld [vmem:[#allocation5 + $0x500] sm:$0xff]  }
  0xd9   :  { %9672 = vmatpush3.bf16.msra.mxu1 %v10826_v31  ;;  %9651 = vmatprep.subr.bf16.mxu0 %v10827_v32  ;;  %v10866_v31 = vld [vmem:[#allocation5 + $0x580] sm:$0xff]   ;;  %v10867_v32 = vld [vmem:[#allocation5 + $0x548] sm:$0xff]  }
  0xda   :  { %9673 = vmatprep.subr.bf16.mxu1 %v10828_v33  ;;  %v10868_v33 = vld [vmem:[#allocation5 + $0x5c8] sm:$0xff]   ;;  %v10913_v26 = vld [vmem:[#allocation5 + $0x620] sm:$0xff]  }
  0xdc   :  { %9652 = vmatpush3.bf16.msra.mxu0 %v10829_v34  ;;  %v10869_v34 = vld [vmem:[#allocation5 + $0x508] sm:$0xff]  }
  0xdd   :  { %9674 = vmatpush3.bf16.msra.mxu1 %v10830_v35  ;;  %9681 = vmatprep.subr.bf16.mxu0 %v10831_v48  ;;  %v10870_v35 = vld [vmem:[#allocation5 + $0x588] sm:$0xff]  }
  0xde   :  { %9703 = vmatprep.subr.bf16.mxu1 %v10832_v49  ;;  %v10883_v48 = vld [vmem:[#allocation5 + $0x568] sm:$0xff]  }
  0xdf   :  { %6808 = vmatmul.mubr.bf16.vlgmr.msra.gmra.mrb[12].mxu0 %v294_v44  ;;  %v10879_v44 = vld [vmem:[#allocation5 + $0x560] sm:$0xff]   ;;  %v10884_v49 = vld [vmem:[#allocation5 + $0x5e8] sm:$0xff]  }
  0xe0   :  { %6849 = vmatmul.mubr.bf16.vlgmr.msra.gmra.mrb[12].mxu1 %v296_v47  ;;  %9682 = vmatpush3.bf16.msra.mxu0 %v10833_v50  ;;  %v10882_v47 = vld [vmem:[#allocation5 + $0x5a0] sm:$0xff]   ;;  %v10885_v50 = vld [vmem:[#allocation5 + $0x528] sm:$0xff]  }
  0xe1   :  { %9704 = vmatpush3.bf16.msra.mxu1 %v10834_v51  ;;  %9683 = vmatprep.subr.bf16.mxu0 %v10835_v52  ;;  %v10886_v51 = vld [vmem:[#allocation5 + $0x5a8] sm:$0xff]   ;;  %v10887_v52 = vld [vmem:[#allocation5 + $0x570] sm:$0xff]  }
  0xe2   :  { %9705 = vmatprep.subr.bf16.mxu1 %v10836_v53  ;;  %6889 = vmatprep.mubr.bf16.mxu0 %v299_v20  ;;  %v10888_v53 = vld [vmem:[#allocation5 + $0x5f0] sm:$0xff]   ;;  %v10907_v20 = vld [vmem:[#allocation5 + $0x658] sm:$0xff]  }
  0xe3   :  { %6930 = vmatprep.mubr.bf16.mxu1 %v301_v21  ;;  %v10908_v21 = vld [vmem:[#allocation5 + $0x6d8] sm:$0xff]  }
  0xe4   :  { %9684 = vmatpush3.bf16.msra.mxu0 %v10837_v54  ;;  %v10889_v54 = vld [vmem:[#allocation5 + $0x530] sm:$0xff]  }
  0xe5   :  { %9706 = vmatpush3.bf16.msra.mxu1 %v10838_v55  ;;  %9685 = vmatprep.subr.bf16.mxu0 %v10839_v56  ;;  %v10890_v55 = vld [vmem:[#allocation5 + $0x5b0] sm:$0xff]   ;;  %v10891_v56 = vld [vmem:[#allocation5 + $0x578] sm:$0xff]  }
  0xe6   :  { %9707 = vmatprep.subr.bf16.mxu1 %v10840_v57  ;;  %v10892_v57 = vld [vmem:[#allocation5 + $0x5f8] sm:$0xff]  }
  0xe8   :  { %9686 = vmatpush3.bf16.msra.mxu0 %v10841_v58  ;;  %v10893_v58 = vld [vmem:[#allocation5 + $0x538] sm:$0xff]  }
  0xe9   :  { %9708 = vmatpush3.bf16.msra.mxu1 %v10842_v59  ;;  %9687 = vmatprep.subr.bf16.mxu0 %v10843_v60  ;;  %v10894_v59 = vld [vmem:[#allocation5 + $0x5b8] sm:$0xff]   ;;  %v111_v60 = vld [vmem:[#allocation2 + $0xa8] sm:$0xff] }
  0xea   :  { %9709 = vmatprep.subr.bf16.mxu1 %v10844_v61  ;;  %v207_v61 = vld [vmem:[#allocation2 + $0x3a8] sm:$0xff] }
  0xec   :  { %9688 = vmatpush3.bf16.msra.mxu0 %v10845_v62  ;;  %v303_v62 = vpack.c.bf16 %v207_v61, %v111_v60  ;;  %v10933_v60 = vld [vmem:[#allocation5 + $0x708] sm:$0xff]  }
  0xed   :  { %9710 = vmatpush3.bf16.msra.mxu1 %v10846_v63  ;;  %9689 = vmatprep.subr.bf16.mxu0 %v10847_v0  ;;  %v113_v63 = vld [vmem:[#allocation2 + $0xb8] sm:$0xff] }
  0xee   :  { %9711 = vmatprep.subr.bf16.mxu1 %v10848_v1  ;;  %v209_v0 = vld [vmem:[#allocation2 + $0x3b8] sm:$0xff]  ;;  %v110_v1 = vld [vmem:[#allocation2 + $0xa0] sm:$0xff] }
  0xf0   :  { %9690 = vmatpush3.bf16.msra.mxu0 %v10849_v2  ;;  %v305_v2 = vpack.c.bf16 %v209_v0, %v113_v63 }
  0xf1   :  { %9712 = vmatpush3.bf16.msra.mxu1 %v10850_v3  ;;  %9691 = vmatprep.subr.bf16.mxu0 %v10851_v4  ;;  %v206_v3 = vld [vmem:[#allocation2 + $0x3a0] sm:$0xff]  ;;  %v112_v4 = vld [vmem:[#allocation2 + $0xb0] sm:$0xff] }
  0xf2   :  { %9713 = vmatprep.subr.bf16.mxu1 %v10852_v5  ;;  %v208_v5 = vld [vmem:[#allocation2 + $0x3b0] sm:$0xff] }
  0xf4   :  { %9692 = vmatpush3.bf16.msra.mxu0 %v10853_v6  ;;  %v302_v6 = vpack.c.bf16 %v206_v3, %v110_v1  ;;  %v10935_v1 = vld [vmem:[#allocation5 + $0x750] sm:$0xff]  }
  0xf5   :  { %9714 = vmatpush3.bf16.msra.mxu1 %v10854_v7  ;;  %9693 = vmatprep.subr.bf16.mxu0 %v10855_v8  ;;  %v304_v7 = vpack.c.bf16 %v208_v5, %v112_v4  ;;  %v10895_v8 = vld [vmem:[#allocation5 + $0x640] sm:$0xff]   ;;  %v10936_v4 = vld [vmem:[#allocation5 + $0x7d0] sm:$0xff]  }
  0xf6   :  { %9715 = vmatprep.subr.bf16.mxu1 %v10856_v9  ;;  %v10896_v9 = vld [vmem:[#allocation5 + $0x6c0] sm:$0xff]  }
  0xf8   :  { %9694 = vmatpush3.bf16.msra.mxu0 %v10857_v10  ;;  %v10897_v10 = vld [vmem:[#allocation5 + $0x600] sm:$0xff]  }
  0xf9   :  { %9716 = vmatpush3.bf16.msra.mxu1 %v10858_v11  ;;  %9695 = vmatprep.subr.bf16.mxu0 %v10859_v12  ;;  %v10898_v11 = vld [vmem:[#allocation5 + $0x680] sm:$0xff]   ;;  %v10899_v12 = vld [vmem:[#allocation5 + $0x648] sm:$0xff]  }
  0xfa   :  { %9717 = vmatprep.subr.bf16.mxu1 %v10860_v13  ;;  %v10900_v13 = vld [vmem:[#allocation5 + $0x6c8] sm:$0xff]  }
  0xfc   :  { %9696 = vmatpush3.bf16.msra.mxu0 %v10861_v14  ;;  %v10901_v14 = vld [vmem:[#allocation5 + $0x608] sm:$0xff]  }
  0xfd   :  { %9718 = vmatpush3.bf16.msra.mxu1 %v10862_v15  ;;  %9725 = vmatprep.subr.bf16.mxu0 %v10863_v28  ;;  %v10902_v15 = vld [vmem:[#allocation5 + $0x688] sm:$0xff]  }
  0xfe   :  { %9747 = vmatprep.subr.bf16.mxu1 %v10864_v29  ;;  %v10915_v28 = vld [vmem:[#allocation5 + $0x668] sm:$0xff]  }
  0xff   :  { %6890 = vmatmul.mubr.bf16.vlgmr.msra.gmra.mrb[16].mxu0 %v298_v25  ;;  %v10912_v25 = vld [vmem:[#allocation5 + $0x6e0] sm:$0xff]   ;;  %v10916_v29 = vld [vmem:[#allocation5 + $0x6e8] sm:$0xff]  }
 0x100   :  { %6931 = vmatmul.mubr.bf16.vlgmr.msra.gmra.mrb[16].mxu1 %v300_v27  ;;  %9726 = vmatpush3.bf16.msra.mxu0 %v10865_v30  ;;  %v10914_v27 = vld [vmem:[#allocation5 + $0x6a0] sm:$0xff]   ;;  %v10917_v30 = vld [vmem:[#allocation5 + $0x628] sm:$0xff]  }
 0x101   :  { %9748 = vmatpush3.bf16.msra.mxu1 %v10866_v31  ;;  %9727 = vmatprep.subr.bf16.mxu0 %v10867_v32  ;;  %v10918_v31 = vld [vmem:[#allocation5 + $0x6a8] sm:$0xff]   ;;  %v10919_v32 = vld [vmem:[#allocation5 + $0x670] sm:$0xff]  }
 0x102   :  { %9749 = vmatprep.subr.bf16.mxu1 %v10868_v33  ;;  %6971 = vmatprep.mubr.bf16.mxu0 %v303_v62  ;;  %v10920_v33 = vld [vmem:[#allocation5 + $0x6f0] sm:$0xff]   ;;  %v10934_v62 = vld [vmem:[#allocation5 + $0x788] sm:$0xff]  }
 0x103   :  { %7012 = vmatprep.mubr.bf16.mxu1 %v305_v2 }
 0x104   :  { %9728 = vmatpush3.bf16.msra.mxu0 %v10869_v34  ;;  %v10921_v34 = vld [vmem:[#allocation5 + $0x630] sm:$0xff]  }
 0x105   :  { %9750 = vmatpush3.bf16.msra.mxu1 %v10870_v35  ;;  %9729 = vmatprep.subr.bf16.mxu0 %v10871_v36  ;;  %v10922_v35 = vld [vmem:[#allocation5 + $0x6b0] sm:$0xff]   ;;  %v10923_v36 = vld [vmem:[#allocation5 + $0x678] sm:$0xff]  }
 0x106   :  { %9751 = vmatprep.subr.bf16.mxu1 %v10872_v37  ;;  %v10924_v37 = vld [vmem:[#allocation5 + $0x6f8] sm:$0xff]  }
 0x108   :  { %9730 = vmatpush3.bf16.msra.mxu0 %v10873_v38  ;;  %v10925_v38 = vld [vmem:[#allocation5 + $0x638] sm:$0xff]  }
 0x109   :  { %9752 = vmatpush3.bf16.msra.mxu1 %v10874_v39  ;;  %9731 = vmatprep.subr.bf16.mxu0 %v10875_v40  ;;  %v10926_v39 = vld [vmem:[#allocation5 + $0x6b8] sm:$0xff]   ;;  %v115_v40 = vld [vmem:[#allocation2 + $0xc8] sm:$0xff] }
 0x10a   :  { %9753 = vmatprep.subr.bf16.mxu1 %v10876_v41  ;;  %v211_v41 = vld [vmem:[#allocation2 + $0x3c8] sm:$0xff] }
 0x10c   :  { %9732 = vmatpush3.bf16.msra.mxu0 %v10877_v42  ;;  %v117_v42 = vld [vmem:[#allocation2 + $0xd8] sm:$0xff] }
 0x10d   :  { %9754 = vmatpush3.bf16.msra.mxu1 %v10878_v43  ;;  %9733 = vmatprep.subr.bf16.mxu0 %v10879_v44  ;;  %v307_v43 = vpack.c.bf16 %v211_v41, %v115_v40  ;;  %v213_v44 = vld [vmem:[#allocation2 + $0x3d8] sm:$0xff] }
 0x10e   :  { %9755 = vmatprep.subr.bf16.mxu1 %v10880_v45  ;;  %v114_v45 = vld [vmem:[#allocation2 + $0xc0] sm:$0xff]  ;;  %v217_v41 = vld [vmem:[#allocation2 + $0x3f8] sm:$0xff] }
 0x110   :  { %9734 = vmatpush3.bf16.msra.mxu0 %v10881_v46  ;;  %v210_v46 = vld [vmem:[#allocation2 + $0x3c0] sm:$0xff] }
 0x111   :  { %9756 = vmatpush3.bf16.msra.mxu1 %v10882_v47  ;;  %9735 = vmatprep.subr.bf16.mxu0 %v10883_v48  ;;  %v309_v47 = vpack.c.bf16 %v213_v44, %v117_v42  ;;  %v306_v48 = vpack.c.bf16 %v210_v46, %v114_v45  ;;  %v118_v42 = vld [vmem:[#allocation2 + $0xe0] sm:$0xff]  ;;  %v120_v46 = vld [vmem:[#allocation2 + $0xf0] sm:$0xff] }
 0x112   :  { %9757 = vmatprep.subr.bf16.mxu1 %v10884_v49  ;;  %v116_v49 = vld [vmem:[#allocation2 + $0xd0] sm:$0xff] }
 0x114   :  { %9736 = vmatpush3.bf16.msra.mxu0 %v10885_v50  ;;  %v212_v50 = vld [vmem:[#allocation2 + $0x3d0] sm:$0xff] }
 0x115   :  { %9758 = vmatpush3.bf16.msra.mxu1 %v10886_v51  ;;  %9737 = vmatprep.subr.bf16.mxu0 %v10887_v52  ;;  %v308_v51 = vpack.c.bf16 %v212_v50, %v116_v49  ;;  %v10927_v52 = vld [vmem:[#allocation5 + $0x740] sm:$0xff]  }
 0x116   :  { %9759 = vmatprep.subr.bf16.mxu1 %v10888_v53  ;;  %v10928_v53 = vld [vmem:[#allocation5 + $0x7c0] sm:$0xff]  }
 0x117   :  { %v10959_v49 = vld [vmem:[#allocation5 + $0x840] sm:$0xff]  }
 0x118   :  { %9738 = vmatpush3.bf16.msra.mxu0 %v10889_v54  ;;  %v10929_v54 = vld [vmem:[#allocation5 + $0x700] sm:$0xff]  }
 0x119   :  { %9760 = vmatpush3.bf16.msra.mxu1 %v10890_v55  ;;  %9739 = vmatprep.subr.bf16.mxu0 %v10891_v56  ;;  %v10930_v55 = vld [vmem:[#allocation5 + $0x780] sm:$0xff]   ;;  %v10931_v56 = vld [vmem:[#allocation5 + $0x748] sm:$0xff]  }
 0x11a   :  { %9761 = vmatprep.subr.bf16.mxu1 %v10892_v57  ;;  %v10960_v50 = vld [vmem:[#allocation5 + $0x8c0] sm:$0xff]  }
 0x11c   :  { %9740 = vmatpush3.bf16.msra.mxu0 %v10893_v58  ;;  %v10932_v58 = vld [vmem:[#allocation5 + $0x7c8] sm:$0xff]  }
 0x11d   :  { %9762 = vmatpush3.bf16.msra.mxu1 %v10894_v59  ;;  %9769 = vmatprep.subr.bf16.mxu0 %v10895_v8  ;;  %v10938_v8 = vld [vmem:[#allocation5 + $0x790] sm:$0xff]  }
 0x11e   :  { %9791 = vmatprep.subr.bf16.mxu1 %v10896_v9 }
 0x11f   :  { %6972 = vmatmul.mubr.bf16.vlgmr.msra.gmra.mrb[20].mxu0 %v302_v6  ;;  %v10937_v6 = vld [vmem:[#allocation5 + $0x710] sm:$0xff]  }
 0x120   :  { %7013 = vmatmul.mubr.bf16.vlgmr.msra.gmra.mrb[20].mxu1 %v304_v7  ;;  %9770 = vmatpush3.bf16.msra.mxu0 %v10897_v10 }
 0x121   :  { %9792 = vmatpush3.bf16.msra.mxu1 %v10898_v11  ;;  %9771 = vmatprep.subr.bf16.mxu0 %v10899_v12  ;;  %v10939_v11 = vld [vmem:[#allocation5 + $0x758] sm:$0xff]  }
 0x122   :  { %9793 = vmatprep.subr.bf16.mxu1 %v10900_v13  ;;  %7053 = vmatprep.mubr.bf16.mxu0 %v307_v43  ;;  %v10940_v13 = vld [vmem:[#allocation5 + $0x7d8] sm:$0xff]   ;;  %v214_v43 = vld [vmem:[#allocation2 + $0x3e0] sm:$0xff] }
 0x123   :  { %7094 = vmatprep.mubr.bf16.mxu1 %v309_v47  ;;  %v310_v45 = vpack.c.bf16 %v214_v43, %v118_v42  ;;  %v216_v47 = vld [vmem:[#allocation2 + $0x3f0] sm:$0xff] }
 0x124   :  { %9772 = vmatpush3.bf16.msra.mxu0 %v10901_v14  ;;  %v10941_v14 = vld [vmem:[#allocation5 + $0x718] sm:$0xff]   ;;  %v220_v43 = vld [vmem:[#allocation2 + $0x410] sm:$0xff] }
 0x125   :  { %9794 = vmatpush3.bf16.msra.mxu1 %v10902_v15  ;;  %9773 = vmatprep.subr.bf16.mxu0 %v10903_v16  ;;  %v10942_v15 = vld [vmem:[#allocation5 + $0x798] sm:$0xff]   ;;  %v10943_v16 = vld [vmem:[#allocation5 + $0x760] sm:$0xff]  }
 0x126   :  { %9795 = vmatprep.subr.bf16.mxu1 %v10904_v17  ;;  %v10944_v17 = vld [vmem:[#allocation5 + $0x7e0] sm:$0xff]  }
 0x128   :  { %9774 = vmatpush3.bf16.msra.mxu0 %v10905_v18  ;;  %v10945_v18 = vld [vmem:[#allocation5 + $0x720] sm:$0xff]  }
 0x129   :  { %9796 = vmatpush3.bf16.msra.mxu1 %v10906_v19  ;;  %9775 = vmatprep.subr.bf16.mxu0 %v10907_v20  ;;  %v10946_v19 = vld [vmem:[#allocation5 + $0x7a0] sm:$0xff]  }
 0x12a   :  { %9797 = vmatprep.subr.bf16.mxu1 %v10908_v21  ;;  %v8730_v20 = vld [vmem:[#allocation7] ss:$0 sm:$0xff] }
 0x12c   :  { %9776 = vmatpush3.bf16.msra.mxu0 %v10909_v22  ;;  %v10947_v22 = vld [vmem:[#allocation5 + $0x768] sm:$0xff]  }
 0x12d   :  { %9798 = vmatpush3.bf16.msra.mxu1 %v10910_v23  ;;  %9777 = vmatprep.subr.bf16.mxu0 %v10911_v24  ;;  %v10948_v24 = vld [vmem:[#allocation5 + $0x7e8] sm:$0xff]  }
 0x12e   :  { %9799 = vmatprep.subr.bf16.mxu1 %v10912_v25 }
 0x130   :  { %9778 = vmatpush3.bf16.msra.mxu0 %v10913_v26  ;;  %v10949_v26 = vld [vmem:[#allocation5 + $0x728] sm:$0xff]  }
 0x131   :  { %9800 = vmatpush3.bf16.msra.mxu1 %v10914_v27  ;;  %9779 = vmatprep.subr.bf16.mxu0 %v10915_v28  ;;  %v10950_v28 = vld [vmem:[#allocation5 + $0x7a8] sm:$0xff]  }
 0x132   :  { %9801 = vmatprep.subr.bf16.mxu1 %v10916_v29  ;;  %v10951_v29 = vld [vmem:[#allocation5 + $0x770] sm:$0xff]  }
 0x134   :  { %9780 = vmatpush3.bf16.msra.mxu0 %v10917_v30  ;;  %v10952_v30 = vld [vmem:[#allocation5 + $0x7f0] sm:$0xff]  }
 0x135   :  { %9802 = vmatpush3.bf16.msra.mxu1 %v10918_v31  ;;  %9781 = vmatprep.subr.bf16.mxu0 %v10919_v32  ;;  %v10953_v31 = vld [vmem:[#allocation5 + $0x730] sm:$0xff]  }
 0x136   :  { %9803 = vmatprep.subr.bf16.mxu1 %v10920_v33  ;;  %v10954_v32 = vld [vmem:[#allocation5 + $0x7b0] sm:$0xff]   ;;  %v10955_v33 = vld [vmem:[#allocation5 + $0x778] sm:$0xff]  }
 0x138   :  { %9782 = vmatpush3.bf16.msra.mxu0 %v10921_v34  ;;  %v10956_v34 = vld [vmem:[#allocation5 + $0x7f8] sm:$0xff]  }
 0x139   :  { %9804 = vmatpush3.bf16.msra.mxu1 %v10922_v35  ;;  %9783 = vmatprep.subr.bf16.mxu0 %v10923_v36  ;;  %v10957_v35 = vld [vmem:[#allocation5 + $0x738] sm:$0xff]  }
 0x13a   :  { %9805 = vmatprep.subr.bf16.mxu1 %v10924_v37  ;;  %v10958_v36 = vld [vmem:[#allocation5 + $0x7b8] sm:$0xff]   ;;  %v119_v37 = vld [vmem:[#allocation2 + $0xe8] sm:$0xff] }
 0x13c   :  { %9784 = vmatpush3.bf16.msra.mxu0 %v10925_v38  ;;  %v215_v38 = vld [vmem:[#allocation2 + $0x3e8] sm:$0xff] }
 0x13d   :  { %9806 = vmatpush3.bf16.msra.mxu1 %v10926_v39  ;;  %9813 = vmatprep.subr.bf16.mxu0 %v10927_v52  ;;  %v121_v39 = vld [vmem:[#allocation2 + $0xf8] sm:$0xff]  ;;  %v311_v40 = vpack.c.bf16 %v215_v38, %v119_v37  ;;  %v10962_v52 = vld [vmem:[#allocation5 + $0x880] sm:$0xff]  }
 0x13e   :  { %9835 = vmatprep.subr.bf16.mxu1 %v10928_v53  ;;  %v313_v44 = vpack.c.bf16 %v217_v41, %v121_v39  ;;  %v10963_v53 = vld [vmem:[#allocation5 + $0x848] sm:$0xff]   ;;  %v122_v39 = vld [vmem:[#allocation2 + $0x100] sm:$0xff]  ;;  %v124_v41 = vld [vmem:[#allocation2 + $0x110] sm:$0xff] }
 0x13f   :  { %7054 = vmatmul.mubr.bf16.vlgmr.msra.gmra.mrb[24].mxu0 %v306_v48  ;;  %v312_v48 = vpack.c.bf16 %v216_v47, %v120_v46  ;;  %v10992_v46 = vld [vmem:[#allocation5 + $0x9c0] sm:$0xff]  }
 0x140   :  { %7095 = vmatmul.mubr.bf16.vlgmr.msra.gmra.mrb[24].mxu1 %v308_v51  ;;  %9814 = vmatpush3.bf16.msra.mxu0 %v10929_v54  ;;  %v10961_v51 = vld [vmem:[#allocation5 + $0x800] sm:$0xff]  }
 0x141   :  { %9836 = vmatpush3.bf16.msra.mxu1 %v10930_v55  ;;  %9815 = vmatprep.subr.bf16.mxu0 %v10931_v56  ;;  %v10964_v55 = vld [vmem:[#allocation5 + $0x8c8] sm:$0xff]   ;;  %v10993_v47 = vld [vmem:[#allocation5 + $0x900] sm:$0xff]  }
 0x142   :  { %9837 = vmatprep.subr.bf16.mxu1 %v10932_v58  ;;  %7135 = vmatprep.mubr.bf16.mxu0 %v311_v40  ;;  %v218_v40 = vld [vmem:[#allocation2 + $0x400] sm:$0xff] }
 0x143   :  { %7176 = vmatprep.mubr.bf16.mxu1 %v313_v44  ;;  %v314_v42 = vpack.c.bf16 %v218_v40, %v122_v39  ;;  %v316_v44 = vpack.c.bf16 %v220_v43, %v124_v41  ;;  %v11023_v41 = vld [vmem:[#allocation5 + $0xa40] sm:$0xff]  }
 0x144   :  { %9816 = vmatpush3.bf16.msra.mxu0 %v10933_v60  ;;  %v11025_v43 = vld [vmem:[#allocation5 + $0xa00] sm:$0xff]  }
 0x145   :  { %9838 = vmatpush3.bf16.msra.mxu1 %v10934_v62  ;;  %9817 = vmatprep.subr.bf16.mxu0 %v10935_v1  ;;  %v10967_v62 = vld [vmem:[#allocation5 + $0x850] sm:$0xff]  }
 0x146   :  { %9839 = vmatprep.subr.bf16.mxu1 %v10936_v4  ;;  %v10968_v1 = vld [vmem:[#allocation5 + $0x8d0] sm:$0xff]  }
 0x147   :  { %v10969_v4 = vld [vmem:[#allocation5 + $0x810] sm:$0xff]  }
 0x148   :  { %9818 = vmatpush3.bf16.msra.mxu0 %v10937_v6  ;;  %v10970_v6 = vld [vmem:[#allocation5 + $0x890] sm:$0xff]  }
 0x149   :  { %9840 = vmatpush3.bf16.msra.mxu1 %v10938_v8  ;;  %9819 = vmatprep.subr.bf16.mxu0 %v10939_v11 }
 0x14a   :  { %9841 = vmatprep.subr.bf16.mxu1 %v10940_v13 }
 0x14c   :  { %9820 = vmatpush3.bf16.msra.mxu0 %v10941_v14  ;;  %v10973_v14 = vld [vmem:[#allocation5 + $0x818] sm:$0xff]  }
 0x14d   :  { %9842 = vmatpush3.bf16.msra.mxu1 %v10942_v15  ;;  %9821 = vmatprep.subr.bf16.mxu0 %v10943_v16  ;;  %v10974_v15 = vld [vmem:[#allocation5 + $0x898] sm:$0xff]  }
 0x14e   :  { %9843 = vmatprep.subr.bf16.mxu1 %v10944_v17  ;;  %v10975_v17 = vld [vmem:[#allocation5 + $0x860] sm:$0xff]  }
 0x150   :  { %9822 = vmatpush3.bf16.msra.mxu0 %v10945_v18  ;;  %v10976_v18 = vld [vmem:[#allocation5 + $0x8e0] sm:$0xff]  }
 0x151   :  { %9844 = vmatpush3.bf16.msra.mxu1 %v10946_v19  ;;  %9823 = vmatprep.subr.bf16.mxu0 %v10947_v22  ;;  %v10977_v19 = vld [vmem:[#allocation5 + $0x820] sm:$0xff]   ;;  %v10980_v22 = vld [vmem:[#allocation5 + $0x8e8] sm:$0xff]  }
 0x152   :  { %v9521_v57 = vpop.f32.mrb[0].mxu0  ;;  %9845 = vmatprep.subr.bf16.mxu1 %v10948_v24  ;;  %v10982_v24 = vld [vmem:[#allocation5 + $0x8a8] sm:$0xff]  }
 0x153   :  { %v9543_v59 = vpop.f32.mrb[0].mxu1  ;;  %v9522_v61 = vpop.f32.mrb[1].mxu0 }
 0x154   :  { %v9523_v63 = vadd.f32 %v9522_v61, %v9521_v57  ;;  %v9544_v0 = vpop.f32.mrb[1].mxu1  ;;  %v9524_v3 = vpop.f32.mrb[2].mxu0  ;;  %9824 = vmatpush3.bf16.msra.mxu0 %v10949_v26  ;;  %v10965_v57 = vld [vmem:[#allocation5 + $0x808] sm:$0xff]   ;;  %v10984_v26 = vld [vmem:[#allocation5 + $0x8f0] sm:$0xff]  }
 0x155   :  { %v9545_v2 = vadd.f32 %v9544_v0, %v9543_v59  ;;  %v9546_v5 = vpop.f32.mrb[2].mxu1  ;;  %v9525_v7 = vpop.f32.mrb[3].mxu0  ;;  %9846 = vmatpush3.bf16.msra.mxu1 %v10950_v28  ;;  %9825 = vmatprep.subr.bf16.mxu0 %v10951_v29  ;;  %v10966_v59 = vld [vmem:[#allocation5 + $0x888] sm:$0xff]   ;;  %v10986_v28 = vld [vmem:[#allocation5 + $0x8b0] sm:$0xff]   ;;  %v10987_v29 = vld [vmem:[#allocation5 + $0x878] sm:$0xff]  }
 0x156   :  { %v9526_v9 = vadd.f32 %v9525_v7, %v9524_v3  ;;  %v9547_v10 = vpop.f32.mrb[3].mxu1  ;;  %v6564_v21 = vadd.f32 %v9523_v63, %v8730_v20  ;;  %9847 = vmatprep.subr.bf16.mxu1 %v10952_v30  ;;  %v10988_v30 = vld [vmem:[#allocation5 + $0x8f8] sm:$0xff]  }
 0x157   :  { %v9548_v12 = vadd.f32 %v9547_v10, %v9546_v5  ;;  %v10971_v10 = vld [vmem:[#allocation5 + $0x858] sm:$0xff]  }
 0x158   :  { %v6567_v23 = vadd.f32 %v9526_v9, %v8730_v20  ;;  %v11731_v25 = vadd.f32 %v9545_v2, %v6564_v21  ;;  %9826 = vmatpush3.bf16.msra.mxu0 %v10953_v31  ;;  %v10978_v20 = vld [vmem:[#allocation5 + $0x8a0] sm:$0xff]   ;;  %v10979_v21 = vld [vmem:[#allocation5 + $0x868] sm:$0xff]   ;;  %v10989_v31 = vld [vmem:[#allocation5 + $0x838] sm:$0xff]  }
 0x159   :  { %9848 = vmatpush3.bf16.msra.mxu1 %v10954_v32  ;;  %9827 = vmatprep.subr.bf16.mxu0 %v10955_v33  ;;  %v10990_v32 = vld [vmem:[#allocation5 + $0x8b8] sm:$0xff]   ;;  %v123_v33 = vld [vmem:[#allocation2 + $0x108] sm:$0xff] }
 0x15a   :  { %v11733_v27 = vadd.f32 %v9548_v12, %v6567_v23  ;;  %9849 = vmatprep.subr.bf16.mxu1 %v10956_v34  ;;  %v10972_v12 = vld [vmem:[#allocation5 + $0x8d8] sm:$0xff]   ;;  %v10981_v23 = vld [vmem:[#allocation5 + $0x828] sm:$0xff]  }
 0x15b   :  { %v219_v34 = vld [vmem:[#allocation2 + $0x408] sm:$0xff] }
 0x15c   :  { %9828 = vmatpush3.bf16.msra.mxu0 %v10957_v35  ;;  %v125_v35 = vld [vmem:[#allocation2 + $0x118] sm:$0xff]  ;;  %v315_v37 = vpack.c.bf16 %v219_v34, %v123_v33  ;;  %v126_v34 = vld [vmem:[#allocation2 + $0x120] sm:$0xff] }
 0x15d   :  { %9850 = vmatpush3.bf16.msra.mxu1 %v10958_v36  ;;  %9857 = vmatprep.subr.bf16.mxu0 %v10959_v49  ;;  %v221_v36 = vld [vmem:[#allocation2 + $0x418] sm:$0xff]  ;;  %v10995_v49 = vld [vmem:[#allocation5 + $0x948] sm:$0xff]  }
 0x15e   :  { %9879 = vmatprep.subr.bf16.mxu1 %v10960_v50  ;;  %v317_v38 = vpack.c.bf16 %v221_v36, %v125_v35  ;;  %v225_v33 = vld [vmem:[#allocation2 + $0x438] sm:$0xff]  ;;  %v222_v36 = vld [vmem:[#allocation2 + $0x420] sm:$0xff] }
 0x15f   :  { %7136 = vmatmul.mubr.bf16.vlgmr.msra.gmra.mrb[28].mxu0 %v310_v45  ;;  %v10991_v45 = vld [vmem:[#allocation5 + $0x940] sm:$0xff]   ;;  %v318_v39 = vpack.c.bf16 %v222_v36, %v126_v34  ;;  %v132_v34 = vld [vmem:[#allocation2 + $0x150] sm:$0xff] }
 0x160   :  { %7177 = vmatmul.mubr.bf16.vlgmr.msra.gmra.mrb[28].mxu1 %v312_v48  ;;  %9858 = vmatpush3.bf16.msra.mxu0 %v10961_v51  ;;  %v10994_v48 = vld [vmem:[#allocation5 + $0x980] sm:$0xff]   ;;  %v10996_v51 = vld [vmem:[#allocation5 + $0x9c8] sm:$0xff]  }
 0x161   :  { %9880 = vmatpush3.bf16.msra.mxu1 %v10962_v52  ;;  %9859 = vmatprep.subr.bf16.mxu0 %v10963_v53  ;;  %v10997_v53 = vld [vmem:[#allocation5 + $0x908] sm:$0xff]  }
 0x162   :  { %9881 = vmatprep.subr.bf16.mxu1 %v10964_v55  ;;  %7217 = vmatprep.mubr.bf16.mxu0 %v315_v37  ;;  %v10998_v55 = vld [vmem:[#allocation5 + $0x988] sm:$0xff]   ;;  %v128_v37 = vld [vmem:[#allocation2 + $0x130] sm:$0xff] }
 0x163   :  { %7258 = vmatprep.mubr.bf16.mxu1 %v317_v38  ;;  %v224_v38 = vld [vmem:[#allocation2 + $0x430] sm:$0xff] }
 0x164   :  { %9860 = vmatpush3.bf16.msra.mxu0 %v10965_v57  ;;  %v320_v40 = vpack.c.bf16 %v224_v38, %v128_v37  ;;  %v11055_v37 = vld [vmem:[#allocation5 + $0xb40] sm:$0xff]  }
 0x165   :  { %9882 = vmatpush3.bf16.msra.mxu1 %v10966_v59  ;;  %9861 = vmatprep.subr.bf16.mxu0 %v10967_v62  ;;  %v11056_v38 = vld [vmem:[#allocation5 + $0xbc0] sm:$0xff]  }
 0x166   :  { %9883 = vmatprep.subr.bf16.mxu1 %v10968_v1 }
 0x168   :  { %9862 = vmatpush3.bf16.msra.mxu0 %v10969_v4 }
 0x169   :  { %9884 = vmatpush3.bf16.msra.mxu1 %v10970_v6  ;;  %9863 = vmatprep.subr.bf16.mxu0 %v10971_v10  ;;  %v11003_v6 = vld [vmem:[#allocation5 + $0x958] sm:$0xff]  }
 0x16a   :  { %9885 = vmatprep.subr.bf16.mxu1 %v10972_v12 }
 0x16c   :  { %9864 = vmatpush3.bf16.msra.mxu0 %v10973_v14  ;;  %v11008_v14 = vld [vmem:[#allocation5 + $0x9e0] sm:$0xff]  }
 0x16d   :  { %9886 = vmatpush3.bf16.msra.mxu1 %v10974_v15  ;;  %9865 = vmatprep.subr.bf16.mxu0 %v10975_v17  ;;  %v11009_v15 = vld [vmem:[#allocation5 + $0x920] sm:$0xff]  }
 0x16e   :  { %9887 = vmatprep.subr.bf16.mxu1 %v10976_v18  ;;  %v11010_v17 = vld [vmem:[#allocation5 + $0x9a0] sm:$0xff]   ;;  %v11011_v18 = vld [vmem:[#allocation5 + $0x968] sm:$0xff]  }
 0x170   :  { %9866 = vmatpush3.bf16.msra.mxu0 %v10977_v19  ;;  %v11012_v19 = vld [vmem:[#allocation5 + $0x9e8] sm:$0xff]  }
 0x171   :  { %9888 = vmatpush3.bf16.msra.mxu1 %v10978_v20  ;;  %9867 = vmatprep.subr.bf16.mxu0 %v10979_v21  ;;  %v11014_v20 = vld [vmem:[#allocation5 + $0x9a8] sm:$0xff]   ;;  %v11015_v21 = vld [vmem:[#allocation5 + $0x970] sm:$0xff]  }
 0x172   :  { %v9565_v54 = vpop.f32.mrb[4].mxu0  ;;  %9889 = vmatprep.subr.bf16.mxu1 %v10980_v22  ;;  %v11016_v22 = vld [vmem:[#allocation5 + $0x9f0] sm:$0xff]  }
 0x173   :  { %v9587_v56 = vpop.f32.mrb[4].mxu1  ;;  %v9566_v58 = vpop.f32.mrb[5].mxu0 }
 0x174   :  { %v9567_v60 = vadd.f32 %v9566_v58, %v9565_v54  ;;  %v9588_v61 = vpop.f32.mrb[5].mxu1  ;;  %v9568_v0 = vpop.f32.mrb[6].mxu0  ;;  %9868 = vmatpush3.bf16.msra.mxu0 %v10981_v23  ;;  %v10999_v58 = vld [vmem:[#allocation5 + $0x950] sm:$0xff]  }
 0x175   :  { %v9589_v63 = vadd.f32 %v9588_v61, %v9587_v56  ;;  %v9590_v3 = vpop.f32.mrb[6].mxu1  ;;  %v9569_v5 = vpop.f32.mrb[7].mxu0  ;;  %9890 = vmatpush3.bf16.msra.mxu1 %v10982_v24  ;;  %v11000_v61 = vld [vmem:[#allocation5 + $0x9d0] sm:$0xff]  }
 0x176   :  { %v6646_v2 = vadd.f32 %v9567_v60, %v11731_v25  ;;  %v9570_v8 = vadd.f32 %v9569_v5, %v9568_v0  ;;  %v9591_v9 = vpop.f32.mrb[7].mxu1  ;;  %v10983_v25 = vld [vmem:[#allocation5 + $0x870] sm:$0xff]   ;;  %9891 = vmatprep.subr.bf16.mxu1 %v10984_v26  ;;  %v11020_v26 = vld [vmem:[#allocation5 + $0x9f8] sm:$0xff]  }
 0x177   :  { %v9592_v11 = vadd.f32 %v9591_v9, %v9590_v3  ;;  %9869 = vmatprep.subr.bf16.mxu0 %v10983_v25  ;;  %v11001_v0 = vld [vmem:[#allocation5 + $0x910] sm:$0xff]   ;;  %v11004_v9 = vld [vmem:[#allocation5 + $0x9d8] sm:$0xff]  }
 0x178   :  { %v11736_v7 = vadd.f32 %v9589_v63, %v6646_v2  ;;  %v6649_v13 = vadd.f32 %v9570_v8, %v11733_v27  ;;  %v10985_v27 = vld [vmem:[#allocation5 + $0x830] sm:$0xff]   ;;  %v11019_v25 = vld [vmem:[#allocation5 + $0x978] sm:$0xff]  }
 0x179   :  { %9870 = vmatpush3.bf16.msra.mxu0 %v10985_v27  ;;  %9892 = vmatpush3.bf16.msra.mxu1 %v10986_v28  ;;  %v11002_v2 = vld [vmem:[#allocation5 + $0x990] sm:$0xff]   ;;  %v11021_v27 = vld [vmem:[#allocation5 + $0x938] sm:$0xff]  }
 0x17a   :  { %v11739_v16 = vadd.f32 %v9592_v11, %v6649_v13  ;;  %9871 = vmatprep.subr.bf16.mxu0 %v10987_v29  ;;  %9893 = vmatprep.subr.bf16.mxu1 %v10988_v30  ;;  %v11005_v11 = vld [vmem:[#allocation5 + $0x918] sm:$0xff]   ;;  %v11007_v13 = vld [vmem:[#allocation5 + $0x960] sm:$0xff]   ;;  %v11017_v23 = vld [vmem:[#allocation5 + $0x930] sm:$0xff]  }
 0x17b   :  { %v11018_v24 = vld [vmem:[#allocation5 + $0x9b0] sm:$0xff]   ;;  %v11022_v28 = vld [vmem:[#allocation5 + $0x9b8] sm:$0xff]   ;;  %v127_v29 = vld [vmem:[#allocation2 + $0x128] sm:$0xff] }
 0x17c   :  { %v223_v30 = vld [vmem:[#allocation2 + $0x428] sm:$0xff] }
 0x17d   :  { %9872 = vmatpush3.bf16.msra.mxu0 %v10989_v31  ;;  %9894 = vmatpush3.bf16.msra.mxu1 %v10990_v32  ;;  %v319_v31 = vpack.c.bf16 %v223_v30, %v127_v29  ;;  %v129_v32 = vld [vmem:[#allocation2 + $0x138] sm:$0xff]  ;;  %v130_v30 = vld [vmem:[#allocation2 + $0x140] sm:$0xff] }
 0x17e   :  { %9901 = vmatprep.subr.bf16.mxu0 %v10991_v45  ;;  %9923 = vmatprep.subr.bf16.mxu1 %v10992_v46  ;;  %v321_v35 = vpack.c.bf16 %v225_v33, %v129_v32  ;;  %v11027_v45 = vld [vmem:[#allocation5 + $0xa48] sm:$0xff]   ;;  %v229_v29 = vld [vmem:[#allocation2 + $0x458] sm:$0xff] }
 0x180   :  { %7218 = vmatmul.mubr.bf16.vlgmr.msra.gmra.mrb[32].mxu0 %v314_v42  ;;  %7259 = vmatmul.mubr.bf16.vlgmr.msra.gmra.mrb[32].mxu1 %v316_v44  ;;  %v11024_v42 = vld [vmem:[#allocation5 + $0xac0] sm:$0xff]  }
 0x181   :  { %9902 = vmatpush3.bf16.msra.mxu0 %v10993_v47  ;;  %9924 = vmatpush3.bf16.msra.mxu1 %v10994_v48  ;;  %v11026_v44 = vld [vmem:[#allocation5 + $0xa80] sm:$0xff]   ;;  %v11028_v47 = vld [vmem:[#allocation5 + $0xac8] sm:$0xff]  }
 0x182   :  { %9903 = vmatprep.subr.bf16.mxu0 %v10995_v49  ;;  %9925 = vmatprep.subr.bf16.mxu1 %v10996_v51  ;;  %v11029_v49 = vld [vmem:[#allocation5 + $0xa08] sm:$0xff]  }
 0x183   :  { %7299 = vmatprep.mubr.bf16.mxu0 %v319_v31  ;;  %7340 = vmatprep.mubr.bf16.mxu1 %v321_v35  ;;  %v11030_v51 = vld [vmem:[#allocation5 + $0xa88] sm:$0xff]   ;;  %v226_v31 = vld [vmem:[#allocation2 + $0x440] sm:$0xff]  ;;  %v228_v35 = vld [vmem:[#allocation2 + $0x450] sm:$0xff] }
 0x184   :  { %v322_v33 = vpack.c.bf16 %v226_v31, %v130_v30  ;;  %v324_v36 = vpack.c.bf16 %v228_v35, %v132_v34  ;;  %v232_v31 = vld [vmem:[#allocation2 + $0x470] sm:$0xff]  ;;  %v11088_v34 = vld [vmem:[#allocation5 + $0xcc0] sm:$0xff]  }
 0x185   :  { %9904 = vmatpush3.bf16.msra.mxu0 %v10997_v53  ;;  %9926 = vmatpush3.bf16.msra.mxu1 %v10998_v55  ;;  %v11089_v35 = vld [vmem:[#allocation5 + $0xc00] sm:$0xff]  }
 0x186   :  { %9905 = vmatprep.subr.bf16.mxu0 %v10999_v58  ;;  %9927 = vmatprep.subr.bf16.mxu1 %v11000_v61 }
 0x189   :  { %9906 = vmatpush3.bf16.msra.mxu0 %v11001_v0  ;;  %9928 = vmatpush3.bf16.msra.mxu1 %v11002_v2  ;;  %v11035_v2 = vld [vmem:[#allocation5 + $0xa58] sm:$0xff]  }
 0x18a   :  { %9907 = vmatprep.subr.bf16.mxu0 %v11003_v6  ;;  %9929 = vmatprep.subr.bf16.mxu1 %v11004_v9 }
 0x18d   :  { %9908 = vmatpush3.bf16.msra.mxu0 %v11005_v11  ;;  %v11040_v11 = vld [vmem:[#allocation5 + $0xae0] sm:$0xff]  }
 0x18e   :  { %9909 = vmatprep.subr.bf16.mxu0 %v11007_v13  ;;  %v11042_v13 = vld [vmem:[#allocation5 + $0xaa0] sm:$0xff]  }
 0x191   :  { %9910 = vmatpush3.bf16.msra.mxu0 %v11009_v15  ;;  %v11044_v15 = vld [vmem:[#allocation5 + $0xae8] sm:$0xff]  }
 0x192   :  { %v9609_v50 = vpop.f32.mrb[8].mxu0  ;;  %9911 = vmatprep.subr.bf16.mxu0 %v11011_v18  ;;  %v11047_v18 = vld [vmem:[#allocation5 + $0xa70] sm:$0xff]  }
 0x193   :  { %v9631_v52 = vpop.f32.mrb[8].mxu1  ;;  %v9610_v54 = vpop.f32.mrb[9].mxu0 }
 0x194   :  { %v9611_v56 = vadd.f32 %v9610_v54, %v9609_v50  ;;  %v9632_v57 = vpop.f32.mrb[9].mxu1  ;;  %v9612_v60 = vpop.f32.mrb[10].mxu0  ;;  %v11031_v54 = vld [vmem:[#allocation5 + $0xa50] sm:$0xff]  }
 0x195   :  { %v9633_v59 = vadd.f32 %v9632_v57, %v9631_v52  ;;  %v9634_v63 = vpop.f32.mrb[10].mxu1  ;;  %v9613_v1 = vpop.f32.mrb[11].mxu0  ;;  %v11032_v57 = vld [vmem:[#allocation5 + $0xad0] sm:$0xff]  }
 0x196   :  { %v6728_v62 = vadd.f32 %v9611_v56, %v11736_v7  ;;  %v9614_v4 = vadd.f32 %v9613_v1, %v9612_v60  ;;  %v9635_v5 = vpop.f32.mrb[11].mxu1  ;;  %v11006_v7 = vld [vmem:[#allocation5 + $0x998] sm:$0xff]   ;;  %v11033_v60 = vld [vmem:[#allocation5 + $0xa10] sm:$0xff]  }
 0x197   :  { %v9636_v8 = vadd.f32 %v9635_v5, %v9634_v63  ;;  %9930 = vmatpush3.bf16.msra.mxu1 %v11006_v7  ;;  %v11036_v5 = vld [vmem:[#allocation5 + $0xad8] sm:$0xff]   ;;  %v11041_v7 = vld [vmem:[#allocation5 + $0xa20] sm:$0xff]  }
 0x198   :  { %v11742_v3 = vadd.f32 %v9633_v59, %v6728_v62  ;;  %v6731_v10 = vadd.f32 %v9614_v4, %v11739_v16  ;;  %9931 = vmatprep.subr.bf16.mxu1 %v11008_v14  ;;  %v11013_v16 = vld [vmem:[#allocation5 + $0x928] sm:$0xff]   ;;  %v11034_v62 = vld [vmem:[#allocation5 + $0xa90] sm:$0xff]  }
 0x199   :  { %9912 = vmatpush3.bf16.msra.mxu0 %v11013_v16  ;;  %v11043_v14 = vld [vmem:[#allocation5 + $0xa68] sm:$0xff]   ;;  %v11049_v16 = vld [vmem:[#allocation5 + $0xa30] sm:$0xff]  }
 0x19a   :  { %v11745_v12 = vadd.f32 %v9636_v8, %v6731_v10  ;;  %9913 = vmatprep.subr.bf16.mxu0 %v11015_v21  ;;  %v11037_v8 = vld [vmem:[#allocation5 + $0xa18] sm:$0xff]   ;;  %v11039_v10 = vld [vmem:[#allocation5 + $0xa60] sm:$0xff]  }
 0x19b   :  { %9932 = vmatpush3.bf16.msra.mxu1 %v11010_v17  ;;  %v11046_v17 = vld [vmem:[#allocation5 + $0xaa8] sm:$0xff]   ;;  %v11051_v21 = vld [vmem:[#allocation5 + $0xa78] sm:$0xff]  }
 0x19c   :  { %9933 = vmatprep.subr.bf16.mxu1 %v11012_v19  ;;  %v11048_v19 = vld [vmem:[#allocation5 + $0xaf0] sm:$0xff]  }
 0x19d   :  { %9914 = vmatpush3.bf16.msra.mxu0 %v11017_v23  ;;  %v11053_v23 = vld [vmem:[#allocation5 + $0xa38] sm:$0xff]  }
 0x19e   :  { %9915 = vmatprep.subr.bf16.mxu0 %v11019_v25  ;;  %v131_v25 = vld [vmem:[#allocation2 + $0x148] sm:$0xff] }
 0x19f   :  { %9934 = vmatpush3.bf16.msra.mxu1 %v11014_v20  ;;  %v11050_v20 = vld [vmem:[#allocation5 + $0xab0] sm:$0xff]  }
 0x1a0   :  { %9935 = vmatprep.subr.bf16.mxu1 %v11016_v22  ;;  %v11052_v22 = vld [vmem:[#allocation5 + $0xaf8] sm:$0xff]  }
 0x1a1   :  { %9916 = vmatpush3.bf16.msra.mxu0 %v11021_v27  ;;  %v133_v27 = vld [vmem:[#allocation2 + $0x158] sm:$0xff] }
 0x1a2   :  { %9945 = vmatprep.subr.bf16.mxu0 %v11023_v41  ;;  %v325_v32 = vpack.c.bf16 %v229_v29, %v133_v27  ;;  %v11059_v41 = vld [vmem:[#allocation5 + $0xb48] sm:$0xff]   ;;  %v134_v27 = vld [vmem:[#allocation2 + $0x160] sm:$0xff]  ;;  %v136_v29 = vld [vmem:[#allocation2 + $0x170] sm:$0xff] }
 0x1a3   :  { %9936 = vmatpush3.bf16.msra.mxu1 %v11018_v24  ;;  %v11054_v24 = vld [vmem:[#allocation5 + $0xab8] sm:$0xff]  }
 0x1a4   :  { %9937 = vmatprep.subr.bf16.mxu1 %v11020_v26  ;;  %7300 = vmatmul.mubr.bf16.vlgmr.msra.gmra.mrb[36].mxu0 %v318_v39  ;;  %v227_v26 = vld [vmem:[#allocation2 + $0x448] sm:$0xff]  ;;  %v11057_v39 = vld [vmem:[#allocation5 + $0xb00] sm:$0xff]  }
 0x1a5   :  { %9946 = vmatpush3.bf16.msra.mxu0 %v11025_v43  ;;  %v11060_v43 = vld [vmem:[#allocation5 + $0xbc8] sm:$0xff]  }
 0x1a6   :  { %9947 = vmatprep.subr.bf16.mxu0 %v11027_v45  ;;  %v11061_v45 = vld [vmem:[#allocation5 + $0xb08] sm:$0xff]  }
 0x1a7   :  { %9938 = vmatpush3.bf16.msra.mxu1 %v11022_v28  ;;  %v323_v28 = vpack.c.bf16 %v227_v26, %v131_v25 }
 0x1a8   :  { %9967 = vmatprep.subr.bf16.mxu1 %v11024_v42 }
 0x1a9   :  { %9948 = vmatpush3.bf16.msra.mxu0 %v11029_v49  ;;  %7381 = vmatprep.mubr.bf16.mxu0 %v323_v28  ;;  %v230_v28 = vld [vmem:[#allocation2 + $0x460] sm:$0xff] }
 0x1aa   :  { %7341 = vmatmul.mubr.bf16.vlgmr.msra.gmra.mrb[36].mxu1 %v320_v40  ;;  %9949 = vmatprep.subr.bf16.mxu0 %v11031_v54  ;;  %v11058_v40 = vld [vmem:[#allocation5 + $0xb80] sm:$0xff]   ;;  %v326_v30 = vpack.c.bf16 %v230_v28, %v134_v27 }
 0x1ab   :  { %9968 = vmatpush3.bf16.msra.mxu1 %v11026_v44  ;;  %7422 = vmatprep.mubr.bf16.mxu1 %v325_v32  ;;  %v328_v32 = vpack.c.bf16 %v232_v31, %v136_v29  ;;  %v11119_v29 = vld [vmem:[#allocation5 + $0xd40] sm:$0xff]  }
 0x1ac   :  { %9969 = vmatprep.subr.bf16.mxu1 %v11028_v47  ;;  %v11062_v47 = vld [vmem:[#allocation5 + $0xb88] sm:$0xff]   ;;  %v11121_v31 = vld [vmem:[#allocation5 + $0xd00] sm:$0xff]  }
 0x1ad   :  { %9950 = vmatpush3.bf16.msra.mxu0 %v11033_v60 }
 0x1ae   :  { %9951 = vmatprep.subr.bf16.mxu0 %v11035_v2 }
 0x1af   :  { %9970 = vmatpush3.bf16.msra.mxu1 %v11030_v51 }
 0x1b0   :  { %9971 = vmatprep.subr.bf16.mxu1 %v11032_v57 }
 0x1b1   :  { %9952 = vmatpush3.bf16.msra.mxu0 %v11037_v8  ;;  %v11072_v8 = vld [vmem:[#allocation5 + $0xbe0] sm:$0xff]  }
 0x1b2   :  { %v9653_v46 = vpop.f32.mrb[12].mxu0  ;;  %9953 = vmatprep.subr.bf16.mxu0 %v11039_v10  ;;  %v11074_v10 = vld [vmem:[#allocation5 + $0xba0] sm:$0xff]  }
 0x1b3   :  { %v9675_v48 = vpop.f32.mrb[12].mxu1  ;;  %v9654_v50 = vpop.f32.mrb[13].mxu0  ;;  %9972 = vmatpush3.bf16.msra.mxu1 %v11034_v62  ;;  %v11067_v62 = vld [vmem:[#allocation5 + $0xb58] sm:$0xff]  }
 0x1b4   :  { %v9655_v52 = vadd.f32 %v9654_v50, %v9653_v46  ;;  %v9676_v53 = vpop.f32.mrb[13].mxu1  ;;  %v9656_v56 = vpop.f32.mrb[14].mxu0  ;;  %9973 = vmatprep.subr.bf16.mxu1 %v11036_v5  ;;  %v11063_v50 = vld [vmem:[#allocation5 + $0xb50] sm:$0xff]  }
 0x1b5   :  { %v9677_v55 = vadd.f32 %v9676_v53, %v9675_v48  ;;  %v9678_v59 = vpop.f32.mrb[14].mxu1  ;;  %v9657_v61 = vpop.f32.mrb[15].mxu0  ;;  %9954 = vmatpush3.bf16.msra.mxu0 %v11041_v7  ;;  %v11064_v53 = vld [vmem:[#allocation5 + $0xbd0] sm:$0xff]   ;;  %v11076_v7 = vld [vmem:[#allocation5 + $0xbe8] sm:$0xff]  }
 0x1b6   :  { %v6810_v58 = vadd.f32 %v9655_v52, %v11742_v3  ;;  %v9658_v0 = vadd.f32 %v9657_v61, %v9656_v56  ;;  %v9679_v1 = vpop.f32.mrb[15].mxu1  ;;  %v11038_v3 = vld [vmem:[#allocation5 + $0xa98] sm:$0xff]   ;;  %9955 = vmatprep.subr.bf16.mxu0 %v11043_v14  ;;  %v11065_v56 = vld [vmem:[#allocation5 + $0xb10] sm:$0xff]  }
 0x1b7   :  { %v9680_v4 = vadd.f32 %v9679_v1, %v9678_v59  ;;  %9974 = vmatpush3.bf16.msra.mxu1 %v11038_v3  ;;  %v11068_v1 = vld [vmem:[#allocation5 + $0xbd8] sm:$0xff]   ;;  %v11073_v3 = vld [vmem:[#allocation5 + $0xb20] sm:$0xff]   ;;  %v11079_v14 = vld [vmem:[#allocation5 + $0xb70] sm:$0xff]  }
 0x1b8   :  { %v11748_v63 = vadd.f32 %v9677_v55, %v6810_v58  ;;  %v6813_v6 = vadd.f32 %v9658_v0, %v11745_v12  ;;  %9975 = vmatprep.subr.bf16.mxu1 %v11040_v11  ;;  %v11045_v12 = vld [vmem:[#allocation5 + $0xa28] sm:$0xff]   ;;  %v11066_v58 = vld [vmem:[#allocation5 + $0xb90] sm:$0xff]  }
 0x1b9   :  { %9956 = vmatpush3.bf16.msra.mxu0 %v11045_v12  ;;  %v11075_v11 = vld [vmem:[#allocation5 + $0xb68] sm:$0xff]   ;;  %v11081_v12 = vld [vmem:[#allocation5 + $0xb30] sm:$0xff]  }
 0x1ba   :  { %v11751_v9 = vadd.f32 %v9680_v4, %v6813_v6  ;;  %9957 = vmatprep.subr.bf16.mxu0 %v11047_v18  ;;  %v11069_v4 = vld [vmem:[#allocation5 + $0xb18] sm:$0xff]   ;;  %v11071_v6 = vld [vmem:[#allocation5 + $0xb60] sm:$0xff]  }
 0x1bb   :  { %9976 = vmatpush3.bf16.msra.mxu1 %v11042_v13  ;;  %v11078_v13 = vld [vmem:[#allocation5 + $0xba8] sm:$0xff]   ;;  %v11083_v18 = vld [vmem:[#allocation5 + $0xb78] sm:$0xff]  }
 0x1bc   :  { %9977 = vmatprep.subr.bf16.mxu1 %v11044_v15  ;;  %v11080_v15 = vld [vmem:[#allocation5 + $0xbf0] sm:$0xff]  }
 0x1bd   :  { %9958 = vmatpush3.bf16.msra.mxu0 %v11049_v16  ;;  %v11085_v16 = vld [vmem:[#allocation5 + $0xb38] sm:$0xff]  }
 0x1be   :  { %9959 = vmatprep.subr.bf16.mxu0 %v11051_v21  ;;  %v135_v21 = vld [vmem:[#allocation2 + $0x168] sm:$0xff] }
 0x1bf   :  { %9978 = vmatpush3.bf16.msra.mxu1 %v11046_v17  ;;  %v11082_v17 = vld [vmem:[#allocation5 + $0xbb0] sm:$0xff]  }
 0x1c0   :  { %9979 = vmatprep.subr.bf16.mxu1 %v11048_v19  ;;  %v11084_v19 = vld [vmem:[#allocation5 + $0xbf8] sm:$0xff]  }
 0x1c1   :  { %9960 = vmatpush3.bf16.msra.mxu0 %v11053_v23  ;;  %v137_v23 = vld [vmem:[#allocation2 + $0x178] sm:$0xff] }
 0x1c2   :  { %9989 = vmatprep.subr.bf16.mxu0 %v11055_v37  ;;  %v11091_v37 = vld [vmem:[#allocation5 + $0xc48] sm:$0xff]  }
 0x1c3   :  { %9980 = vmatpush3.bf16.msra.mxu1 %v11050_v20  ;;  %v11086_v20 = vld [vmem:[#allocation5 + $0xbb8] sm:$0xff]  }
 0x1c4   :  { %9981 = vmatprep.subr.bf16.mxu1 %v11052_v22  ;;  %7382 = vmatmul.mubr.bf16.vlgmr.msra.gmra.mrb[40].mxu0 %v322_v33  ;;  %v231_v22 = vld [vmem:[#allocation2 + $0x468] sm:$0xff]  ;;  %v11087_v33 = vld [vmem:[#allocation5 + $0xc40] sm:$0xff]  }
 0x1c5   :  { %9990 = vmatpush3.bf16.msra.mxu0 %v11057_v39  ;;  %v327_v25 = vpack.c.bf16 %v231_v22, %v135_v21  ;;  %v11092_v39 = vld [vmem:[#allocation5 + $0xcc8] sm:$0xff]   ;;  %v237_v21 = vld [vmem:[#allocation2 + $0x498] sm:$0xff]  ;;  %v138_v22 = vld [vmem:[#allocation2 + $0x180] sm:$0xff] }
 0x1c6   :  { %9991 = vmatprep.subr.bf16.mxu0 %v11059_v41  ;;  %v11093_v41 = vld [vmem:[#allocation5 + $0xc08] sm:$0xff]  }
 0x1c7   :  { %9982 = vmatpush3.bf16.msra.mxu1 %v11054_v24  ;;  %v233_v24 = vld [vmem:[#allocation2 + $0x478] sm:$0xff]  ;;  %7463 = vmatprep.mubr.bf16.mxu0 %v327_v25  ;;  %v140_v25 = vld [vmem:[#allocation2 + $0x190] sm:$0xff] }
 0x1c8   :  { %10011 = vmatprep.subr.bf16.mxu1 %v11056_v38  ;;  %v329_v26 = vpack.c.bf16 %v233_v24, %v137_v23  ;;  %v234_v24 = vld [vmem:[#allocation2 + $0x480] sm:$0xff] }
 0x1c9   :  { %9992 = vmatpush3.bf16.msra.mxu0 %v11061_v45  ;;  %v330_v27 = vpack.c.bf16 %v234_v24, %v138_v22  ;;  %v144_v22 = vld [vmem:[#allocation2 + $0x1b0] sm:$0xff] }
 0x1ca   :  { %7423 = vmatmul.mubr.bf16.vlgmr.msra.gmra.mrb[40].mxu1 %v324_v36  ;;  %9993 = vmatprep.subr.bf16.mxu0 %v11063_v50  ;;  %v11090_v36 = vld [vmem:[#allocation5 + $0xc80] sm:$0xff]  }
 0x1cb   :  { %10012 = vmatpush3.bf16.msra.mxu1 %v11058_v40  ;;  %7504 = vmatprep.mubr.bf16.mxu1 %v329_v26  ;;  %v236_v26 = vld [vmem:[#allocation2 + $0x490] sm:$0xff] }
 0x1cc   :  { %10013 = vmatprep.subr.bf16.mxu1 %v11060_v43  ;;  %v11094_v43 = vld [vmem:[#allocation5 + $0xc88] sm:$0xff]   ;;  %v332_v28 = vpack.c.bf16 %v236_v26, %v140_v25  ;;  %v11151_v25 = vld [vmem:[#allocation5 + $0xe40] sm:$0xff]  }
 0x1cd   :  { %9994 = vmatpush3.bf16.msra.mxu0 %v11065_v56  ;;  %v11152_v26 = vld [vmem:[#allocation5 + $0xec0] sm:$0xff]  }
 0x1ce   :  { %9995 = vmatprep.subr.bf16.mxu0 %v11067_v62 }
 0x1cf   :  { %10014 = vmatpush3.bf16.msra.mxu1 %v11062_v47 }
 0x1d0   :  { %10015 = vmatprep.subr.bf16.mxu1 %v11064_v53 }
 0x1d1   :  { %9996 = vmatpush3.bf16.msra.mxu0 %v11069_v4  ;;  %v11104_v4 = vld [vmem:[#allocation5 + $0xce0] sm:$0xff]  }
 0x1d2   :  { %v9697_v42 = vpop.f32.mrb[16].mxu0  ;;  %9997 = vmatprep.subr.bf16.mxu0 %v11071_v6  ;;  %v11106_v6 = vld [vmem:[#allocation5 + $0xca0] sm:$0xff]  }
 0x1d3   :  { %v9719_v44 = vpop.f32.mrb[16].mxu1  ;;  %v9698_v46 = vpop.f32.mrb[17].mxu0  ;;  %10016 = vmatpush3.bf16.msra.mxu1 %v11066_v58  ;;  %v11099_v58 = vld [vmem:[#allocation5 + $0xc58] sm:$0xff]  }
 0x1d4   :  { %v9699_v48 = vadd.f32 %v9698_v46, %v9697_v42  ;;  %v9720_v49 = vpop.f32.mrb[17].mxu1  ;;  %v9700_v52 = vpop.f32.mrb[18].mxu0  ;;  %10017 = vmatprep.subr.bf16.mxu1 %v11068_v1  ;;  %v11095_v46 = vld [vmem:[#allocation5 + $0xc50] sm:$0xff]  }
 0x1d5   :  { %v9721_v51 = vadd.f32 %v9720_v49, %v9719_v44  ;;  %v9722_v55 = vpop.f32.mrb[18].mxu1  ;;  %v9701_v57 = vpop.f32.mrb[19].mxu0  ;;  %9998 = vmatpush3.bf16.msra.mxu0 %v11073_v3  ;;  %v11096_v49 = vld [vmem:[#allocation5 + $0xcd0] sm:$0xff]   ;;  %v11108_v3 = vld [vmem:[#allocation5 + $0xce8] sm:$0xff]  }
 0x1d6   :  { %v6892_v54 = vadd.f32 %v9699_v48, %v11748_v63  ;;  %v9702_v60 = vadd.f32 %v9701_v57, %v9700_v52  ;;  %v9723_v61 = vpop.f32.mrb[19].mxu1  ;;  %v11070_v63 = vld [vmem:[#allocation5 + $0xb98] sm:$0xff]   ;;  %9999 = vmatprep.subr.bf16.mxu0 %v11075_v11  ;;  %v11097_v52 = vld [vmem:[#allocation5 + $0xc10] sm:$0xff]  }
 0x1d7   :  { %v9724_v0 = vadd.f32 %v9723_v61, %v9722_v55  ;;  %10018 = vmatpush3.bf16.msra.mxu1 %v11070_v63  ;;  %v11100_v61 = vld [vmem:[#allocation5 + $0xcd8] sm:$0xff]   ;;  %v11105_v63 = vld [vmem:[#allocation5 + $0xc20] sm:$0xff]   ;;  %v11111_v11 = vld [vmem:[#allocation5 + $0xc70] sm:$0xff]  }
 0x1d8   :  { %v11754_v59 = vadd.f32 %v9721_v51, %v6892_v54  ;;  %v6895_v2 = vadd.f32 %v9702_v60, %v11751_v9  ;;  %10019 = vmatprep.subr.bf16.mxu1 %v11072_v8  ;;  %v11077_v9 = vld [vmem:[#allocation5 + $0xb28] sm:$0xff]   ;;  %v11098_v54 = vld [vmem:[#allocation5 + $0xc90] sm:$0xff]  }
 0x1d9   :  { %10000 = vmatpush3.bf16.msra.mxu0 %v11077_v9  ;;  %v11107_v8 = vld [vmem:[#allocation5 + $0xc68] sm:$0xff]   ;;  %v11113_v9 = vld [vmem:[#allocation5 + $0xc30] sm:$0xff]  }
 0x1da   :  { %v11757_v5 = vadd.f32 %v9724_v0, %v6895_v2  ;;  %10001 = vmatprep.subr.bf16.mxu0 %v11079_v14  ;;  %v11101_v0 = vld [vmem:[#allocation5 + $0xc18] sm:$0xff]   ;;  %v11103_v2 = vld [vmem:[#allocation5 + $0xc60] sm:$0xff]  }
 0x1db   :  { %10020 = vmatpush3.bf16.msra.mxu1 %v11074_v10  ;;  %v11110_v10 = vld [vmem:[#allocation5 + $0xca8] sm:$0xff]   ;;  %v11115_v14 = vld [vmem:[#allocation5 + $0xc78] sm:$0xff]  }
 0x1dc   :  { %10021 = vmatprep.subr.bf16.mxu1 %v11076_v7  ;;  %v11112_v7 = vld [vmem:[#allocation5 + $0xcf0] sm:$0xff]  }
 0x1dd   :  { %10002 = vmatpush3.bf16.msra.mxu0 %v11081_v12  ;;  %v11117_v12 = vld [vmem:[#allocation5 + $0xc38] sm:$0xff]  }
 0x1de   :  { %10003 = vmatprep.subr.bf16.mxu0 %v11083_v18  ;;  %v139_v18 = vld [vmem:[#allocation2 + $0x188] sm:$0xff] }
 0x1df   :  { %10022 = vmatpush3.bf16.msra.mxu1 %v11078_v13  ;;  %v11114_v13 = vld [vmem:[#allocation5 + $0xcb0] sm:$0xff]  }
 0x1e0   :  { %10023 = vmatprep.subr.bf16.mxu1 %v11080_v15  ;;  %v11116_v15 = vld [vmem:[#allocation5 + $0xcf8] sm:$0xff]  }
 0x1e1   :  { %10004 = vmatpush3.bf16.msra.mxu0 %v11085_v16 }
 0x1e2   :  { %10033 = vmatprep.subr.bf16.mxu0 %v11087_v33  ;;  %v11123_v33 = vld [vmem:[#allocation5 + $0xd48] sm:$0xff]  }
 0x1e3   :  { %10024 = vmatpush3.bf16.msra.mxu1 %v11082_v17  ;;  %v11118_v17 = vld [vmem:[#allocation5 + $0xcb8] sm:$0xff]  }
 0x1e4   :  { %10025 = vmatprep.subr.bf16.mxu1 %v11084_v19  ;;  %7464 = vmatmul.mubr.bf16.vlgmr.msra.gmra.mrb[44].mxu0 %v326_v30  ;;  %v235_v19 = vld [vmem:[#allocation2 + $0x488] sm:$0xff]  ;;  %v11120_v30 = vld [vmem:[#allocation5 + $0xdc0] sm:$0xff]  }
 0x1e5   :  { %10034 = vmatpush3.bf16.msra.mxu0 %v11089_v35  ;;  %v331_v16 = vpack.c.bf16 %v235_v19, %v139_v18  ;;  %v11124_v35 = vld [vmem:[#allocation5 + $0xdc8] sm:$0xff]   ;;  %v241_v18 = vld [vmem:[#allocation2 + $0x4b8] sm:$0xff]  ;;  %v142_v19 = vld [vmem:[#allocation2 + $0x1a0] sm:$0xff] }
 0x1e6   :  { %10035 = vmatprep.subr.bf16.mxu0 %v11091_v37  ;;  %v11125_v37 = vld [vmem:[#allocation5 + $0xd08] sm:$0xff]  }
 0x1e7   :  { %10026 = vmatpush3.bf16.msra.mxu1 %v11086_v20  ;;  %v141_v20 = vld [vmem:[#allocation2 + $0x198] sm:$0xff]  ;;  %7545 = vmatprep.mubr.bf16.mxu0 %v331_v16  ;;  %v238_v16 = vld [vmem:[#allocation2 + $0x4a0] sm:$0xff] }
 0x1e8   :  { %10055 = vmatprep.subr.bf16.mxu1 %v11088_v34  ;;  %v333_v23 = vpack.c.bf16 %v237_v21, %v141_v20  ;;  %v334_v21 = vpack.c.bf16 %v238_v16, %v142_v19  ;;  %v244_v16 = vld [vmem:[#allocation2 + $0x4d0] sm:$0xff] }
 0x1e9   :  { %10036 = vmatpush3.bf16.msra.mxu0 %v11093_v41 }
 0x1ea   :  { %7505 = vmatmul.mubr.bf16.vlgmr.msra.gmra.mrb[44].mxu1 %v328_v32  ;;  %10037 = vmatprep.subr.bf16.mxu0 %v11095_v46  ;;  %v11122_v32 = vld [vmem:[#allocation5 + $0xd80] sm:$0xff]  }
 0x1eb   :  { %10056 = vmatpush3.bf16.msra.mxu1 %v11090_v36  ;;  %7586 = vmatprep.mubr.bf16.mxu1 %v333_v23  ;;  %v240_v23 = vld [vmem:[#allocation2 + $0x4b0] sm:$0xff] }
 0x1ec   :  { %10057 = vmatprep.subr.bf16.mxu1 %v11092_v39  ;;  %v11126_v39 = vld [vmem:[#allocation5 + $0xd88] sm:$0xff]   ;;  %v336_v24 = vpack.c.bf16 %v240_v23, %v144_v22  ;;  %v11184_v22 = vld [vmem:[#allocation5 + $0xfc0] sm:$0xff]  }
 0x1ed   :  { %10038 = vmatpush3.bf16.msra.mxu0 %v11097_v52  ;;  %v11185_v23 = vld [vmem:[#allocation5 + $0xf00] sm:$0xff]  }
 0x1ee   :  { %10039 = vmatprep.subr.bf16.mxu0 %v11099_v58 }
 0x1ef   :  { %10058 = vmatpush3.bf16.msra.mxu1 %v11094_v43 }
 0x1f0   :  { %10059 = vmatprep.subr.bf16.mxu1 %v11096_v49 }
 0x1f1   :  { %10040 = vmatpush3.bf16.msra.mxu0 %v11101_v0  ;;  %v11136_v0 = vld [vmem:[#allocation5 + $0xde0] sm:$0xff]  }
 0x1f2   :  { %v9741_v38 = vpop.f32.mrb[20].mxu0  ;;  %10041 = vmatprep.subr.bf16.mxu0 %v11103_v2  ;;  %v11138_v2 = vld [vmem:[#allocation5 + $0xda0] sm:$0xff]  }
 0x1f3   :  { %v9763_v40 = vpop.f32.mrb[20].mxu1  ;;  %v9742_v42 = vpop.f32.mrb[21].mxu0  ;;  %10060 = vmatpush3.bf16.msra.mxu1 %v11098_v54  ;;  %v11131_v54 = vld [vmem:[#allocation5 + $0xd58] sm:$0xff]  }
 0x1f4   :  { %v9743_v44 = vadd.f32 %v9742_v42, %v9741_v38  ;;  %v9764_v45 = vpop.f32.mrb[21].mxu1  ;;  %v9744_v48 = vpop.f32.mrb[22].mxu0  ;;  %10061 = vmatprep.subr.bf16.mxu1 %v11100_v61  ;;  %v11127_v42 = vld [vmem:[#allocation5 + $0xd50] sm:$0xff]  }
 0x1f5   :  { %v9765_v47 = vadd.f32 %v9764_v45, %v9763_v40  ;;  %v9766_v51 = vpop.f32.mrb[22].mxu1  ;;  %v9745_v53 = vpop.f32.mrb[23].mxu0  ;;  %10042 = vmatpush3.bf16.msra.mxu0 %v11105_v63  ;;  %v11128_v45 = vld [vmem:[#allocation5 + $0xdd0] sm:$0xff]   ;;  %v11140_v63 = vld [vmem:[#allocation5 + $0xde8] sm:$0xff]  }
 0x1f6   :  { %v6974_v50 = vadd.f32 %v9743_v44, %v11754_v59  ;;  %v9746_v56 = vadd.f32 %v9745_v53, %v9744_v48  ;;  %v9767_v57 = vpop.f32.mrb[23].mxu1  ;;  %v11102_v59 = vld [vmem:[#allocation5 + $0xc98] sm:$0xff]   ;;  %10043 = vmatprep.subr.bf16.mxu0 %v11107_v8  ;;  %v11129_v48 = vld [vmem:[#allocation5 + $0xd10] sm:$0xff]  }
 0x1f7   :  { %v9768_v60 = vadd.f32 %v9767_v57, %v9766_v51  ;;  %10062 = vmatpush3.bf16.msra.mxu1 %v11102_v59  ;;  %v11132_v57 = vld [vmem:[#allocation5 + $0xdd8] sm:$0xff]   ;;  %v11137_v59 = vld [vmem:[#allocation5 + $0xd20] sm:$0xff]   ;;  %v11143_v8 = vld [vmem:[#allocation5 + $0xd70] sm:$0xff]  }
 0x1f8   :  { %v11760_v55 = vadd.f32 %v9765_v47, %v6974_v50  ;;  %v6977_v62 = vadd.f32 %v9746_v56, %v11757_v5  ;;  %10063 = vmatprep.subr.bf16.mxu1 %v11104_v4  ;;  %v11109_v5 = vld [vmem:[#allocation5 + $0xc28] sm:$0xff]   ;;  %v11130_v50 = vld [vmem:[#allocation5 + $0xd90] sm:$0xff]  }
 0x1f9   :  { %10044 = vmatpush3.bf16.msra.mxu0 %v11109_v5  ;;  %v11139_v4 = vld [vmem:[#allocation5 + $0xd68] sm:$0xff]   ;;  %v11145_v5 = vld [vmem:[#allocation5 + $0xd30] sm:$0xff]  }
 0x1fa   :  { %v11763_v1 = vadd.f32 %v9768_v60, %v6977_v62  ;;  %10045 = vmatprep.subr.bf16.mxu0 %v11111_v11  ;;  %v11133_v60 = vld [vmem:[#allocation5 + $0xd18] sm:$0xff]   ;;  %v11135_v62 = vld [vmem:[#allocation5 + $0xd60] sm:$0xff]  }
 0x1fb   :  { %10064 = vmatpush3.bf16.msra.mxu1 %v11106_v6  ;;  %v11142_v6 = vld [vmem:[#allocation5 + $0xda8] sm:$0xff]   ;;  %v11147_v11 = vld [vmem:[#allocation5 + $0xd78] sm:$0xff]  }
 0x1fc   :  { %10065 = vmatprep.subr.bf16.mxu1 %v11108_v3  ;;  %v11144_v3 = vld [vmem:[#allocation5 + $0xdf0] sm:$0xff]  }
 0x1fd   :  { %10046 = vmatpush3.bf16.msra.mxu0 %v11113_v9  ;;  %v11149_v9 = vld [vmem:[#allocation5 + $0xd38] sm:$0xff]  }
 0x1fe   :  { %10047 = vmatprep.subr.bf16.mxu0 %v11115_v14  ;;  %v143_v14 = vld [vmem:[#allocation2 + $0x1a8] sm:$0xff] }
 0x1ff   :  { %10066 = vmatpush3.bf16.msra.mxu1 %v11110_v10  ;;  %v11146_v10 = vld [vmem:[#allocation5 + $0xdb0] sm:$0xff]  }
 0x200   :  { %10067 = vmatprep.subr.bf16.mxu1 %v11112_v7  ;;  %v11148_v7 = vld [vmem:[#allocation5 + $0xdf8] sm:$0xff]  }
 0x201   :  { %10048 = vmatpush3.bf16.msra.mxu0 %v11117_v12  ;;  %v145_v12 = vld [vmem:[#allocation2 + $0x1b8] sm:$0xff] }
 0x202   :  { %10077 = vmatprep.subr.bf16.mxu0 %v11119_v29  ;;  %v337_v20 = vpack.c.bf16 %v241_v18, %v145_v12  ;;  %v11155_v29 = vld [vmem:[#allocation5 + $0xe48] sm:$0xff]   ;;  %v146_v12 = vld [vmem:[#allocation2 + $0x1c0] sm:$0xff]  ;;  %v148_v18 = vld [vmem:[#allocation2 + $0x1d0] sm:$0xff] }
 0x203   :  { %10068 = vmatpush3.bf16.msra.mxu1 %v11114_v13  ;;  %v11150_v13 = vld [vmem:[#allocation5 + $0xdb8] sm:$0xff]  }
 0x204   :  { %10069 = vmatprep.subr.bf16.mxu1 %v11116_v15  ;;  %7546 = vmatmul.mubr.bf16.vlgmr.msra.gmra.mrb[48].mxu0 %v330_v27  ;;  %v239_v15 = vld [vmem:[#allocation2 + $0x4a8] sm:$0xff]  ;;  %v11153_v27 = vld [vmem:[#allocation5 + $0xe00] sm:$0xff]  }
 0x205   :  { %10078 = vmatpush3.bf16.msra.mxu0 %v11121_v31  ;;  %v11156_v31 = vld [vmem:[#allocation5 + $0xec8] sm:$0xff]  }
 0x206   :  { %10079 = vmatprep.subr.bf16.mxu0 %v11123_v33  ;;  %v11157_v33 = vld [vmem:[#allocation5 + $0xe08] sm:$0xff]  }
 0x207   :  { %10070 = vmatpush3.bf16.msra.mxu1 %v11118_v17  ;;  %v335_v17 = vpack.c.bf16 %v239_v15, %v143_v14 }
 0x208   :  { %10099 = vmatprep.subr.bf16.mxu1 %v11120_v30 }
 0x209   :  { %10080 = vmatpush3.bf16.msra.mxu0 %v11125_v37  ;;  %7627 = vmatprep.mubr.bf16.mxu0 %v335_v17  ;;  %v242_v17 = vld [vmem:[#allocation2 + $0x4c0] sm:$0xff] }
 0x20a   :  { %7587 = vmatmul.mubr.bf16.vlgmr.msra.gmra.mrb[48].mxu1 %v332_v28  ;;  %10081 = vmatprep.subr.bf16.mxu0 %v11127_v42  ;;  %v11154_v28 = vld [vmem:[#allocation5 + $0xe80] sm:$0xff]   ;;  %v338_v19 = vpack.c.bf16 %v242_v17, %v146_v12 }
 0x20b   :  { %10100 = vmatpush3.bf16.msra.mxu1 %v11122_v32  ;;  %7668 = vmatprep.mubr.bf16.mxu1 %v337_v20  ;;  %v340_v20 = vpack.c.bf16 %v244_v16, %v148_v18  ;;  %v11215_v18 = vld [vmem:[#allocation5 + $0x1040] sm:$0xff]  }
 0x20c   :  { %10101 = vmatprep.subr.bf16.mxu1 %v11124_v35  ;;  %v11158_v35 = vld [vmem:[#allocation5 + $0xe88] sm:$0xff]   ;;  %v11217_v16 = vld [vmem:[#allocation5 + $0x1000] sm:$0xff]  }
 0x20d   :  { %10082 = vmatpush3.bf16.msra.mxu0 %v11129_v48 }
 0x20e   :  { %10083 = vmatprep.subr.bf16.mxu0 %v11131_v54 }
 0x20f   :  { %10102 = vmatpush3.bf16.msra.mxu1 %v11126_v39 }
 0x210   :  { %10103 = vmatprep.subr.bf16.mxu1 %v11128_v45 }
 0x211   :  { %10084 = vmatpush3.bf16.msra.mxu0 %v11133_v60  ;;  %v11168_v60 = vld [vmem:[#allocation5 + $0xee0] sm:$0xff]  }
 0x212   :  { %v9785_v34 = vpop.f32.mrb[24].mxu0  ;;  %10085 = vmatprep.subr.bf16.mxu0 %v11135_v62  ;;  %v11170_v62 = vld [vmem:[#allocation5 + $0xea0] sm:$0xff]  }
 0x213   :  { %v9807_v36 = vpop.f32.mrb[24].mxu1  ;;  %v9786_v38 = vpop.f32.mrb[25].mxu0  ;;  %10104 = vmatpush3.bf16.msra.mxu1 %v11130_v50  ;;  %v11163_v50 = vld [vmem:[#allocation5 + $0xe58] sm:$0xff]  }
 0x214   :  { %v9787_v40 = vadd.f32 %v9786_v38, %v9785_v34  ;;  %v9808_v41 = vpop.f32.mrb[25].mxu1  ;;  %v9788_v44 = vpop.f32.mrb[26].mxu0  ;;  %10105 = vmatprep.subr.bf16.mxu1 %v11132_v57  ;;  %v11159_v38 = vld [vmem:[#allocation5 + $0xe50] sm:$0xff]  }
 0x215   :  { %v9809_v43 = vadd.f32 %v9808_v41, %v9807_v36  ;;  %v9810_v47 = vpop.f32.mrb[26].mxu1  ;;  %v9789_v49 = vpop.f32.mrb[27].mxu0  ;;  %10086 = vmatpush3.bf16.msra.mxu0 %v11137_v59  ;;  %v11160_v41 = vld [vmem:[#allocation5 + $0xed0] sm:$0xff]   ;;  %v11172_v59 = vld [vmem:[#allocation5 + $0xee8] sm:$0xff]  }
 0x216   :  { %v7056_v46 = vadd.f32 %v9787_v40, %v11760_v55  ;;  %v9790_v52 = vadd.f32 %v9789_v49, %v9788_v44  ;;  %v9811_v53 = vpop.f32.mrb[27].mxu1  ;;  %v11134_v55 = vld [vmem:[#allocation5 + $0xd98] sm:$0xff]   ;;  %10087 = vmatprep.subr.bf16.mxu0 %v11139_v4  ;;  %v11161_v44 = vld [vmem:[#allocation5 + $0xe10] sm:$0xff]  }
 0x217   :  { %v9812_v56 = vadd.f32 %v9811_v53, %v9810_v47  ;;  %10106 = vmatpush3.bf16.msra.mxu1 %v11134_v55  ;;  %v11164_v53 = vld [vmem:[#allocation5 + $0xed8] sm:$0xff]   ;;  %v11169_v55 = vld [vmem:[#allocation5 + $0xe20] sm:$0xff]   ;;  %v11175_v4 = vld [vmem:[#allocation5 + $0xe70] sm:$0xff]  }
 0x218   :  { %v11766_v51 = vadd.f32 %v9809_v43, %v7056_v46  ;;  %v7059_v58 = vadd.f32 %v9790_v52, %v11763_v1  ;;  %10107 = vmatprep.subr.bf16.mxu1 %v11136_v0  ;;  %v11141_v1 = vld [vmem:[#allocation5 + $0xd28] sm:$0xff]   ;;  %v11162_v46 = vld [vmem:[#allocation5 + $0xe90] sm:$0xff]  }
 0x219   :  { %10088 = vmatpush3.bf16.msra.mxu0 %v11141_v1  ;;  %v11171_v0 = vld [vmem:[#allocation5 + $0xe68] sm:$0xff]   ;;  %v11177_v1 = vld [vmem:[#allocation5 + $0xe30] sm:$0xff]  }
 0x21a   :  { %v11769_v61 = vadd.f32 %v9812_v56, %v7059_v58  ;;  %10089 = vmatprep.subr.bf16.mxu0 %v11143_v8  ;;  %v11165_v56 = vld [vmem:[#allocation5 + $0xe18] sm:$0xff]   ;;  %v11167_v58 = vld [vmem:[#allocation5 + $0xe60] sm:$0xff]  }
 0x21b   :  { %10108 = vmatpush3.bf16.msra.mxu1 %v11138_v2  ;;  %v11174_v2 = vld [vmem:[#allocation5 + $0xea8] sm:$0xff]   ;;  %v11179_v8 = vld [vmem:[#allocation5 + $0xe78] sm:$0xff]  }
 0x21c   :  { %10109 = vmatprep.subr.bf16.mxu1 %v11140_v63  ;;  %v11176_v63 = vld [vmem:[#allocation5 + $0xef0] sm:$0xff]  }
 0x21d   :  { %10090 = vmatpush3.bf16.msra.mxu0 %v11145_v5  ;;  %v11181_v5 = vld [vmem:[#allocation5 + $0xe38] sm:$0xff]  }
 0x21e   :  { %10091 = vmatprep.subr.bf16.mxu0 %v11147_v11  ;;  %v147_v11 = vld [vmem:[#allocation2 + $0x1c8] sm:$0xff] }
 0x21f   :  { %10110 = vmatpush3.bf16.msra.mxu1 %v11142_v6  ;;  %v11178_v6 = vld [vmem:[#allocation5 + $0xeb0] sm:$0xff]  }
 0x220   :  { %10111 = vmatprep.subr.bf16.mxu1 %v11144_v3  ;;  %v11180_v3 = vld [vmem:[#allocation5 + $0xef8] sm:$0xff]  }
 0x221   :  { %10092 = vmatpush3.bf16.msra.mxu0 %v11149_v9  ;;  %v149_v9 = vld [vmem:[#allocation2 + $0x1d8] sm:$0xff] }
 0x222   :  { %10121 = vmatprep.subr.bf16.mxu0 %v11151_v25  ;;  %v11187_v25 = vld [vmem:[#allocation5 + $0xf48] sm:$0xff]  }
 0x223   :  { %10112 = vmatpush3.bf16.msra.mxu1 %v11146_v10  ;;  %v11182_v10 = vld [vmem:[#allocation5 + $0xeb8] sm:$0xff]  }
 0x224   :  { %10113 = vmatprep.subr.bf16.mxu1 %v11148_v7  ;;  %7628 = vmatmul.mubr.bf16.vlgmr.msra.gmra.mrb[52].mxu0 %v334_v21  ;;  %v243_v7 = vld [vmem:[#allocation2 + $0x4c8] sm:$0xff]  ;;  %v11183_v21 = vld [vmem:[#allocation5 + $0xf40] sm:$0xff]  }
 0x225   :  { %10122 = vmatpush3.bf16.msra.mxu0 %v11153_v27  ;;  %v339_v14 = vpack.c.bf16 %v243_v7, %v147_v11  ;;  %v11188_v27 = vld [vmem:[#allocation5 + $0xfc8] sm:$0xff]   ;;  %v249_v11 = vld [vmem:[#allocation2 + $0x4f8] sm:$0xff]  ;;  %v150_v7 = vld [vmem:[#allocation2 + $0x1e0] sm:$0xff] }
 0x226   :  { %10123 = vmatprep.subr.bf16.mxu0 %v11155_v29  ;;  %v11189_v29 = vld [vmem:[#allocation5 + $0xf08] sm:$0xff]  }
 0x227   :  { %10114 = vmatpush3.bf16.msra.mxu1 %v11150_v13  ;;  %v245_v13 = vld [vmem:[#allocation2 + $0x4d8] sm:$0xff]  ;;  %7709 = vmatprep.mubr.bf16.mxu0 %v339_v14  ;;  %v152_v14 = vld [vmem:[#allocation2 + $0x1f0] sm:$0xff] }
 0x228   :  { %10143 = vmatprep.subr.bf16.mxu1 %v11152_v26  ;;  %v341_v15 = vpack.c.bf16 %v245_v13, %v149_v9  ;;  %v246_v13 = vld [vmem:[#allocation2 + $0x4e0] sm:$0xff] }
 0x229   :  { %10124 = vmatpush3.bf16.msra.mxu0 %v11157_v33  ;;  %v342_v12 = vpack.c.bf16 %v246_v13, %v150_v7  ;;  %v156_v7 = vld [vmem:[#allocation2 + $0x210] sm:$0xff] }
 0x22a   :  { %7669 = vmatmul.mubr.bf16.vlgmr.msra.gmra.mrb[52].mxu1 %v336_v24  ;;  %10125 = vmatprep.subr.bf16.mxu0 %v11159_v38  ;;  %v11186_v24 = vld [vmem:[#allocation5 + $0xf80] sm:$0xff]  }
 0x22b   :  { %10144 = vmatpush3.bf16.msra.mxu1 %v11154_v28  ;;  %7750 = vmatprep.mubr.bf16.mxu1 %v341_v15  ;;  %v248_v15 = vld [vmem:[#allocation2 + $0x4f0] sm:$0xff] }
 0x22c   :  { %10145 = vmatprep.subr.bf16.mxu1 %v11156_v31  ;;  %v11190_v31 = vld [vmem:[#allocation5 + $0xf88] sm:$0xff]   ;;  %v344_v17 = vpack.c.bf16 %v248_v15, %v152_v14  ;;  %v11247_v14 = vld [vmem:[#allocation5 + $0x1140] sm:$0xff]  }
 0x22d   :  { %10126 = vmatpush3.bf16.msra.mxu0 %v11161_v44  ;;  %v11248_v15 = vld [vmem:[#allocation5 + $0x11c0] sm:$0xff]  }
 0x22e   :  { %10127 = vmatprep.subr.bf16.mxu0 %v11163_v50 }
 0x22f   :  { %10146 = vmatpush3.bf16.msra.mxu1 %v11158_v35 }
 0x230   :  { %10147 = vmatprep.subr.bf16.mxu1 %v11160_v41 }
 0x231   :  { %10128 = vmatpush3.bf16.msra.mxu0 %v11165_v56  ;;  %v11200_v56 = vld [vmem:[#allocation5 + $0xfe0] sm:$0xff]  }
 0x232   :  { %v9829_v30 = vpop.f32.mrb[28].mxu0  ;;  %10129 = vmatprep.subr.bf16.mxu0 %v11167_v58  ;;  %v11202_v58 = vld [vmem:[#allocation5 + $0xfa0] sm:$0xff]  }
 0x233   :  { %v9851_v32 = vpop.f32.mrb[28].mxu1  ;;  %v9830_v34 = vpop.f32.mrb[29].mxu0  ;;  %10148 = vmatpush3.bf16.msra.mxu1 %v11162_v46  ;;  %v11195_v46 = vld [vmem:[#allocation5 + $0xf58] sm:$0xff]  }
 0x234   :  { %v9831_v36 = vadd.f32 %v9830_v34, %v9829_v30  ;;  %v9852_v37 = vpop.f32.mrb[29].mxu1  ;;  %v9832_v40 = vpop.f32.mrb[30].mxu0  ;;  %10149 = vmatprep.subr.bf16.mxu1 %v11164_v53  ;;  %v11191_v34 = vld [vmem:[#allocation5 + $0xf50] sm:$0xff]  }
 0x235   :  { %v9853_v39 = vadd.f32 %v9852_v37, %v9851_v32  ;;  %v9854_v43 = vpop.f32.mrb[30].mxu1  ;;  %v9833_v45 = vpop.f32.mrb[31].mxu0  ;;  %10130 = vmatpush3.bf16.msra.mxu0 %v11169_v55  ;;  %v11192_v37 = vld [vmem:[#allocation5 + $0xfd0] sm:$0xff]   ;;  %v11204_v55 = vld [vmem:[#allocation5 + $0xfe8] sm:$0xff]  }
 0x236   :  { %v7138_v42 = vadd.f32 %v9831_v36, %v11766_v51  ;;  %v9834_v48 = vadd.f32 %v9833_v45, %v9832_v40  ;;  %v9855_v49 = vpop.f32.mrb[31].mxu1  ;;  %v11166_v51 = vld [vmem:[#allocation5 + $0xe98] sm:$0xff]   ;;  %10131 = vmatprep.subr.bf16.mxu0 %v11171_v0  ;;  %v11193_v40 = vld [vmem:[#allocation5 + $0xf10] sm:$0xff]  }
 0x237   :  { %v9856_v52 = vadd.f32 %v9855_v49, %v9854_v43  ;;  %10150 = vmatpush3.bf16.msra.mxu1 %v11166_v51  ;;  %v11196_v49 = vld [vmem:[#allocation5 + $0xfd8] sm:$0xff]   ;;  %v11201_v51 = vld [vmem:[#allocation5 + $0xf20] sm:$0xff]   ;;  %v11207_v0 = vld [vmem:[#allocation5 + $0xf70] sm:$0xff]  }
 0x238   :  { %v11772_v47 = vadd.f32 %v9853_v39, %v7138_v42  ;;  %v7141_v54 = vadd.f32 %v9834_v48, %v11769_v61  ;;  %10151 = vmatprep.subr.bf16.mxu1 %v11168_v60  ;;  %v11173_v61 = vld [vmem:[#allocation5 + $0xe28] sm:$0xff]   ;;  %v11194_v42 = vld [vmem:[#allocation5 + $0xf90] sm:$0xff]  }
 0x239   :  { %10132 = vmatpush3.bf16.msra.mxu0 %v11173_v61  ;;  %v11203_v60 = vld [vmem:[#allocation5 + $0xf68] sm:$0xff]   ;;  %v11209_v61 = vld [vmem:[#allocation5 + $0xf30] sm:$0xff]  }
 0x23a   :  { %v11775_v57 = vadd.f32 %v9856_v52, %v7141_v54  ;;  %10133 = vmatprep.subr.bf16.mxu0 %v11175_v4  ;;  %v11197_v52 = vld [vmem:[#allocation5 + $0xf18] sm:$0xff]   ;;  %v11199_v54 = vld [vmem:[#allocation5 + $0xf60] sm:$0xff]  }
 0x23b   :  { %10152 = vmatpush3.bf16.msra.mxu1 %v11170_v62  ;;  %v11206_v62 = vld [vmem:[#allocation5 + $0xfa8] sm:$0xff]   ;;  %v11211_v4 = vld [vmem:[#allocation5 + $0xf78] sm:$0xff]  }
 0x23c   :  { %10153 = vmatprep.subr.bf16.mxu1 %v11172_v59  ;;  %v11208_v59 = vld [vmem:[#allocation5 + $0xff0] sm:$0xff]  }
 0x23d   :  { %10134 = vmatpush3.bf16.msra.mxu0 %v11177_v1  ;;  %v11213_v1 = vld [vmem:[#allocation5 + $0xf38] sm:$0xff]  }
 0x23e   :  { %10135 = vmatprep.subr.bf16.mxu0 %v11179_v8  ;;  %v151_v8 = vld [vmem:[#allocation2 + $0x1e8] sm:$0xff] }
 0x23f   :  { %10154 = vmatpush3.bf16.msra.mxu1 %v11174_v2  ;;  %v11210_v2 = vld [vmem:[#allocation5 + $0xfb0] sm:$0xff]  }
 0x240   :  { %10155 = vmatprep.subr.bf16.mxu1 %v11176_v63  ;;  %v11212_v63 = vld [vmem:[#allocation5 + $0xff8] sm:$0xff]  }
 0x241   :  { %10136 = vmatpush3.bf16.msra.mxu0 %v11181_v5 }
 0x242   :  { %10165 = vmatprep.subr.bf16.mxu0 %v11183_v21  ;;  %v11219_v21 = vld [vmem:[#allocation5 + $0x1048] sm:$0xff]  }
 0x243   :  { %10156 = vmatpush3.bf16.msra.mxu1 %v11178_v6  ;;  %v11214_v6 = vld [vmem:[#allocation5 + $0xfb8] sm:$0xff]  }
 0x244   :  { %10157 = vmatprep.subr.bf16.mxu1 %v11180_v3  ;;  %7710 = vmatmul.mubr.bf16.vlgmr.msra.gmra.mrb[56].mxu0 %v338_v19  ;;  %v247_v3 = vld [vmem:[#allocation2 + $0x4e8] sm:$0xff]  ;;  %v11216_v19 = vld [vmem:[#allocation5 + $0x10c0] sm:$0xff]  }
 0x245   :  { %10166 = vmatpush3.bf16.msra.mxu0 %v11185_v23  ;;  %v343_v5 = vpack.c.bf16 %v247_v3, %v151_v8  ;;  %v253_v8 = vld [vmem:[#allocation2 + $0x518] sm:$0xff]  ;;  %v154_v3 = vld [vmem:[#allocation2 + $0x200] sm:$0xff] }
 0x246   :  { %10167 = vmatprep.subr.bf16.mxu0 %v11187_v25 }
 0x247   :  { %10158 = vmatpush3.bf16.msra.mxu1 %v11182_v10  ;;  %v153_v10 = vld [vmem:[#allocation2 + $0x1f8] sm:$0xff]  ;;  %7791 = vmatprep.mubr.bf16.mxu0 %v343_v5  ;;  %v250_v5 = vld [vmem:[#allocation2 + $0x500] sm:$0xff] }
 0x248   :  { %10187 = vmatprep.subr.bf16.mxu1 %v11184_v22  ;;  %v345_v9 = vpack.c.bf16 %v249_v11, %v153_v10  ;;  %v11220_v22 = vld [vmem:[#allocation5 + $0x10c8] sm:$0xff]   ;;  %v346_v11 = vpack.c.bf16 %v250_v5, %v154_v3  ;;  %v256_v5 = vld [vmem:[#allocation2 + $0x530] sm:$0xff] }
 0x249   :  { %10168 = vmatpush3.bf16.msra.mxu0 %v11189_v29 }
 0x24a   :  { %7751 = vmatmul.mubr.bf16.vlgmr.msra.gmra.mrb[56].mxu1 %v340_v20  ;;  %10169 = vmatprep.subr.bf16.mxu0 %v11191_v34  ;;  %v11218_v20 = vld [vmem:[#allocation5 + $0x1080] sm:$0xff]   ;;  %v11225_v34 = vld [vmem:[#allocation5 + $0x1010] sm:$0xff]  }
 0x24b   :  { %10188 = vmatpush3.bf16.msra.mxu1 %v11186_v24  ;;  %7832 = vmatprep.mubr.bf16.mxu1 %v345_v9  ;;  %v11221_v24 = vld [vmem:[#allocation5 + $0x1008] sm:$0xff]   ;;  %v252_v9 = vld [vmem:[#allocation2 + $0x510] sm:$0xff] }
 0x24c   :  { %10189 = vmatprep.subr.bf16.mxu1 %v11188_v27  ;;  %v348_v13 = vpack.c.bf16 %v252_v9, %v156_v7  ;;  %v11280_v7 = vld [vmem:[#allocation5 + $0x12c0] sm:$0xff]  }
 0x24d   :  { %10170 = vmatpush3.bf16.msra.mxu0 %v11193_v40  ;;  %v11281_v9 = vld [vmem:[#allocation5 + $0x1200] sm:$0xff]  }
 0x24e   :  { %10171 = vmatprep.subr.bf16.mxu0 %v11195_v46  ;;  %v11229_v46 = vld [vmem:[#allocation5 + $0x1018] sm:$0xff]  }
 0x24f   :  { %10190 = vmatpush3.bf16.msra.mxu1 %v11190_v31  ;;  %v11224_v31 = vld [vmem:[#allocation5 + $0x10d0] sm:$0xff]  }
 0x250   :  { %10191 = vmatprep.subr.bf16.mxu1 %v11192_v37  ;;  %v11226_v37 = vld [vmem:[#allocation5 + $0x1090] sm:$0xff]  }
 0x251   :  { %10172 = vmatpush3.bf16.msra.mxu0 %v11197_v52  ;;  %v11232_v52 = vld [vmem:[#allocation5 + $0x10e0] sm:$0xff]  }
 0x252   :  { %10173 = vmatprep.subr.bf16.mxu0 %v11199_v54  ;;  %v11234_v54 = vld [vmem:[#allocation5 + $0x10a0] sm:$0xff]  }
 0x253   :  { %v9873_v26 = vpop.f32.mrb[32].mxu0  ;;  %v9895_v28 = vpop.f32.mrb[32].mxu1  ;;  %10192 = vmatpush3.bf16.msra.mxu1 %v11194_v42 }
 0x254   :  { %v9874_v30 = vpop.f32.mrb[33].mxu0  ;;  %v9896_v33 = vpop.f32.mrb[33].mxu1  ;;  %10193 = vmatprep.subr.bf16.mxu1 %v11196_v49  ;;  %v11230_v49 = vld [vmem:[#allocation5 + $0x1098] sm:$0xff]  }
 0x255   :  { %v9875_v32 = vadd.f32 %v9874_v30, %v9873_v26  ;;  %v9897_v35 = vadd.f32 %v9896_v33, %v9895_v28  ;;  %v9876_v36 = vpop.f32.mrb[34].mxu0  ;;  %v9898_v39 = vpop.f32.mrb[34].mxu1  ;;  %10174 = vmatpush3.bf16.msra.mxu0 %v11201_v51  ;;  %v11222_v26 = vld [vmem:[#allocation5 + $0x1088] sm:$0xff]   ;;  %v11223_v28 = vld [vmem:[#allocation5 + $0x1050] sm:$0xff]  }
 0x256   :  { %v9877_v41 = vpop.f32.mrb[35].mxu0  ;;  %v9899_v45 = vpop.f32.mrb[35].mxu1  ;;  %10175 = vmatprep.subr.bf16.mxu0 %v11203_v60  ;;  %v11236_v51 = vld [vmem:[#allocation5 + $0x10e8] sm:$0xff]   ;;  %v11239_v60 = vld [vmem:[#allocation5 + $0x1070] sm:$0xff]  }
 0x257   :  { %v7220_v38 = vadd.f32 %v9875_v32, %v11772_v47  ;;  %v9878_v44 = vadd.f32 %v9877_v41, %v9876_v36  ;;  %v9900_v48 = vadd.f32 %v9899_v45, %v9898_v39  ;;  %v11198_v47 = vld [vmem:[#allocation5 + $0xf98] sm:$0xff]  }
 0x258   :  { %10194 = vmatpush3.bf16.msra.mxu1 %v11198_v47  ;;  %v11227_v39 = vld [vmem:[#allocation5 + $0x1058] sm:$0xff]   ;;  %v11233_v47 = vld [vmem:[#allocation5 + $0x1020] sm:$0xff]  }
 0x259   :  { %v11778_v43 = vadd.f32 %v9897_v35, %v7220_v38  ;;  %v7223_v50 = vadd.f32 %v9878_v44, %v11775_v57  ;;  %10195 = vmatprep.subr.bf16.mxu1 %v11200_v56  ;;  %v11205_v57 = vld [vmem:[#allocation5 + $0xf28] sm:$0xff]   ;;  %v11228_v44 = vld [vmem:[#allocation5 + $0x10d8] sm:$0xff]  }
 0x25a   :  { %10176 = vmatpush3.bf16.msra.mxu0 %v11205_v57  ;;  %v11235_v56 = vld [vmem:[#allocation5 + $0x1068] sm:$0xff]   ;;  %v11241_v57 = vld [vmem:[#allocation5 + $0x1030] sm:$0xff]  }
 0x25b   :  { %v11781_v53 = vadd.f32 %v9900_v48, %v7223_v50  ;;  %10177 = vmatprep.subr.bf16.mxu0 %v11207_v0  ;;  %v11243_v0 = vld [vmem:[#allocation5 + $0x1078] sm:$0xff]  }
 0x25c   :  { %10196 = vmatpush3.bf16.msra.mxu1 %v11202_v58  ;;  %v11237_v58 = vld [vmem:[#allocation5 + $0x1028] sm:$0xff]  }
 0x25d   :  { %10197 = vmatprep.subr.bf16.mxu1 %v11204_v55  ;;  %v11240_v55 = vld [vmem:[#allocation5 + $0x10f0] sm:$0xff]  }
 0x25e   :  { %10178 = vmatpush3.bf16.msra.mxu0 %v11209_v61  ;;  %v11245_v61 = vld [vmem:[#allocation5 + $0x1038] sm:$0xff]  }
 0x25f   :  { %10179 = vmatprep.subr.bf16.mxu0 %v11211_v4  ;;  %v155_v4 = vld [vmem:[#allocation2 + $0x208] sm:$0xff] }
 0x260   :  { %10198 = vmatpush3.bf16.msra.mxu1 %v11206_v62  ;;  %v11242_v62 = vld [vmem:[#allocation5 + $0x10b0] sm:$0xff]  }
 0x261   :  { %10199 = vmatprep.subr.bf16.mxu1 %v11208_v59  ;;  %v11244_v59 = vld [vmem:[#allocation5 + $0x10f8] sm:$0xff]  }
 0x262   :  { %10180 = vmatpush3.bf16.msra.mxu0 %v11213_v1  ;;  %v157_v1 = vld [vmem:[#allocation2 + $0x218] sm:$0xff] }
 0x263   :  { %10209 = vmatprep.subr.bf16.mxu0 %v11215_v18  ;;  %v349_v10 = vpack.c.bf16 %v253_v8, %v157_v1  ;;  %v11251_v18 = vld [vmem:[#allocation5 + $0x1148] sm:$0xff]   ;;  %v158_v1 = vld [vmem:[#allocation2 + $0x220] sm:$0xff]  ;;  %v160_v8 = vld [vmem:[#allocation2 + $0x230] sm:$0xff] }
 0x264   :  { %10200 = vmatpush3.bf16.msra.mxu1 %v11210_v2  ;;  %v11246_v2 = vld [vmem:[#allocation5 + $0x10b8] sm:$0xff]  }
 0x265   :  { %10201 = vmatprep.subr.bf16.mxu1 %v11212_v63  ;;  %7792 = vmatmul.mubr.bf16.vlgmr.msra.gmra.mrb[60].mxu0 %v342_v12  ;;  %v251_v63 = vld [vmem:[#allocation2 + $0x508] sm:$0xff]  ;;  %v11249_v12 = vld [vmem:[#allocation5 + $0x1100] sm:$0xff]  }
 0x266   :  { %10210 = vmatpush3.bf16.msra.mxu0 %v11217_v16  ;;  %v11252_v16 = vld [vmem:[#allocation5 + $0x11c8] sm:$0xff]  }
 0x267   :  { %10211 = vmatprep.subr.bf16.mxu0 %v11219_v21  ;;  %v11253_v21 = vld [vmem:[#allocation5 + $0x1108] sm:$0xff]  }
 0x268   :  { %10202 = vmatpush3.bf16.msra.mxu1 %v11214_v6  ;;  %v347_v6 = vpack.c.bf16 %v251_v63, %v155_v4 }
 0x269   :  { %10231 = vmatprep.subr.bf16.mxu1 %v11216_v19 }
 0x26a   :  { %10212 = vmatpush3.bf16.msra.mxu0 %v11221_v24  ;;  %7873 = vmatprep.mubr.bf16.mxu0 %v347_v6  ;;  %v254_v6 = vld [vmem:[#allocation2 + $0x520] sm:$0xff] }
 0x26b   :  { %7833 = vmatmul.mubr.bf16.vlgmr.msra.gmra.mrb[60].mxu1 %v344_v17  ;;  %10213 = vmatprep.subr.bf16.mxu0 %v11223_v28  ;;  %v11250_v17 = vld [vmem:[#allocation5 + $0x1180] sm:$0xff]   ;;  %v350_v3 = vpack.c.bf16 %v254_v6, %v158_v1 }
 0x26c   :  { %10232 = vmatpush3.bf16.msra.mxu1 %v11218_v20  ;;  %7914 = vmatprep.mubr.bf16.mxu1 %v349_v10  ;;  %v352_v10 = vpack.c.bf16 %v256_v5, %v160_v8  ;;  %v11311_v8 = vld [vmem:[#allocation5 + $0x1340] sm:$0xff]  }
 0x26d   :  { %10233 = vmatprep.subr.bf16.mxu1 %v11220_v22  ;;  %v11313_v5 = vld [vmem:[#allocation5 + $0x1300] sm:$0xff]  }
 0x26e   :  { %10214 = vmatpush3.bf16.msra.mxu0 %v11225_v34  ;;  %v11258_v34 = vld [vmem:[#allocation5 + $0x1190] sm:$0xff]  }
 0x26f   :  { %10215 = vmatprep.subr.bf16.mxu0 %v11227_v39 }
 0x270   :  { %10234 = vmatpush3.bf16.msra.mxu1 %v11222_v26  ;;  %v11255_v26 = vld [vmem:[#allocation5 + $0x1150] sm:$0xff]  }
 0x271   :  { %10235 = vmatprep.subr.bf16.mxu1 %v11224_v31 }
 0x272   :  { %10216 = vmatpush3.bf16.msra.mxu0 %v11229_v46  ;;  %v11263_v46 = vld [vmem:[#allocation5 + $0x1160] sm:$0xff]  }
 0x274   :  { %10236 = vmatpush3.bf16.msra.mxu1 %v11226_v37 }
 0x275   :  { %10237 = vmatprep.subr.bf16.mxu1 %v11228_v44  ;;  %v11261_v44 = vld [vmem:[#allocation5 + $0x1118] sm:$0xff]  }
 0x277   :  { %v9917_v23 = vpop.f32.mrb[36].mxu0 }
 0x278   :  { %v9918_v27 = vpop.f32.mrb[37].mxu0  ;;  %10238 = vmatpush3.bf16.msra.mxu1 %v11230_v49  ;;  %v11265_v49 = vld [vmem:[#allocation5 + $0x1120] sm:$0xff]  }
 0x279   :  { %v9919_v29 = vadd.f32 %v9918_v27, %v9917_v23  ;;  %v9920_v33 = vpop.f32.mrb[38].mxu0  ;;  %10239 = vmatprep.subr.bf16.mxu1 %v11232_v52  ;;  %v11254_v23 = vld [vmem:[#allocation5 + $0x1188] sm:$0xff]  }
 0x27a   :  { %v9921_v38 = vpop.f32.mrb[39].mxu0  ;;  %v11267_v52 = vld [vmem:[#allocation5 + $0x1168] sm:$0xff]  }
 0x27b   :  { %v7302_v35 = vadd.f32 %v9919_v29, %v11778_v43  ;;  %v9922_v41 = vadd.f32 %v9921_v38, %v9920_v33  ;;  %v11231_v43 = vld [vmem:[#allocation5 + $0x1060] sm:$0xff]   ;;  %v11256_v29 = vld [vmem:[#allocation5 + $0x11d0] sm:$0xff]   ;;  %v11259_v38 = vld [vmem:[#allocation5 + $0x1158] sm:$0xff]  }
 0x27c   :  { %10217 = vmatprep.subr.bf16.mxu0 %v11231_v43  ;;  %10240 = vmatpush3.bf16.msra.mxu1 %v11234_v54  ;;  %v11266_v43 = vld [vmem:[#allocation5 + $0x11a0] sm:$0xff]   ;;  %v11270_v54 = vld [vmem:[#allocation5 + $0x11a8] sm:$0xff]  }
 0x27d   :  { %v9939_v25 = vpop.f32.mrb[36].mxu1  ;;  %v7305_v48 = vadd.f32 %v9922_v41, %v11781_v53  ;;  %10218 = vmatpush3.bf16.msra.mxu0 %v11233_v47  ;;  %10241 = vmatprep.subr.bf16.mxu1 %v11236_v51  ;;  %v11238_v53 = vld [vmem:[#allocation5 + $0x10a8] sm:$0xff]   ;;  %v11260_v41 = vld [vmem:[#allocation5 + $0x11d8] sm:$0xff]   ;;  %v11272_v51 = vld [vmem:[#allocation5 + $0x11f0] sm:$0xff]  }
 0x27e   :  { %v9940_v30 = vpop.f32.mrb[37].mxu1  ;;  %10219 = vmatprep.subr.bf16.mxu0 %v11235_v56  ;;  %v11268_v47 = vld [vmem:[#allocation5 + $0x11e8] sm:$0xff]   ;;  %v11271_v56 = vld [vmem:[#allocation5 + $0x1170] sm:$0xff]  }
 0x27f   :  { %v9941_v32 = vadd.f32 %v9940_v30, %v9939_v25  ;;  %v9942_v36 = vpop.f32.mrb[38].mxu1 }
 0x280   :  { %v9943_v42 = vpop.f32.mrb[39].mxu1  ;;  %10242 = vmatpush3.bf16.msra.mxu1 %v11238_v53  ;;  %v11274_v53 = vld [vmem:[#allocation5 + $0x11b0] sm:$0xff]  }
 0x281   :  { %v11784_v40 = vadd.f32 %v9941_v32, %v7302_v35  ;;  %v9944_v45 = vadd.f32 %v9943_v42, %v9942_v36  ;;  %10220 = vmatpush3.bf16.msra.mxu0 %v11237_v58  ;;  %10243 = vmatprep.subr.bf16.mxu1 %v11240_v55  ;;  %v11257_v32 = vld [vmem:[#allocation5 + $0x1110] sm:$0xff]   ;;  %v11276_v55 = vld [vmem:[#allocation5 + $0x11f8] sm:$0xff]  }
 0x282   :  { %10221 = vmatprep.subr.bf16.mxu0 %v11239_v60  ;;  %v11273_v58 = vld [vmem:[#allocation5 + $0x1130] sm:$0xff]   ;;  %v11275_v60 = vld [vmem:[#allocation5 + $0x1178] sm:$0xff]  }
 0x283   :  { %v11787_v50 = vadd.f32 %v9944_v45, %v7305_v48  ;;  %v11264_v48 = vld [vmem:[#allocation5 + $0x11e0] sm:$0xff]  }
 0x284   :  { %10244 = vmatpush3.bf16.msra.mxu1 %v11242_v62  ;;  %v11278_v62 = vld [vmem:[#allocation5 + $0x11b8] sm:$0xff]  }
 0x285   :  { %10222 = vmatpush3.bf16.msra.mxu0 %v11241_v57  ;;  %10245 = vmatprep.subr.bf16.mxu1 %v11244_v59  ;;  %v11277_v57 = vld [vmem:[#allocation5 + $0x1138] sm:$0xff]   ;;  %v255_v59 = vld [vmem:[#allocation2 + $0x528] sm:$0xff] }
 0x286   :  { %10223 = vmatprep.subr.bf16.mxu0 %v11243_v0  ;;  %v159_v0 = vld [vmem:[#allocation2 + $0x228] sm:$0xff] }
 0x287   :  { %v351_v4 = vpack.c.bf16 %v255_v59, %v159_v0  ;;  %v261_v0 = vld [vmem:[#allocation2 + $0x558] sm:$0xff]  ;;  %v162_v59 = vld [vmem:[#allocation2 + $0x240] sm:$0xff] }
 0x288   :  { %10246 = vmatpush3.bf16.msra.mxu1 %v11246_v2  ;;  %v257_v2 = vld [vmem:[#allocation2 + $0x538] sm:$0xff] }
 0x289   :  { %10224 = vmatpush3.bf16.msra.mxu0 %v11245_v61  ;;  %10275 = vmatprep.subr.bf16.mxu1 %v11248_v15  ;;  %v161_v61 = vld [vmem:[#allocation2 + $0x238] sm:$0xff] }
 0x28a   :  { %10253 = vmatprep.subr.bf16.mxu0 %v11247_v14  ;;  %v353_v63 = vpack.c.bf16 %v257_v2, %v161_v61  ;;  %v11283_v14 = vld [vmem:[#allocation5 + $0x1248] sm:$0xff]   ;;  %v258_v2 = vld [vmem:[#allocation2 + $0x540] sm:$0xff] }
 0x28b   :  { %7915 = vmatmul.mubr.bf16.vlgmr.msra.gmra.mrb[64].mxu1 %v348_v13  ;;  %v11282_v13 = vld [vmem:[#allocation5 + $0x1280] sm:$0xff]   ;;  %v354_v1 = vpack.c.bf16 %v258_v2, %v162_v59  ;;  %v168_v59 = vld [vmem:[#allocation2 + $0x270] sm:$0xff] }
 0x28c   :  { %7874 = vmatmul.mubr.bf16.vlgmr.msra.gmra.mrb[64].mxu0 %v346_v11  ;;  %10276 = vmatpush3.bf16.msra.mxu1 %v11250_v17  ;;  %v11279_v11 = vld [vmem:[#allocation5 + $0x1240] sm:$0xff]  }
 0x28d   :  { %10254 = vmatpush3.bf16.msra.mxu0 %v11249_v12  ;;  %10277 = vmatprep.subr.bf16.mxu1 %v11252_v16  ;;  %v11284_v12 = vld [vmem:[#allocation5 + $0x12c8] sm:$0xff]  }
 0x28e   :  { %10255 = vmatprep.subr.bf16.mxu0 %v11251_v18  ;;  %7955 = vmatprep.mubr.bf16.mxu0 %v351_v4  ;;  %v11285_v18 = vld [vmem:[#allocation5 + $0x1208] sm:$0xff]   ;;  %v164_v4 = vld [vmem:[#allocation2 + $0x250] sm:$0xff] }
 0x28f   :  { %7996 = vmatprep.mubr.bf16.mxu1 %v353_v63  ;;  %v11286_v16 = vld [vmem:[#allocation5 + $0x1288] sm:$0xff]   ;;  %v260_v63 = vld [vmem:[#allocation2 + $0x550] sm:$0xff] }
 0x290   :  { %10278 = vmatpush3.bf16.msra.mxu1 %v11254_v23  ;;  %v356_v6 = vpack.c.bf16 %v260_v63, %v164_v4  ;;  %v11343_v4 = vld [vmem:[#allocation5 + $0x1440] sm:$0xff]  }
 0x291   :  { %10256 = vmatpush3.bf16.msra.mxu0 %v11253_v21  ;;  %10279 = vmatprep.subr.bf16.mxu1 %v11256_v29  ;;  %v11344_v63 = vld [vmem:[#allocation5 + $0x14c0] sm:$0xff]  }
 0x292   :  { %10257 = vmatprep.subr.bf16.mxu0 %v11255_v26 }
 0x294   :  { %10280 = vmatpush3.bf16.msra.mxu1 %v11258_v34  ;;  %v11291_v34 = vld [vmem:[#allocation5 + $0x1258] sm:$0xff]  }
 0x295   :  { %10258 = vmatpush3.bf16.msra.mxu0 %v11257_v32  ;;  %10281 = vmatprep.subr.bf16.mxu1 %v11260_v41 }
 0x296   :  { %10259 = vmatprep.subr.bf16.mxu0 %v11259_v38 }
 0x297   :  { %v9961_v19 = vpop.f32.mrb[40].mxu0 }
 0x298   :  { %v9962_v22 = vpop.f32.mrb[41].mxu0 }
 0x299   :  { %v9963_v24 = vadd.f32 %v9962_v22, %v9961_v19  ;;  %v9964_v28 = vpop.f32.mrb[42].mxu0  ;;  %10260 = vmatpush3.bf16.msra.mxu0 %v11261_v44  ;;  %v11287_v22 = vld [vmem:[#allocation5 + $0x1250] sm:$0xff]   ;;  %v11296_v44 = vld [vmem:[#allocation5 + $0x12e0] sm:$0xff]  }
 0x29a   :  { %v9965_v33 = vpop.f32.mrb[43].mxu0  ;;  %10261 = vmatprep.subr.bf16.mxu0 %v11263_v46  ;;  %v11298_v46 = vld [vmem:[#allocation5 + $0x12a0] sm:$0xff]  }
 0x29b   :  { %v7384_v30 = vadd.f32 %v9963_v24, %v11784_v40  ;;  %v9966_v36 = vadd.f32 %v9965_v33, %v9964_v28  ;;  %v11262_v40 = vld [vmem:[#allocation5 + $0x1198] sm:$0xff]   ;;  %v11289_v28 = vld [vmem:[#allocation5 + $0x1210] sm:$0xff]  }
 0x29c   :  { %10282 = vmatpush3.bf16.msra.mxu1 %v11262_v40  ;;  %v11297_v40 = vld [vmem:[#allocation5 + $0x1220] sm:$0xff]  }
 0x29d   :  { %v9983_v20 = vpop.f32.mrb[40].mxu1  ;;  %v7387_v42 = vadd.f32 %v9966_v36, %v11787_v50  ;;  %10283 = vmatprep.subr.bf16.mxu1 %v11264_v48  ;;  %10262 = vmatpush3.bf16.msra.mxu0 %v11265_v49  ;;  %v11269_v50 = vld [vmem:[#allocation5 + $0x1128] sm:$0xff]  }
 0x29e   :  { %v9984_v25 = vpop.f32.mrb[41].mxu1  ;;  %10263 = vmatprep.subr.bf16.mxu0 %v11267_v52  ;;  %v11299_v48 = vld [vmem:[#allocation5 + $0x1268] sm:$0xff]   ;;  %v11303_v52 = vld [vmem:[#allocation5 + $0x1270] sm:$0xff]  }
 0x29f   :  { %v9985_v27 = vadd.f32 %v9984_v25, %v9983_v20  ;;  %v9986_v31 = vpop.f32.mrb[42].mxu1  ;;  %v11288_v25 = vld [vmem:[#allocation5 + $0x12d0] sm:$0xff]   ;;  %v11300_v49 = vld [vmem:[#allocation5 + $0x12e8] sm:$0xff]  }
 0x2a0   :  { %v9987_v37 = vpop.f32.mrb[43].mxu1  ;;  %10284 = vmatpush3.bf16.msra.mxu1 %v11266_v43  ;;  %v11302_v43 = vld [vmem:[#allocation5 + $0x12a8] sm:$0xff]  }
 0x2a1   :  { %v11790_v35 = vadd.f32 %v9985_v27, %v7384_v30  ;;  %v9988_v39 = vadd.f32 %v9987_v37, %v9986_v31  ;;  %10285 = vmatprep.subr.bf16.mxu1 %v11268_v47  ;;  %10264 = vmatpush3.bf16.msra.mxu0 %v11269_v50  ;;  %v11290_v30 = vld [vmem:[#allocation5 + $0x1290] sm:$0xff]   ;;  %v11292_v37 = vld [vmem:[#allocation5 + $0x12d8] sm:$0xff]  }
 0x2a2   :  { %10265 = vmatprep.subr.bf16.mxu0 %v11271_v56  ;;  %v11304_v47 = vld [vmem:[#allocation5 + $0x12f0] sm:$0xff]   ;;  %v11307_v56 = vld [vmem:[#allocation5 + $0x1278] sm:$0xff]  }
 0x2a3   :  { %v11793_v45 = vadd.f32 %v9988_v39, %v7387_v42  ;;  %v11293_v39 = vld [vmem:[#allocation5 + $0x1218] sm:$0xff]   ;;  %v11295_v42 = vld [vmem:[#allocation5 + $0x1260] sm:$0xff]   ;;  %v11305_v50 = vld [vmem:[#allocation5 + $0x1230] sm:$0xff]  }
 0x2a4   :  { %10286 = vmatpush3.bf16.msra.mxu1 %v11270_v54  ;;  %v11306_v54 = vld [vmem:[#allocation5 + $0x12b0] sm:$0xff]  }
 0x2a5   :  { %10287 = vmatprep.subr.bf16.mxu1 %v11272_v51  ;;  %10266 = vmatpush3.bf16.msra.mxu0 %v11273_v58  ;;  %v11308_v51 = vld [vmem:[#allocation5 + $0x12f8] sm:$0xff]  }
 0x2a6   :  { %10267 = vmatprep.subr.bf16.mxu0 %v11275_v60  ;;  %v11309_v58 = vld [vmem:[#allocation5 + $0x1238] sm:$0xff]   ;;  %v163_v60 = vld [vmem:[#allocation2 + $0x248] sm:$0xff] }
 0x2a8   :  { %10288 = vmatpush3.bf16.msra.mxu1 %v11274_v53  ;;  %v11310_v53 = vld [vmem:[#allocation5 + $0x12b8] sm:$0xff]  }
 0x2a9   :  { %10289 = vmatprep.subr.bf16.mxu1 %v11276_v55  ;;  %10268 = vmatpush3.bf16.msra.mxu0 %v11277_v57  ;;  %v259_v55 = vld [vmem:[#allocation2 + $0x548] sm:$0xff] }
 0x2aa   :  { %10297 = vmatprep.subr.bf16.mxu0 %v11279_v11  ;;  %v355_v57 = vpack.c.bf16 %v259_v55, %v163_v60  ;;  %v11315_v11 = vld [vmem:[#allocation5 + $0x1348] sm:$0xff]   ;;  %v265_v60 = vld [vmem:[#allocation2 + $0x578] sm:$0xff]  ;;  %v166_v55 = vld [vmem:[#allocation2 + $0x260] sm:$0xff] }
 0x2ac   :  { %10290 = vmatpush3.bf16.msra.mxu1 %v11278_v62  ;;  %7956 = vmatmul.mubr.bf16.vlgmr.msra.gmra.mrb[68].mxu0 %v350_v3  ;;  %v165_v62 = vld [vmem:[#allocation2 + $0x258] sm:$0xff]  ;;  %v11312_v3 = vld [vmem:[#allocation5 + $0x13c0] sm:$0xff]  }
 0x2ad   :  { %10319 = vmatprep.subr.bf16.mxu1 %v11280_v7  ;;  %10298 = vmatpush3.bf16.msra.mxu0 %v11281_v9  ;;  %v357_v61 = vpack.c.bf16 %v261_v0, %v165_v62  ;;  %v11316_v7 = vld [vmem:[#allocation5 + $0x13c8] sm:$0xff]  }
 0x2ae   :  { %10299 = vmatprep.subr.bf16.mxu0 %v11283_v14  ;;  %8037 = vmatprep.mubr.bf16.mxu0 %v355_v57  ;;  %v262_v57 = vld [vmem:[#allocation2 + $0x560] sm:$0xff] }
 0x2af   :  { %7997 = vmatmul.mubr.bf16.vlgmr.msra.gmra.mrb[68].mxu1 %v352_v10  ;;  %v11314_v10 = vld [vmem:[#allocation5 + $0x1380] sm:$0xff]   ;;  %v358_v0 = vpack.c.bf16 %v262_v57, %v166_v55  ;;  %v268_v57 = vld [vmem:[#allocation2 + $0x590] sm:$0xff] }
 0x2b0   :  { %10320 = vmatpush3.bf16.msra.mxu1 %v11282_v13  ;;  %8078 = vmatprep.mubr.bf16.mxu1 %v357_v61  ;;  %v11317_v13 = vld [vmem:[#allocation5 + $0x1308] sm:$0xff]   ;;  %v264_v61 = vld [vmem:[#allocation2 + $0x570] sm:$0xff] }
 0x2b1   :  { %10321 = vmatprep.subr.bf16.mxu1 %v11284_v12  ;;  %10300 = vmatpush3.bf16.msra.mxu0 %v11285_v18  ;;  %v360_v2 = vpack.c.bf16 %v264_v61, %v168_v59  ;;  %v11376_v59 = vld [vmem:[#allocation5 + $0x15c0] sm:$0xff]  }
 0x2b2   :  { %10301 = vmatprep.subr.bf16.mxu0 %v11287_v22  ;;  %v11321_v22 = vld [vmem:[#allocation5 + $0x1310] sm:$0xff]   ;;  %v11377_v61 = vld [vmem:[#allocation5 + $0x1500] sm:$0xff]  }
 0x2b4   :  { %10322 = vmatpush3.bf16.msra.mxu1 %v11286_v16  ;;  %v11320_v16 = vld [vmem:[#allocation5 + $0x13d0] sm:$0xff]  }
 0x2b5   :  { %10323 = vmatprep.subr.bf16.mxu1 %v11288_v25  ;;  %10302 = vmatpush3.bf16.msra.mxu0 %v11289_v28  ;;  %v11322_v25 = vld [vmem:[#allocation5 + $0x1390] sm:$0xff]  }
 0x2b6   :  { %10303 = vmatprep.subr.bf16.mxu0 %v11291_v34  ;;  %v11325_v34 = vld [vmem:[#allocation5 + $0x1318] sm:$0xff]  }
 0x2b7   :  { %v10005_v15 = vpop.f32.mrb[44].mxu0 }
 0x2b8   :  { %v10006_v19 = vpop.f32.mrb[45].mxu0  ;;  %10324 = vmatpush3.bf16.msra.mxu1 %v11290_v30 }
 0x2b9   :  { %v10007_v20 = vadd.f32 %v10006_v19, %v10005_v15  ;;  %v10008_v24 = vpop.f32.mrb[46].mxu0  ;;  %10325 = vmatprep.subr.bf16.mxu1 %v11292_v37  ;;  %10304 = vmatpush3.bf16.msra.mxu0 %v11293_v39  ;;  %v11318_v15 = vld [vmem:[#allocation5 + $0x1388] sm:$0xff]   ;;  %v11326_v37 = vld [vmem:[#allocation5 + $0x1398] sm:$0xff]   ;;  %v11328_v39 = vld [vmem:[#allocation5 + $0x13e0] sm:$0xff]  }
 0x2ba   :  { %v10009_v29 = vpop.f32.mrb[47].mxu0  ;;  %10305 = vmatprep.subr.bf16.mxu0 %v11295_v42  ;;  %v11330_v42 = vld [vmem:[#allocation5 + $0x13a0] sm:$0xff]  }
 0x2bb   :  { %v7466_v26 = vadd.f32 %v10007_v20, %v11790_v35  ;;  %v10010_v32 = vadd.f32 %v10009_v29, %v10008_v24  ;;  %v11294_v35 = vld [vmem:[#allocation5 + $0x1298] sm:$0xff]  }
 0x2bc   :  { %10326 = vmatpush3.bf16.msra.mxu1 %v11294_v35  ;;  %v11329_v35 = vld [vmem:[#allocation5 + $0x1320] sm:$0xff]  }
 0x2bd   :  { %v10027_v17 = vpop.f32.mrb[44].mxu1  ;;  %v7469_v38 = vadd.f32 %v10010_v32, %v11793_v45  ;;  %10327 = vmatprep.subr.bf16.mxu1 %v11296_v44  ;;  %10306 = vmatpush3.bf16.msra.mxu0 %v11297_v40  ;;  %v11301_v45 = vld [vmem:[#allocation5 + $0x1228] sm:$0xff]   ;;  %v11324_v32 = vld [vmem:[#allocation5 + $0x13d8] sm:$0xff]  }
 0x2be   :  { %v10028_v21 = vpop.f32.mrb[45].mxu1  ;;  %10307 = vmatprep.subr.bf16.mxu0 %v11299_v48  ;;  %v11331_v44 = vld [vmem:[#allocation5 + $0x1368] sm:$0xff]   ;;  %v11335_v48 = vld [vmem:[#allocation5 + $0x1370] sm:$0xff]  }
 0x2bf   :  { %v10029_v23 = vadd.f32 %v10028_v21, %v10027_v17  ;;  %v10030_v27 = vpop.f32.mrb[46].mxu1  ;;  %v11319_v17 = vld [vmem:[#allocation5 + $0x1350] sm:$0xff]   ;;  %v11332_v40 = vld [vmem:[#allocation5 + $0x13e8] sm:$0xff]  }
 0x2c0   :  { %v10031_v33 = vpop.f32.mrb[47].mxu1  ;;  %10328 = vmatpush3.bf16.msra.mxu1 %v11298_v46  ;;  %v11333_v46 = vld [vmem:[#allocation5 + $0x1328] sm:$0xff]  }
 0x2c1   :  { %v11796_v31 = vadd.f32 %v10029_v23, %v7466_v26  ;;  %v10032_v36 = vadd.f32 %v10031_v33, %v10030_v27  ;;  %10329 = vmatprep.subr.bf16.mxu1 %v11300_v49  ;;  %10308 = vmatpush3.bf16.msra.mxu0 %v11301_v45  ;;  %v11323_v27 = vld [vmem:[#allocation5 + $0x1358] sm:$0xff]   ;;  %v11336_v49 = vld [vmem:[#allocation5 + $0x13f0] sm:$0xff]  }
 0x2c2   :  { %10309 = vmatprep.subr.bf16.mxu0 %v11303_v52  ;;  %v11337_v45 = vld [vmem:[#allocation5 + $0x1330] sm:$0xff]   ;;  %v11339_v52 = vld [vmem:[#allocation5 + $0x1378] sm:$0xff]  }
 0x2c3   :  { %v11799_v41 = vadd.f32 %v10032_v36, %v7469_v38 }
 0x2c4   :  { %10330 = vmatpush3.bf16.msra.mxu1 %v11302_v43  ;;  %v11338_v43 = vld [vmem:[#allocation5 + $0x13b0] sm:$0xff]  }
 0x2c5   :  { %10331 = vmatprep.subr.bf16.mxu1 %v11304_v47  ;;  %10310 = vmatpush3.bf16.msra.mxu0 %v11305_v50  ;;  %v11340_v47 = vld [vmem:[#allocation5 + $0x13f8] sm:$0xff]  }
 0x2c6   :  { %10311 = vmatprep.subr.bf16.mxu0 %v11307_v56  ;;  %v11341_v50 = vld [vmem:[#allocation5 + $0x1338] sm:$0xff]   ;;  %v167_v56 = vld [vmem:[#allocation2 + $0x268] sm:$0xff] }
 0x2c8   :  { %10332 = vmatpush3.bf16.msra.mxu1 %v11306_v54  ;;  %v11342_v54 = vld [vmem:[#allocation5 + $0x13b8] sm:$0xff]  }
 0x2c9   :  { %10333 = vmatprep.subr.bf16.mxu1 %v11308_v51  ;;  %10312 = vmatpush3.bf16.msra.mxu0 %v11309_v58  ;;  %v263_v51 = vld [vmem:[#allocation2 + $0x568] sm:$0xff]  ;;  %v169_v58 = vld [vmem:[#allocation2 + $0x278] sm:$0xff] }
 0x2ca   :  { %10341 = vmatprep.subr.bf16.mxu0 %v11311_v8  ;;  %v361_v62 = vpack.c.bf16 %v265_v60, %v169_v58  ;;  %v11347_v8 = vld [vmem:[#allocation5 + $0x1448] sm:$0xff]   ;;  %v170_v58 = vld [vmem:[#allocation2 + $0x280] sm:$0xff]  ;;  %v172_v60 = vld [vmem:[#allocation2 + $0x290] sm:$0xff] }
 0x2cc   :  { %10334 = vmatpush3.bf16.msra.mxu1 %v11310_v53  ;;  %8038 = vmatmul.mubr.bf16.vlgmr.msra.gmra.mrb[72].mxu0 %v354_v1  ;;  %v359_v53 = vpack.c.bf16 %v263_v51, %v167_v56  ;;  %v11345_v1 = vld [vmem:[#allocation5 + $0x1400] sm:$0xff]  }
 0x2cd   :  { %10363 = vmatprep.subr.bf16.mxu1 %v11312_v3  ;;  %10342 = vmatpush3.bf16.msra.mxu0 %v11313_v5  ;;  %v11348_v5 = vld [vmem:[#allocation5 + $0x14c8] sm:$0xff]  }
 0x2ce   :  { %10343 = vmatprep.subr.bf16.mxu0 %v11315_v11  ;;  %8119 = vmatprep.mubr.bf16.mxu0 %v359_v53  ;;  %v11349_v11 = vld [vmem:[#allocation5 + $0x1408] sm:$0xff]   ;;  %v266_v53 = vld [vmem:[#allocation2 + $0x580] sm:$0xff] }
 0x2cf   :  { %8079 = vmatmul.mubr.bf16.vlgmr.msra.gmra.mrb[72].mxu1 %v356_v6  ;;  %v11346_v6 = vld [vmem:[#allocation5 + $0x1480] sm:$0xff]   ;;  %v362_v55 = vpack.c.bf16 %v266_v53, %v170_v58 }
 0x2d0   :  { %10364 = vmatpush3.bf16.msra.mxu1 %v11314_v10  ;;  %8160 = vmatprep.mubr.bf16.mxu1 %v361_v62  ;;  %v364_v62 = vpack.c.bf16 %v268_v57, %v172_v60  ;;  %v11407_v60 = vld [vmem:[#allocation5 + $0x1640] sm:$0xff]  }
 0x2d1   :  { %10365 = vmatprep.subr.bf16.mxu1 %v11316_v7  ;;  %10344 = vmatpush3.bf16.msra.mxu0 %v11317_v13  ;;  %v11409_v57 = vld [vmem:[#allocation5 + $0x1600] sm:$0xff]  }
 0x2d2   :  { %10345 = vmatprep.subr.bf16.mxu0 %v11319_v17 }
 0x2d4   :  { %10366 = vmatpush3.bf16.msra.mxu1 %v11318_v15  ;;  %v11351_v15 = vld [vmem:[#allocation5 + $0x1450] sm:$0xff]  }
 0x2d5   :  { %10367 = vmatprep.subr.bf16.mxu1 %v11320_v16  ;;  %10346 = vmatpush3.bf16.msra.mxu0 %v11321_v22  ;;  %v11354_v22 = vld [vmem:[#allocation5 + $0x1490] sm:$0xff]  }
 0x2d6   :  { %10347 = vmatprep.subr.bf16.mxu0 %v11323_v27 }
 0x2d7   :  { %v10049_v9 = vpop.f32.mrb[48].mxu0 }
 0x2d8   :  { %v10050_v12 = vpop.f32.mrb[49].mxu0  ;;  %10368 = vmatpush3.bf16.msra.mxu1 %v11322_v25 }
 0x2d9   :  { %v10051_v18 = vadd.f32 %v10050_v12, %v10049_v9  ;;  %v10052_v21 = vpop.f32.mrb[50].mxu0  ;;  %10369 = vmatprep.subr.bf16.mxu1 %v11324_v32  ;;  %10348 = vmatpush3.bf16.msra.mxu0 %v11325_v34  ;;  %v11350_v9 = vld [vmem:[#allocation5 + $0x1488] sm:$0xff]   ;;  %v11357_v32 = vld [vmem:[#allocation5 + $0x1418] sm:$0xff]   ;;  %v11359_v34 = vld [vmem:[#allocation5 + $0x1460] sm:$0xff]  }
 0x2da   :  { %v10053_v26 = vpop.f32.mrb[51].mxu0 }
 0x2db   :  { %v7548_v23 = vadd.f32 %v10051_v18, %v11796_v31  ;;  %v10054_v29 = vadd.f32 %v10053_v26, %v10052_v21  ;;  %v11327_v31 = vld [vmem:[#allocation5 + $0x1360] sm:$0xff]   ;;  %v11352_v18 = vld [vmem:[#allocation5 + $0x14d0] sm:$0xff]   ;;  %v11355_v26 = vld [vmem:[#allocation5 + $0x1458] sm:$0xff]  }
 0x2dc   :  { %10370 = vmatpush3.bf16.msra.mxu1 %v11326_v37  ;;  %10349 = vmatprep.subr.bf16.mxu0 %v11327_v31  ;;  %v11361_v37 = vld [vmem:[#allocation5 + $0x1420] sm:$0xff]  }
 0x2dd   :  { %v10071_v14 = vpop.f32.mrb[48].mxu1  ;;  %v7551_v36 = vadd.f32 %v10054_v29, %v11799_v41  ;;  %10371 = vmatprep.subr.bf16.mxu1 %v11328_v39  ;;  %10350 = vmatpush3.bf16.msra.mxu0 %v11329_v35  ;;  %v11334_v41 = vld [vmem:[#allocation5 + $0x13a8] sm:$0xff]   ;;  %v11356_v29 = vld [vmem:[#allocation5 + $0x14d8] sm:$0xff]   ;;  %v11362_v31 = vld [vmem:[#allocation5 + $0x14a0] sm:$0xff]  }
 0x2de   :  { %v10072_v19 = vpop.f32.mrb[49].mxu1  ;;  %10351 = vmatprep.subr.bf16.mxu0 %v11331_v44  ;;  %v11363_v39 = vld [vmem:[#allocation5 + $0x1468] sm:$0xff]   ;;  %v11367_v44 = vld [vmem:[#allocation5 + $0x1470] sm:$0xff]  }
 0x2df   :  { %v10073_v20 = vadd.f32 %v10072_v19, %v10071_v14  ;;  %v10074_v24 = vpop.f32.mrb[50].mxu1  ;;  %v11364_v35 = vld [vmem:[#allocation5 + $0x14e8] sm:$0xff]  }
 0x2e0   :  { %v10075_v30 = vpop.f32.mrb[51].mxu1  ;;  %10372 = vmatpush3.bf16.msra.mxu1 %v11330_v42  ;;  %v11366_v42 = vld [vmem:[#allocation5 + $0x14a8] sm:$0xff]  }
 0x2e1   :  { %v11802_v28 = vadd.f32 %v10073_v20, %v7548_v23  ;;  %v10076_v33 = vadd.f32 %v10075_v30, %v10074_v24  ;;  %10373 = vmatprep.subr.bf16.mxu1 %v11332_v40  ;;  %10352 = vmatpush3.bf16.msra.mxu0 %v11333_v46  ;;  %v11353_v20 = vld [vmem:[#allocation5 + $0x1410] sm:$0xff]  }
 0x2e2   :  { %10353 = vmatprep.subr.bf16.mxu0 %v11335_v48  ;;  %v11368_v40 = vld [vmem:[#allocation5 + $0x14f0] sm:$0xff]   ;;  %v11371_v48 = vld [vmem:[#allocation5 + $0x1478] sm:$0xff]  }
 0x2e3   :  { %v11805_v38 = vadd.f32 %v10076_v33, %v7551_v36  ;;  %v11360_v36 = vld [vmem:[#allocation5 + $0x14e0] sm:$0xff]   ;;  %v11369_v46 = vld [vmem:[#allocation5 + $0x1430] sm:$0xff]  }
 0x2e4   :  { %10374 = vmatpush3.bf16.msra.mxu1 %v11334_v41  ;;  %v11370_v41 = vld [vmem:[#allocation5 + $0x14b0] sm:$0xff]  }
 0x2e5   :  { %10375 = vmatprep.subr.bf16.mxu1 %v11336_v49  ;;  %10354 = vmatpush3.bf16.msra.mxu0 %v11337_v45  ;;  %v11372_v49 = vld [vmem:[#allocation5 + $0x14f8] sm:$0xff]  }
 0x2e6   :  { %10355 = vmatprep.subr.bf16.mxu0 %v11339_v52  ;;  %v11373_v45 = vld [vmem:[#allocation5 + $0x1438] sm:$0xff]   ;;  %v171_v52 = vld [vmem:[#allocation2 + $0x288] sm:$0xff] }
 0x2e8   :  { %10376 = vmatpush3.bf16.msra.mxu1 %v11338_v43  ;;  %v11374_v43 = vld [vmem:[#allocation5 + $0x14b8] sm:$0xff]  }
 0x2e9   :  { %10377 = vmatprep.subr.bf16.mxu1 %v11340_v47  ;;  %10356 = vmatpush3.bf16.msra.mxu0 %v11341_v50  ;;  %v267_v47 = vld [vmem:[#allocation2 + $0x588] sm:$0xff]  ;;  %v173_v50 = vld [vmem:[#allocation2 + $0x298] sm:$0xff] }
 0x2ea   :  { %10385 = vmatprep.subr.bf16.mxu0 %v11343_v4  ;;  %v363_v56 = vpack.c.bf16 %v267_v47, %v171_v52  ;;  %v11379_v4 = vld [vmem:[#allocation5 + $0x1548] sm:$0xff]   ;;  %v273_v52 = vld [vmem:[#allocation2 + $0x5b8] sm:$0xff]  ;;  %v174_v47 = vld [vmem:[#allocation2 + $0x2a0] sm:$0xff] }
 0x2ec   :  { %10378 = vmatpush3.bf16.msra.mxu1 %v11342_v54  ;;  %8120 = vmatmul.mubr.bf16.vlgmr.msra.gmra.mrb[76].mxu0 %v358_v0  ;;  %v269_v54 = vld [vmem:[#allocation2 + $0x598] sm:$0xff]  ;;  %v11375_v0 = vld [vmem:[#allocation5 + $0x1540] sm:$0xff]  }
 0x2ed   :  { %10407 = vmatprep.subr.bf16.mxu1 %v11344_v63  ;;  %10386 = vmatpush3.bf16.msra.mxu0 %v11345_v1  ;;  %v365_v51 = vpack.c.bf16 %v269_v54, %v173_v50  ;;  %v11380_v1 = vld [vmem:[#allocation5 + $0x15c8] sm:$0xff]   ;;  %v270_v54 = vld [vmem:[#allocation2 + $0x5a0] sm:$0xff] }
 0x2ee   :  { %10387 = vmatprep.subr.bf16.mxu0 %v11347_v8  ;;  %8201 = vmatprep.mubr.bf16.mxu0 %v363_v56  ;;  %v11381_v8 = vld [vmem:[#allocation5 + $0x1508] sm:$0xff]   ;;  %v176_v56 = vld [vmem:[#allocation2 + $0x2b0] sm:$0xff]  ;;  %v366_v58 = vpack.c.bf16 %v270_v54, %v174_v47 }
 0x2ef   :  { %8161 = vmatmul.mubr.bf16.vlgmr.msra.gmra.mrb[76].mxu1 %v360_v2  ;;  %v11378_v2 = vld [vmem:[#allocation5 + $0x1580] sm:$0xff]   ;;  %v180_v47 = vld [vmem:[#allocation2 + $0x2d0] sm:$0xff] }
 0x2f0   :  { %10408 = vmatpush3.bf16.msra.mxu1 %v11346_v6  ;;  %8242 = vmatprep.mubr.bf16.mxu1 %v365_v51  ;;  %v272_v51 = vld [vmem:[#allocation2 + $0x5b0] sm:$0xff] }
 0x2f1   :  { %10409 = vmatprep.subr.bf16.mxu1 %v11348_v5  ;;  %10388 = vmatpush3.bf16.msra.mxu0 %v11349_v11  ;;  %v11382_v5 = vld [vmem:[#allocation5 + $0x1588] sm:$0xff]   ;;  %v368_v53 = vpack.c.bf16 %v272_v51, %v176_v56  ;;  %v11439_v56 = vld [vmem:[#allocation5 + $0x1740] sm:$0xff]  }
 0x2f2   :  { %10389 = vmatprep.subr.bf16.mxu0 %v11351_v15  ;;  %v11440_v51 = vld [vmem:[#allocation5 + $0x17c0] sm:$0xff]  }
 0x2f4   :  { %10410 = vmatpush3.bf16.msra.mxu1 %v11350_v9 }
 0x2f5   :  { %10411 = vmatprep.subr.bf16.mxu1 %v11352_v18  ;;  %10390 = vmatpush3.bf16.msra.mxu0 %v11353_v20 }
 0x2f6   :  { %10391 = vmatprep.subr.bf16.mxu0 %v11355_v26 }
 0x2f7   :  { %v10093_v3 = vpop.f32.mrb[52].mxu0 }
 0x2f8   :  { %v10094_v7 = vpop.f32.mrb[53].mxu0  ;;  %10412 = vmatpush3.bf16.msra.mxu1 %v11354_v22  ;;  %v11387_v22 = vld [vmem:[#allocation5 + $0x1558] sm:$0xff]  }
 0x2f9   :  { %v10095_v13 = vadd.f32 %v10094_v7, %v10093_v3  ;;  %v10096_v17 = vpop.f32.mrb[54].mxu0  ;;  %10413 = vmatprep.subr.bf16.mxu1 %v11356_v29  ;;  %10392 = vmatpush3.bf16.msra.mxu0 %v11357_v32  ;;  %v11383_v7 = vld [vmem:[#allocation5 + $0x1550] sm:$0xff]   ;;  %v11392_v32 = vld [vmem:[#allocation5 + $0x15e0] sm:$0xff]  }
 0x2fa   :  { %v10097_v21 = vpop.f32.mrb[55].mxu0  ;;  %10393 = vmatprep.subr.bf16.mxu0 %v11359_v34  ;;  %v11394_v34 = vld [vmem:[#allocation5 + $0x15a0] sm:$0xff]  }
 0x2fb   :  { %v7630_v19 = vadd.f32 %v10095_v13, %v11802_v28  ;;  %v10098_v24 = vadd.f32 %v10097_v21, %v10096_v17  ;;  %v11358_v28 = vld [vmem:[#allocation5 + $0x1498] sm:$0xff]   ;;  %v11385_v17 = vld [vmem:[#allocation5 + $0x1510] sm:$0xff]  }
 0x2fc   :  { %10414 = vmatpush3.bf16.msra.mxu1 %v11358_v28  ;;  %v11393_v28 = vld [vmem:[#allocation5 + $0x1520] sm:$0xff]  }
 0x2fd   :  { %v10115_v10 = vpop.f32.mrb[52].mxu1  ;;  %v7633_v30 = vadd.f32 %v10098_v24, %v11805_v38  ;;  %10415 = vmatprep.subr.bf16.mxu1 %v11360_v36  ;;  %10394 = vmatpush3.bf16.msra.mxu0 %v11361_v37  ;;  %v11365_v38 = vld [vmem:[#allocation5 + $0x1428] sm:$0xff]  }
 0x2fe   :  { %v10116_v14 = vpop.f32.mrb[53].mxu1  ;;  %10395 = vmatprep.subr.bf16.mxu0 %v11363_v39  ;;  %v11395_v36 = vld [vmem:[#allocation5 + $0x1568] sm:$0xff]   ;;  %v11399_v39 = vld [vmem:[#allocation5 + $0x1570] sm:$0xff]  }
 0x2ff   :  { %v10117_v12 = vadd.f32 %v10116_v14, %v10115_v10  ;;  %v10118_v16 = vpop.f32.mrb[54].mxu1  ;;  %v11384_v14 = vld [vmem:[#allocation5 + $0x15d0] sm:$0xff]   ;;  %v11396_v37 = vld [vmem:[#allocation5 + $0x15e8] sm:$0xff]  }
 0x300   :  { %v10119_v25 = vpop.f32.mrb[55].mxu1  ;;  %10416 = vmatpush3.bf16.msra.mxu1 %v11362_v31  ;;  %v11398_v31 = vld [vmem:[#allocation5 + $0x15a8] sm:$0xff]  }
 0x301   :  { %v11808_v23 = vadd.f32 %v10117_v12, %v7630_v19  ;;  %v10120_v27 = vadd.f32 %v10119_v25, %v10118_v16  ;;  %10417 = vmatprep.subr.bf16.mxu1 %v11364_v35  ;;  %10396 = vmatpush3.bf16.msra.mxu0 %v11365_v38  ;;  %v11386_v19 = vld [vmem:[#allocation5 + $0x1590] sm:$0xff]   ;;  %v11388_v25 = vld [vmem:[#allocation5 + $0x15d8] sm:$0xff]  }
 0x302   :  { %10397 = vmatprep.subr.bf16.mxu0 %v11367_v44  ;;  %v11400_v35 = vld [vmem:[#allocation5 + $0x15f0] sm:$0xff]   ;;  %v11403_v44 = vld [vmem:[#allocation5 + $0x1578] sm:$0xff]  }
 0x303   :  { %v11811_v33 = vadd.f32 %v10120_v27, %v7633_v30  ;;  %v11389_v27 = vld [vmem:[#allocation5 + $0x1518] sm:$0xff]   ;;  %v11391_v30 = vld [vmem:[#allocation5 + $0x1560] sm:$0xff]   ;;  %v11401_v38 = vld [vmem:[#allocation5 + $0x1530] sm:$0xff]  }
 0x304   :  { %10418 = vmatpush3.bf16.msra.mxu1 %v11366_v42  ;;  %v11402_v42 = vld [vmem:[#allocation5 + $0x15b0] sm:$0xff]  }
 0x305   :  { %10419 = vmatprep.subr.bf16.mxu1 %v11368_v40  ;;  %10398 = vmatpush3.bf16.msra.mxu0 %v11369_v46  ;;  %v11404_v40 = vld [vmem:[#allocation5 + $0x15f8] sm:$0xff]  }
 0x306   :  { %10399 = vmatprep.subr.bf16.mxu0 %v11371_v48  ;;  %v11405_v46 = vld [vmem:[#allocation5 + $0x1538] sm:$0xff]   ;;  %v175_v48 = vld [vmem:[#allocation2 + $0x2a8] sm:$0xff] }
 0x308   :  { %10420 = vmatpush3.bf16.msra.mxu1 %v11370_v41  ;;  %v11406_v41 = vld [vmem:[#allocation5 + $0x15b8] sm:$0xff]  }
 0x309   :  { %10421 = vmatprep.subr.bf16.mxu1 %v11372_v49  ;;  %10400 = vmatpush3.bf16.msra.mxu0 %v11373_v45  ;;  %v271_v49 = vld [vmem:[#allocation2 + $0x5a8] sm:$0xff] }
 0x30a   :  { %10429 = vmatprep.subr.bf16.mxu0 %v11375_v0  ;;  %v367_v45 = vpack.c.bf16 %v271_v49, %v175_v48  ;;  %v11411_v0 = vld [vmem:[#allocation5 + $0x1648] sm:$0xff]   ;;  %v277_v48 = vld [vmem:[#allocation2 + $0x5d8] sm:$0xff]  ;;  %v178_v49 = vld [vmem:[#allocation2 + $0x2c0] sm:$0xff] }
 0x30c   :  { %10422 = vmatpush3.bf16.msra.mxu1 %v11374_v43  ;;  %8202 = vmatmul.mubr.bf16.vlgmr.msra.gmra.mrb[80].mxu0 %v362_v55  ;;  %v177_v43 = vld [vmem:[#allocation2 + $0x2b8] sm:$0xff]  ;;  %v11408_v55 = vld [vmem:[#allocation5 + $0x16c0] sm:$0xff]  }
 0x30d   :  { %10451 = vmatprep.subr.bf16.mxu1 %v11376_v59  ;;  %10430 = vmatpush3.bf16.msra.mxu0 %v11377_v61  ;;  %v369_v50 = vpack.c.bf16 %v273_v52, %v177_v43  ;;  %v11412_v59 = vld [vmem:[#allocation5 + $0x16c8] sm:$0xff]  }
 0x30e   :  { %10431 = vmatprep.subr.bf16.mxu0 %v11379_v4  ;;  %8283 = vmatprep.mubr.bf16.mxu0 %v367_v45  ;;  %v274_v45 = vld [vmem:[#allocation2 + $0x5c0] sm:$0xff] }
 0x30f   :  { %8243 = vmatmul.mubr.bf16.vlgmr.msra.gmra.mrb[80].mxu1 %v364_v62  ;;  %v11410_v62 = vld [vmem:[#allocation5 + $0x1680] sm:$0xff]   ;;  %v370_v52 = vpack.c.bf16 %v274_v45, %v178_v49  ;;  %v280_v45 = vld [vmem:[#allocation2 + $0x5f0] sm:$0xff] }
 0x310   :  { %10452 = vmatpush3.bf16.msra.mxu1 %v11378_v2  ;;  %8324 = vmatprep.mubr.bf16.mxu1 %v369_v50  ;;  %v11413_v2 = vld [vmem:[#allocation5 + $0x1608] sm:$0xff]   ;;  %v276_v50 = vld [vmem:[#allocation2 + $0x5d0] sm:$0xff] }
 0x311   :  { %10453 = vmatprep.subr.bf16.mxu1 %v11380_v1  ;;  %10432 = vmatpush3.bf16.msra.mxu0 %v11381_v8  ;;  %v372_v54 = vpack.c.bf16 %v276_v50, %v180_v47 }
 0x312   :  { %10433 = vmatprep.subr.bf16.mxu0 %v11383_v7  ;;  %v11417_v7 = vld [vmem:[#allocation5 + $0x1610] sm:$0xff]  }
 0x314   :  { %10454 = vmatpush3.bf16.msra.mxu1 %v11382_v5  ;;  %v11416_v5 = vld [vmem:[#allocation5 + $0x16d0] sm:$0xff]  }
 0x315   :  { %10455 = vmatprep.subr.bf16.mxu1 %v11384_v14  ;;  %10434 = vmatpush3.bf16.msra.mxu0 %v11385_v17  ;;  %v11418_v14 = vld [vmem:[#allocation5 + $0x1690] sm:$0xff]  }
 0x316   :  { %10435 = vmatprep.subr.bf16.mxu0 %v11387_v22  ;;  %v11421_v22 = vld [vmem:[#allocation5 + $0x1618] sm:$0xff]  }
 0x317   :  { %v10137_v63 = vpop.f32.mrb[56].mxu0 }
 0x318   :  { %v10138_v3 = vpop.f32.mrb[57].mxu0  ;;  %10456 = vmatpush3.bf16.msra.mxu1 %v11386_v19 }
 0x319   :  { %v10139_v10 = vadd.f32 %v10138_v3, %v10137_v63  ;;  %v10140_v13 = vpop.f32.mrb[58].mxu0  ;;  %10457 = vmatprep.subr.bf16.mxu1 %v11388_v25  ;;  %10436 = vmatpush3.bf16.msra.mxu0 %v11389_v27  ;;  %v11414_v63 = vld [vmem:[#allocation5 + $0x1688] sm:$0xff]   ;;  %v11422_v25 = vld [vmem:[#allocation5 + $0x1698] sm:$0xff]   ;;  %v11424_v27 = vld [vmem:[#allocation5 + $0x16e0] sm:$0xff]  }
 0x31a   :  { %v10141_v18 = vpop.f32.mrb[59].mxu0  ;;  %10437 = vmatprep.subr.bf16.mxu0 %v11391_v30  ;;  %v11426_v30 = vld [vmem:[#allocation5 + $0x16a0] sm:$0xff]  }
 0x31b   :  { %v7712_v15 = vadd.f32 %v10139_v10, %v11808_v23  ;;  %v10142_v20 = vadd.f32 %v10141_v18, %v10140_v13  ;;  %v11390_v23 = vld [vmem:[#allocation5 + $0x1598] sm:$0xff]  }
 0x31c   :  { %10458 = vmatpush3.bf16.msra.mxu1 %v11390_v23  ;;  %v11425_v23 = vld [vmem:[#allocation5 + $0x1620] sm:$0xff]  }
 0x31d   :  { %v10159_v6 = vpop.f32.mrb[56].mxu1  ;;  %v7715_v26 = vadd.f32 %v10142_v20, %v11811_v33  ;;  %10459 = vmatprep.subr.bf16.mxu1 %v11392_v32  ;;  %10438 = vmatpush3.bf16.msra.mxu0 %v11393_v28  ;;  %v11397_v33 = vld [vmem:[#allocation5 + $0x1528] sm:$0xff]   ;;  %v11420_v20 = vld [vmem:[#allocation5 + $0x16d8] sm:$0xff]  }
 0x31e   :  { %v10160_v11 = vpop.f32.mrb[57].mxu1  ;;  %10439 = vmatprep.subr.bf16.mxu0 %v11395_v36  ;;  %v11427_v32 = vld [vmem:[#allocation5 + $0x1668] sm:$0xff]   ;;  %v11431_v36 = vld [vmem:[#allocation5 + $0x1670] sm:$0xff]  }
 0x31f   :  { %v10161_v9 = vadd.f32 %v10160_v11, %v10159_v6  ;;  %v10162_v12 = vpop.f32.mrb[58].mxu1  ;;  %v11415_v6 = vld [vmem:[#allocation5 + $0x1650] sm:$0xff]   ;;  %v11428_v28 = vld [vmem:[#allocation5 + $0x16e8] sm:$0xff]  }
 0x320   :  { %v10163_v21 = vpop.f32.mrb[59].mxu1  ;;  %10460 = vmatpush3.bf16.msra.mxu1 %v11394_v34  ;;  %v11429_v34 = vld [vmem:[#allocation5 + $0x1628] sm:$0xff]  }
 0x321   :  { %v11814_v16 = vadd.f32 %v10161_v9, %v7712_v15  ;;  %v10164_v24 = vadd.f32 %v10163_v21, %v10162_v12  ;;  %10461 = vmatprep.subr.bf16.mxu1 %v11396_v37  ;;  %10440 = vmatpush3.bf16.msra.mxu0 %v11397_v33  ;;  %v11419_v12 = vld [vmem:[#allocation5 + $0x1658] sm:$0xff]   ;;  %v11432_v37 = vld [vmem:[#allocation5 + $0x16f0] sm:$0xff]  }
 0x322   :  { %10441 = vmatprep.subr.bf16.mxu0 %v11399_v39  ;;  %v11433_v33 = vld [vmem:[#allocation5 + $0x1630] sm:$0xff]   ;;  %v11435_v39 = vld [vmem:[#allocation5 + $0x1678] sm:$0xff]  }
 0x323   :  { %v11817_v29 = vadd.f32 %v10164_v24, %v7715_v26 }
 0x324   :  { %10462 = vmatpush3.bf16.msra.mxu1 %v11398_v31  ;;  %v11434_v31 = vld [vmem:[#allocation5 + $0x16b0] sm:$0xff]  }
 0x325   :  { %10463 = vmatprep.subr.bf16.mxu1 %v11400_v35  ;;  %10442 = vmatpush3.bf16.msra.mxu0 %v11401_v38  ;;  %v11436_v35 = vld [vmem:[#allocation5 + $0x16f8] sm:$0xff]  }
 0x326   :  { %10443 = vmatprep.subr.bf16.mxu0 %v11403_v44  ;;  %v11437_v38 = vld [vmem:[#allocation5 + $0x1638] sm:$0xff]   ;;  %v179_v44 = vld [vmem:[#allocation2 + $0x2c8] sm:$0xff] }
 0x328   :  { %10464 = vmatpush3.bf16.msra.mxu1 %v11402_v42  ;;  %v11438_v42 = vld [vmem:[#allocation5 + $0x16b8] sm:$0xff]  }
 0x329   :  { %10465 = vmatprep.subr.bf16.mxu1 %v11404_v40  ;;  %10444 = vmatpush3.bf16.msra.mxu0 %v11405_v46  ;;  %v275_v40 = vld [vmem:[#allocation2 + $0x5c8] sm:$0xff]  ;;  %v181_v46 = vld [vmem:[#allocation2 + $0x2d8] sm:$0xff] }
 0x32a   :  { %10473 = vmatprep.subr.bf16.mxu0 %v11407_v60  ;;  %v373_v43 = vpack.c.bf16 %v277_v48, %v181_v46  ;;  %v11443_v60 = vld [vmem:[#allocation5 + $0x1748] sm:$0xff]   ;;  %v182_v46 = vld [vmem:[#allocation2 + $0x2e0] sm:$0xff]  ;;  %v184_v48 = vld [vmem:[#allocation2 + $0x2f0] sm:$0xff] }
 0x32c   :  { %10466 = vmatpush3.bf16.msra.mxu1 %v11406_v41  ;;  %8284 = vmatmul.mubr.bf16.vlgmr.msra.gmra.mrb[84].mxu0 %v366_v58  ;;  %v371_v41 = vpack.c.bf16 %v275_v40, %v179_v44  ;;  %v11441_v58 = vld [vmem:[#allocation5 + $0x1700] sm:$0xff]  }
 0x32d   :  { %10495 = vmatprep.subr.bf16.mxu1 %v11408_v55  ;;  %10474 = vmatpush3.bf16.msra.mxu0 %v11409_v57  ;;  %v11444_v57 = vld [vmem:[#allocation5 + $0x17c8] sm:$0xff]  }
 0x32e   :  { %10475 = vmatprep.subr.bf16.mxu0 %v11411_v0  ;;  %8365 = vmatprep.mubr.bf16.mxu0 %v371_v41  ;;  %v11445_v0 = vld [vmem:[#allocation5 + $0x1708] sm:$0xff]   ;;  %v278_v41 = vld [vmem:[#allocation2 + $0x5e0] sm:$0xff] }
 0x32f   :  { %8325 = vmatmul.mubr.bf16.vlgmr.msra.gmra.mrb[84].mxu1 %v368_v53  ;;  %v11442_v53 = vld [vmem:[#allocation5 + $0x1780] sm:$0xff]   ;;  %v374_v49 = vpack.c.bf16 %v278_v41, %v182_v46 }
 0x330   :  { %10496 = vmatpush3.bf16.msra.mxu1 %v11410_v62  ;;  %8406 = vmatprep.mubr.bf16.mxu1 %v373_v43  ;;  %v376_v43 = vpack.c.bf16 %v280_v45, %v184_v48 }
 0x331   :  { %10497 = vmatprep.subr.bf16.mxu1 %v11412_v59  ;;  %10476 = vmatpush3.bf16.msra.mxu0 %v11413_v2 }
 0x332   :  { %10477 = vmatprep.subr.bf16.mxu0 %v11415_v6 }
 0x334   :  { %10498 = vmatpush3.bf16.msra.mxu1 %v11414_v63  ;;  %v11447_v63 = vld [vmem:[#allocation5 + $0x1750] sm:$0xff]  }
 0x335   :  { %10499 = vmatprep.subr.bf16.mxu1 %v11416_v5  ;;  %10478 = vmatpush3.bf16.msra.mxu0 %v11417_v7  ;;  %v11450_v7 = vld [vmem:[#allocation5 + $0x1790] sm:$0xff]  }
 0x336   :  { %10479 = vmatprep.subr.bf16.mxu0 %v11419_v12 }
 0x338   :  { %v10181_v61 = vpop.f32.mrb[60].mxu0  ;;  %10500 = vmatpush3.bf16.msra.mxu1 %v11418_v14 }
 0x339   :  { %v10182_v1 = vpop.f32.mrb[61].mxu0  ;;  %10501 = vmatprep.subr.bf16.mxu1 %v11420_v20  ;;  %10480 = vmatpush3.bf16.msra.mxu0 %v11421_v22  ;;  %v11453_v20 = vld [vmem:[#allocation5 + $0x1718] sm:$0xff]   ;;  %v11455_v22 = vld [vmem:[#allocation5 + $0x1760] sm:$0xff]  }
 0x33a   :  { %v10183_v8 = vadd.f32 %v10182_v1, %v10181_v61  ;;  %v10184_v11 = vpop.f32.mrb[62].mxu0  ;;  %v11446_v61 = vld [vmem:[#allocation5 + $0x1788] sm:$0xff]  }
 0x33b   :  { %v10185_v15 = vpop.f32.mrb[63].mxu0 }
 0x33c   :  { %v7794_v9 = vadd.f32 %v10183_v8, %v11814_v16  ;;  %v10186_v18 = vadd.f32 %v10185_v15, %v10184_v11  ;;  %v11423_v16 = vld [vmem:[#allocation5 + $0x1660] sm:$0xff]   ;;  %10502 = vmatpush3.bf16.msra.mxu1 %v11422_v25  ;;  %v11448_v8 = vld [vmem:[#allocation5 + $0x17d0] sm:$0xff]   ;;  %v11451_v15 = vld [vmem:[#allocation5 + $0x1758] sm:$0xff]  }
 0x33d   :  { %10481 = vmatprep.subr.bf16.mxu0 %v11423_v16  ;;  %10503 = vmatprep.subr.bf16.mxu1 %v11424_v27  ;;  %v11457_v25 = vld [vmem:[#allocation5 + $0x1720] sm:$0xff]   ;;  %v11459_v27 = vld [vmem:[#allocation5 + $0x1768] sm:$0xff]  }
 0x33e   :  { %v10203_v4 = vpop.f32.mrb[60].mxu1  ;;  %v7797_v24 = vadd.f32 %v10186_v18, %v11817_v29  ;;  %10482 = vmatpush3.bf16.msra.mxu0 %v11425_v23  ;;  %v11430_v29 = vld [vmem:[#allocation5 + $0x16a8] sm:$0xff]   ;;  %v11452_v18 = vld [vmem:[#allocation5 + $0x17d8] sm:$0xff]   ;;  %v11458_v16 = vld [vmem:[#allocation5 + $0x17a0] sm:$0xff]  }
 0x33f   :  { %v10204_v3 = vpop.f32.mrb[61].mxu1  ;;  %10483 = vmatprep.subr.bf16.mxu0 %v11427_v32  ;;  %v11460_v23 = vld [vmem:[#allocation5 + $0x17e8] sm:$0xff]   ;;  %v11463_v32 = vld [vmem:[#allocation5 + $0x1770] sm:$0xff]  }
 0x340   :  { %v10205_v10 = vadd.f32 %v10204_v3, %v10203_v4  ;;  %v10206_v13 = vpop.f32.mrb[62].mxu1  ;;  %10504 = vmatpush3.bf16.msra.mxu1 %v11426_v30  ;;  %v11462_v30 = vld [vmem:[#allocation5 + $0x17a8] sm:$0xff]  }
 0x341   :  { %v10207_v19 = vpop.f32.mrb[63].mxu1  ;;  %10505 = vmatprep.subr.bf16.mxu1 %v11428_v28  ;;  %v11464_v28 = vld [vmem:[#allocation5 + $0x17f0] sm:$0xff]  }
 0x342   :  { %v11820_v17 = vadd.f32 %v10205_v10, %v7794_v9  ;;  %v10208_v21 = vadd.f32 %v10207_v19, %v10206_v13  ;;  %10484 = vmatpush3.bf16.msra.mxu0 %v11429_v34  ;;  %v11449_v10 = vld [vmem:[#allocation5 + $0x1710] sm:$0xff]  }
 0x343   :  { %10485 = vmatprep.subr.bf16.mxu0 %v11431_v36  ;;  %v11465_v34 = vld [vmem:[#allocation5 + $0x1730] sm:$0xff]   ;;  %v11467_v36 = vld [vmem:[#allocation5 + $0x1778] sm:$0xff]  }
 0x344   :  { %v11823_v26 = vadd.f32 %v10208_v21, %v7797_v24  ;;  %10506 = vmatpush3.bf16.msra.mxu1 %v11430_v29  ;;  %v11456_v24 = vld [vmem:[#allocation5 + $0x17e0] sm:$0xff]   ;;  %v11466_v29 = vld [vmem:[#allocation5 + $0x17b0] sm:$0xff]  }
 0x345   :  { %10507 = vmatprep.subr.bf16.mxu1 %v11432_v37  ;;  %v11468_v37 = vld [vmem:[#allocation5 + $0x17f8] sm:$0xff]  }
 0x346   :  { %10486 = vmatpush3.bf16.msra.mxu0 %v11433_v33  ;;  %v11469_v33 = vld [vmem:[#allocation5 + $0x1738] sm:$0xff]  }
 0x347   :  { %10487 = vmatprep.subr.bf16.mxu0 %v11435_v39  ;;  %v183_v39 = vld [vmem:[#allocation2 + $0x2e8] sm:$0xff] }
 0x348   :  { %10508 = vmatpush3.bf16.msra.mxu1 %v11434_v31  ;;  %v11470_v31 = vld [vmem:[#allocation5 + $0x17b8] sm:$0xff]  }
 0x349   :  { %10509 = vmatprep.subr.bf16.mxu1 %v11436_v35  ;;  %v279_v35 = vld [vmem:[#allocation2 + $0x5e8] sm:$0xff] }
 0x34a   :  { %10488 = vmatpush3.bf16.msra.mxu0 %v11437_v38  ;;  %v185_v38 = vld [vmem:[#allocation2 + $0x2f8] sm:$0xff]  ;;  %v375_v44 = vpack.c.bf16 %v279_v35, %v183_v39 }
 0x34b   :  { %10517 = vmatprep.subr.bf16.mxu0 %v11439_v56 }
 0x34c   :  { %10510 = vmatpush3.bf16.msra.mxu1 %v11438_v42  ;;  %v281_v42 = vld [vmem:[#allocation2 + $0x5f8] sm:$0xff] }
 0x34d   :  { %8366 = vmatmul.mubr.bf16.vlgmr.msra.gmra.mrb[88].mxu0 %v370_v52  ;;  %10539 = vmatprep.subr.bf16.mxu1 %v11440_v51  ;;  %v377_v40 = vpack.c.bf16 %v281_v42, %v185_v38 }
 0x34e   :  { %10518 = vmatpush3.bf16.msra.mxu0 %v11441_v58  ;;  %8447 = vmatprep.mubr.bf16.mxu0 %v375_v44 }
 0x34f   :  { %8407 = vmatmul.mubr.bf16.vlgmr.msra.gmra.mrb[88].mxu1 %v372_v54  ;;  %10519 = vmatprep.subr.bf16.mxu0 %v11443_v60 }
 0x350   :  { %10540 = vmatpush3.bf16.msra.mxu1 %v11442_v53  ;;  %8488 = vmatprep.mubr.bf16.mxu1 %v377_v40 }
 0x351   :  { %10541 = vmatprep.subr.bf16.mxu1 %v11444_v57 }
 0x352   :  { %10520 = vmatpush3.bf16.msra.mxu0 %v11445_v0 }
 0x353   :  { %10521 = vmatprep.subr.bf16.mxu0 %v11447_v63 }
 0x354   :  { %10542 = vmatpush3.bf16.msra.mxu1 %v11446_v61 }
 0x355   :  { %10543 = vmatprep.subr.bf16.mxu1 %v11448_v8 }
 0x356   :  { %10522 = vmatpush3.bf16.msra.mxu0 %v11449_v10 }
 0x357   :  { %10523 = vmatprep.subr.bf16.mxu0 %v11451_v15 }
 0x358   :  { %10544 = vmatpush3.bf16.msra.mxu1 %v11450_v7 }
 0x359   :  { %10545 = vmatprep.subr.bf16.mxu1 %v11452_v18 }
 0x35a   :  { %10524 = vmatpush3.bf16.msra.mxu0 %v11453_v20  ;;  %v8500_v20 = vld [vmem:[%s11920_s3 + $0x8] sm:$0xff] }
 0x35b   :  { %10525 = vmatprep.subr.bf16.mxu0 %v11455_v22  ;;  %v8502_v22 = vld [vmem:[%s11920_s3 + $0x18] sm:$0xff] }
 0x35e   :  { %v10247_v62 = vpop.f32.mrb[64].mxu1  ;;  %10526 = vmatpush3.bf16.msra.mxu0 %v11457_v25  ;;  %v8503_v25 = vld [vmem:[%s11920_s3 + $0x20] sm:$0xff] }
 0x35f   :  { %v10225_v55 = vpop.f32.mrb[64].mxu0  ;;  %v10248_v4 = vpop.f32.mrb[65].mxu1  ;;  %10527 = vmatprep.subr.bf16.mxu0 %v11459_v27 }
 0x360   :  { %v10226_v59 = vpop.f32.mrb[65].mxu0  ;;  %v10249_v1 = vadd.f32 %v10248_v4, %v10247_v62  ;;  %v10250_v5 = vpop.f32.mrb[66].mxu1 }
 0x361   :  { %v10227_v2 = vadd.f32 %v10226_v59, %v10225_v55  ;;  %v10228_v6 = vpop.f32.mrb[66].mxu0  ;;  %v10251_v14 = vpop.f32.mrb[67].mxu1 }
 0x362   :  { %v10229_v11 = vpop.f32.mrb[67].mxu0  ;;  %v10252_v12 = vadd.f32 %v10251_v14, %v10250_v5 }
 0x363   :  { %v7876_v3 = vadd.f32 %v10227_v2, %v11820_v17  ;;  %v10230_v13 = vadd.f32 %v10229_v11, %v10228_v6  ;;  %v11454_v17 = vld [vmem:[#allocation5 + $0x1798] sm:$0xff]  }
 0x364   :  { %10546 = vmatpush3.bf16.msra.mxu1 %v11454_v17  ;;  %v8501_v17 = vld [vmem:[%s11920_s3 + $0x10] sm:$0xff] }
 0x365   :  { %v11826_v9 = vadd.f32 %v10249_v1, %v7876_v3  ;;  %v7879_v19 = vadd.f32 %v10230_v13, %v11823_v26  ;;  %10547 = vmatprep.subr.bf16.mxu1 %v11456_v24  ;;  %v11461_v26 = vld [vmem:[#allocation5 + $0x1728] sm:$0xff]   ;;  %v10647_v24 = vpack.c.bf16 %v8502_v22, %v8501_v17 }
 0x366   :  { %10528 = vmatpush3.bf16.msra.mxu0 %v11461_v26  ;;  %v8506_v26 = vld [vmem:[%s11920_s3 + $0x38] sm:$0xff] }
 0x367   :  { %v11829_v21 = vadd.f32 %v10252_v12, %v7879_v19  ;;  %10529 = vmatprep.subr.bf16.mxu0 %v11463_v32  ;;  %v8499_v19 = vld [vmem:[%s11920_s3] sm:$0xff] }
 0x368   :  { %10548 = vmatpush3.bf16.msra.mxu1 %v11458_v16  ;;  %v8504_v16 = vld [vmem:[%s11920_s3 + $0x28] sm:$0xff]  ;;  %v8507_v32 = vld [vmem:[%s11920_s3 + $0x40] sm:$0xff] }
 0x369   :  { %10549 = vmatprep.subr.bf16.mxu1 %v11460_v23  ;;  %v10651_v27 = vpack.c.bf16 %v8504_v16, %v8503_v25  ;;  %v8505_v23 = vld [vmem:[%s11920_s3 + $0x30] sm:$0xff] }
 0x36a   :  { %10530 = vmatpush3.bf16.msra.mxu0 %v11465_v34 }
 0x36b   :  { %10531 = vmatprep.subr.bf16.mxu0 %v11467_v36 }
 0x36c   :  { %10550 = vmatpush3.bf16.msra.mxu1 %v11462_v30  ;;  %v10655_v30 = vpack.c.bf16 %v8506_v26, %v8505_v23 }
 0x36d   :  { %10551 = vmatprep.subr.bf16.mxu1 %v11464_v28  ;;  %v8508_v28 = vld [vmem:[%s11920_s3 + $0x48] sm:$0xff] }
 0x36e   :  { %10532 = vmatpush3.bf16.msra.mxu0 %v11469_v33  ;;  %v10659_v34 = vpack.c.bf16 %v8508_v28, %v8507_v32 }
 0x370   :  { %10552 = vmatpush3.bf16.msra.mxu1 %v11466_v29 }
 0x371   :  { %10553 = vmatprep.subr.bf16.mxu1 %v11468_v37  ;;  %8448 = vmatmul.mubr.bf16.vlgmr.msra.gmra.mrb[92].mxu0 %v374_v49 }
 0x374   :  { %10554 = vmatpush3.bf16.msra.mxu1 %v11470_v31 }
 0x377   :  { %8489 = vmatmul.mubr.bf16.vlgmr.msra.gmra.mrb[92].mxu1 %v376_v43  ;;  %v8509_v43 = vld [vmem:[%s11920_s3 + $0x50] sm:$0xff] }
 0x37f   :  { %v10269_v52 = vpop.f32.mrb[68].mxu0 }
 0x380   :  { %v10270_v50 = vpop.f32.mrb[69].mxu0 }
 0x381   :  { %v10271_v54 = vadd.f32 %v10270_v50, %v10269_v52  ;;  %v10272_v51 = vpop.f32.mrb[70].mxu0  ;;  %v8510_v52 = vld [vmem:[%s11920_s3 + $0x58] sm:$0xff]  ;;  %v8511_v50 = vld [vmem:[%s11920_s3 + $0x60] sm:$0xff] }
 0x382   :  { %v10291_v47 = vpop.f32.mrb[68].mxu1  ;;  %v10273_v60 = vpop.f32.mrb[71].mxu0 }
 0x383   :  { %v10292_v56 = vpop.f32.mrb[69].mxu1  ;;  %v7958_v55 = vadd.f32 %v10271_v54, %v11826_v9  ;;  %v10274_v57 = vadd.f32 %v10273_v60, %v10272_v51  ;;  %v8512_v54 = vld [vmem:[%s11920_s3 + $0x68] sm:$0xff]  ;;  %v8513_v51 = vld [vmem:[%s11920_s3 + $0x70] sm:$0xff]  ;;  %v8599_v60 = vld [vmem:[%s11922_s5] sm:$0xff] }
 0x384   :  { %v10293_v58 = vadd.f32 %v10292_v56, %v10291_v47  ;;  %v10294_v53 = vpop.f32.mrb[70].mxu1  ;;  %v10663_v47 = vpack.c.bf16 %v8510_v52, %v8509_v43  ;;  %v10667_v56 = vpack.c.bf16 %v8512_v54, %v8511_v50 }
 0x385   :  { %v10295_v62 = vpop.f32.mrb[71].mxu1  ;;  %v7961_v61 = vadd.f32 %v10274_v57, %v11829_v21  ;;  %v10643_v21 = vpack.c.bf16 %v8500_v20, %v8499_v19  ;;  %v8601_v57 = vld [vmem:[%s11922_s5 + $0x10] sm:$0xff] }
 0x386   :  { %v10296_v0 = vadd.f32 %v10295_v62, %v10294_v53  ;;  %v7999_v59 = vadd.f32 %v10293_v58, %v7958_v55  ;;  %v8514_v58 = vld [vmem:[%s11920_s3 + $0x78] sm:$0xff]  ;;  %v8600_v55 = vld [vmem:[%s11922_s5 + $0x8] sm:$0xff] }
 0x387   :  { %10644 = vmatprep.subr.bf16.mxu0 %v10643_v21  ;;  %v10671_v53 = vpack.c.bf16 %v8514_v58, %v8513_v51  ;;  %v10675_v62 = vpack.c.bf16 %v8600_v55, %v8599_v60 }
 0x388   :  { %v8002_v2 = vadd.f32 %v10296_v0, %v7961_v61  ;;  %10646 = vmatpush3.bf16.msra.mxu0 %v10643_v21  ;;  %v8602_v0 = vld [vmem:[%s11922_s5 + $0x18] sm:$0xff]  ;;  %v8603_v61 = vld [vmem:[%s11922_s5 + $0x20] sm:$0xff] }
 0x389   :  { %10648 = vmatprep.subr.bf16.mxu0 %v10647_v24  ;;  %10676 = vmatprep.subr.bf16.mxu1 %v10675_v62 }
 0x38a   :  { %10678 = vmatpush3.bf16.msra.mxu1 %v10675_v62 }
 0x38c   :  { %10650 = vmatpush3.bf16.msra.mxu0 %v10647_v24 }
 0x38d   :  { %10652 = vmatprep.subr.bf16.mxu0 %v10651_v27 }
 0x390   :  { %10654 = vmatpush3.bf16.msra.mxu0 %v10651_v27 }
 0x391   :  { %10656 = vmatprep.subr.bf16.mxu0 %v10655_v30 }
 0x394   :  { %10658 = vmatpush3.bf16.msra.mxu0 %v10655_v30 }
 0x395   :  { %10660 = vmatprep.subr.bf16.mxu0 %v10659_v34 }
 0x398   :  { %10662 = vmatpush3.bf16.msra.mxu0 %v10659_v34 }
 0x399   :  { %10664 = vmatprep.subr.bf16.mxu0 %v10663_v47 }
 0x39c   :  { %10666 = vmatpush3.bf16.msra.mxu0 %v10663_v47 }
 0x39d   :  { %10668 = vmatprep.subr.bf16.mxu0 %v10667_v56 }
 0x39f   :  { %v10313_v4 = vpop.f32.mrb[72].mxu0 }
 0x3a0   :  { %v10314_v1 = vpop.f32.mrb[73].mxu0  ;;  %10670 = vmatpush3.bf16.msra.mxu0 %v10667_v56 }
 0x3a1   :  { %v10315_v8 = vadd.f32 %v10314_v1, %v10313_v4  ;;  %v10316_v5 = vpop.f32.mrb[74].mxu0  ;;  %10672 = vmatprep.subr.bf16.mxu0 %v10671_v53 }
 0x3a2   :  { %v10335_v63 = vpop.f32.mrb[72].mxu1  ;;  %v10317_v11 = vpop.f32.mrb[75].mxu0 }
 0x3a3   :  { %v10336_v6 = vpop.f32.mrb[73].mxu1  ;;  %v8040_v13 = vadd.f32 %v10315_v8, %v7999_v59  ;;  %v10318_v14 = vadd.f32 %v10317_v11, %v10316_v5  ;;  %v10679_v59 = vpack.c.bf16 %v8602_v0, %v8601_v57 }
 0x3a4   :  { %v10337_v3 = vadd.f32 %v10336_v6, %v10335_v63  ;;  %v10338_v10 = vpop.f32.mrb[74].mxu1  ;;  %10674 = vmatpush3.bf16.msra.mxu0 %v10671_v53 }
 0x3a5   :  { %v10339_v7 = vpop.f32.mrb[75].mxu1  ;;  %v8043_v12 = vadd.f32 %v10318_v14, %v8002_v2  ;;  %v8604_v2 = vld [vmem:[%s11922_s5 + $0x28] sm:$0xff]  ;;  %10680 = vmatprep.subr.bf16.mxu1 %v10679_v59 }
 0x3a6   :  { %v10340_v9 = vadd.f32 %v10339_v7, %v10338_v10  ;;  %v8081_v15 = vadd.f32 %v10337_v3, %v8040_v13  ;;  %v10683_v4 = vpack.c.bf16 %v8604_v2, %v8603_v61  ;;  %10682 = vmatpush3.bf16.msra.mxu1 %v10679_v59 }
 0x3a8   :  { %v8084_v18 = vadd.f32 %v10340_v9, %v8043_v12  ;;  %10684 = vmatprep.subr.bf16.mxu1 %v10683_v4 }
 0x3aa   :  { %10686 = vmatpush3.bf16.msra.mxu1 %v10683_v4 }
 0x3bf   :  { %v10357_v29 = vpop.f32.mrb[76].mxu0 }
 0x3c0   :  { %v10358_v37 = vpop.f32.mrb[77].mxu0 }
 0x3c1   :  { %v10359_v33 = vadd.f32 %v10358_v37, %v10357_v29  ;;  %v10360_v39 = vpop.f32.mrb[78].mxu0 }
 0x3c2   :  { %v10379_v36 = vpop.f32.mrb[76].mxu1  ;;  %v10361_v42 = vpop.f32.mrb[79].mxu0 }
 0x3c3   :  { %v10380_v31 = vpop.f32.mrb[77].mxu1  ;;  %v8122_v44 = vadd.f32 %v10359_v33, %v8081_v15  ;;  %v10362_v40 = vadd.f32 %v10361_v42, %v10360_v39 }
 0x3c4   :  { %v10381_v35 = vadd.f32 %v10380_v31, %v10379_v36  ;;  %v10382_v38 = vpop.f32.mrb[78].mxu1 }
 0x3c5   :  { %v10383_v46 = vpop.f32.mrb[79].mxu1  ;;  %v8125_v49 = vadd.f32 %v10362_v40, %v8084_v18 }
 0x3c6   :  { %v10384_v41 = vadd.f32 %v10383_v46, %v10382_v38  ;;  %v8163_v48 = vadd.f32 %v10381_v35, %v8122_v44 }
 0x3c8   :  { %v8166_v45 = vadd.f32 %v10384_v41, %v8125_v49 }
 0x3df   :  { %v10401_v63 = vpop.f32.mrb[80].mxu0 }
 0x3e0   :  { %v10402_v6 = vpop.f32.mrb[81].mxu0 }
 0x3e1   :  { %v10403_v8 = vadd.f32 %v10402_v6, %v10401_v63  ;;  %v10404_v5 = vpop.f32.mrb[82].mxu0  ;;  %v8605_v6 = vld [vmem:[%s11922_s5 + $0x30] sm:$0xff] }
 0x3e2   :  { %v10423_v1 = vpop.f32.mrb[80].mxu1  ;;  %v10405_v7 = vpop.f32.mrb[83].mxu0 }
 0x3e3   :  { %v10424_v3 = vpop.f32.mrb[81].mxu1  ;;  %v8204_v13 = vadd.f32 %v10403_v8, %v8163_v48  ;;  %v10406_v14 = vadd.f32 %v10405_v7, %v10404_v5  ;;  %v8606_v8 = vld [vmem:[%s11922_s5 + $0x38] sm:$0xff]  ;;  %v9499_v5 = vld [vmem:[#allocation8] ss:$0 sm:$0xff]  ;;  %s11628_s5 = smov [#allocation11]  }
 0x3e4   :  { %v10425_v10 = vadd.f32 %v10424_v3, %v10423_v1  ;;  %v10426_v11 = vpop.f32.mrb[82].mxu1  ;;  %v10687_v3 = vpack.c.bf16 %v8606_v8, %v8605_v6  ;;  %s8716_s9 = sshll.u32 %s11628_s5, 4  ;;  %s8717_s9 = int_to_ptr.vmem [resolvable:$true] %s8716_s9 }
 0x3e5   :  { %v10427_v9 = vpop.f32.mrb[83].mxu1  ;;  %v8207_v18 = vadd.f32 %v10406_v14, %v8166_v45  ;;  %s11589_s10 = scalar_lea.vmem %s8717_s9, 256  ;;  %p11594_p13 = scmp.lt.s32.totalorder %s8717_s9, %s8717_s9 }
 0x3e6   :  { %v10428_v15 = vadd.f32 %v10427_v9, %v10426_v11  ;;  %v8245_v12 = vadd.f32 %v10425_v10, %v8204_v13  ;;  %10688 = vmatprep.subr.bf16.mxu1 %v10687_v3  ;;  %p11590_p12 = scmp.ne.s32.totalorder %s8717_s9, %s11589_s10  ;;  %p11595_p0 = scmp.lt.s32.totalorder %s11589_s10, %s11589_s10 }
 0x3e7   :  { %10690 = vmatpush3.bf16.msra.mxu1 %v10687_v3 }
 0x3e8   :  { %v8248_v19 = vadd.f32 %v10428_v15, %v8207_v18  ;;  %v9500_v15 = vld [vmem:[#allocation10] ss:$0 sm:$0xff]  ;;  %p11596_p1 = por %p11595_p0, %p11594_p13 }
 0x3ea   :  { %p11597_p2 = pnand %p11596_p1, %p11590_p12 }
 0x3ff   :  { %v10445_v20 = vpop.f32.mrb[84].mxu0 }
 0x400   :  { %v10446_v21 = vpop.f32.mrb[85].mxu0 }
 0x401   :  { %v10447_v24 = vadd.f32 %v10446_v21, %v10445_v20  ;;  %v10448_v16 = vpop.f32.mrb[86].mxu0 }
 0x402   :  { %v10467_v17 = vpop.f32.mrb[84].mxu1  ;;  %v10449_v23 = vpop.f32.mrb[87].mxu0 }
 0x403   :  { %v10468_v22 = vpop.f32.mrb[85].mxu1  ;;  %v8286_v30 = vadd.f32 %v10447_v24, %v8245_v12  ;;  %v10450_v32 = vadd.f32 %v10449_v23, %v10448_v16 }
 0x404   :  { %v10469_v25 = vadd.f32 %v10468_v22, %v10467_v17  ;;  %v10470_v27 = vpop.f32.mrb[86].mxu1 }
 0x405   :  { %v10471_v26 = vpop.f32.mrb[87].mxu1  ;;  %v8289_v29 = vadd.f32 %v10450_v32, %v8248_v19 }
 0x406   :  { %v10472_v28 = vadd.f32 %v10471_v26, %v10470_v27  ;;  %v8327_v34 = vadd.f32 %v10469_v25, %v8286_v30 }
 0x408   :  { %v8330_v36 = vadd.f32 %v10472_v28, %v8289_v29 }
 0x420   :  { %v10489_v37 = vpop.f32.mrb[88].mxu0 }
 0x421   :  { %v10490_v31 = vpop.f32.mrb[89].mxu0 }
 0x422   :  { %v10511_v33 = vpop.f32.mrb[88].mxu1  ;;  %v10491_v39 = vadd.f32 %v10490_v31, %v10489_v37  ;;  %v10492_v38 = vpop.f32.mrb[90].mxu0 }
 0x423   :  { %v10512_v35 = vpop.f32.mrb[89].mxu1  ;;  %v10493_v40 = vpop.f32.mrb[91].mxu0 }
 0x424   :  { %v10513_v42 = vadd.f32 %v10512_v35, %v10511_v33  ;;  %v10514_v44 = vpop.f32.mrb[90].mxu1  ;;  %v8368_v46 = vadd.f32 %v10491_v39, %v8327_v34  ;;  %v10494_v41 = vadd.f32 %v10493_v40, %v10492_v38 }
 0x425   :  { %v10515_v48 = vpop.f32.mrb[91].mxu1 }
 0x426   :  { %v10516_v49 = vadd.f32 %v10515_v48, %v10514_v44  ;;  %v8409_v45 = vadd.f32 %v10513_v42, %v8368_v46  ;;  %v8371_v43 = vadd.f32 %v10494_v41, %v8330_v36 }
 0x428   :  { %v8412_v52 = vadd.f32 %v10516_v49, %v8371_v43 }
 0x444   :  { %v10533_v47 = vpop.f32.mrb[92].mxu0 }
 0x445   :  { %v10534_v54 = vpop.f32.mrb[93].mxu0 }
 0x446   :  { %v10535_v56 = vadd.f32 %v10534_v54, %v10533_v47  ;;  %v10536_v58 = vpop.f32.mrb[94].mxu0 }
 0x447   :  { %v10537_v55 = vpop.f32.mrb[95].mxu0 }
 0x448   :  { %v8450_v57 = vadd.f32 %v10535_v56, %v8409_v45  ;;  %v10538_v62 = vadd.f32 %v10537_v55, %v10536_v58 }
 0x44a   :  { %v10555_v50 = vpop.f32.mrb[92].mxu1  ;;  %v8453_v2 = vadd.f32 %v10538_v62, %v8412_v52 }
 0x44b   :  { %v10556_v51 = vpop.f32.mrb[93].mxu1 }
 0x44c   :  { %v10557_v53 = vadd.f32 %v10556_v51, %v10555_v50  ;;  %v10558_v60 = vpop.f32.mrb[94].mxu1 }
 0x44d   :  { %v10559_v0 = vpop.f32.mrb[95].mxu1 }
 0x44e   :  { %v10560_v59 = vadd.f32 %v10559_v0, %v10558_v60  ;;  %v8491_v61 = vadd.f32 %v10557_v53, %v8450_v57 }
 0x450   :  { %v8497_v4 = vmax.f32 %v8491_v61, 0.0  ;;  %v8494_v63 = vadd.f32 %v10560_v59, %v8453_v2 }
 0x452   :  { %v8498_v1 = vmax.f32 %v8494_v63, 0.0  ;;  %10621 = vmatprep.mubr.f32.mxu0 %v8497_v4 }
 0x454   :  { %10622 = vmatmul.mubr.f32.vlgmr.msra.gmra.mrb[96].mxu0 %v8498_v1 }
 0x527   :  { %v10623_v10 = vpop.f32.mrb[96].mxu0 }
 0x528   :  { %v8594_v11 = vadd.f32 %v10623_v10, %v9499_v5  ;;  %v8588_v7 = vpop.f32.mrb[97].mxu0 }
 0x529   :  { %v8589_v13 = vadd.f32 %v9499_v5, %v8588_v7 }
 0x52a   :  { %v8598_v9 = vmax.f32 %v8594_v11, 0.0 }
 0x52b   :  { %v8597_v14 = vmax.f32 %v8589_v13, 0.0 }
 0x52d   :  { %10640 = vmatprep.mubr.msk.f32.mxu1 %vm8614_vm0, %v8597_v14 }
 0x52e   :  { %10641 = vmatmul.mubr.msk.f32.vlgmr.msra.gmra.mrb[96].mxu1 %vm8614_vm0, %v8598_v9 }
 0x601   :  { %v10642_v12 = vpop.f32.mrb[96].mxu1 }
 0x602   :  { %v8693_v18 = vadd.f32 %v10642_v12, %v9500_v15  ;;  %v8687_v19 = vpop.f32.mrb[97].mxu1 }
 0x603   :  { %v8688_v20 = vadd.f32 %v9500_v15, %v8687_v19 }
 0x604   :  { %v9504_v17 = vmul.f32 -1.442695, %v8693_v18 }
 0x605   :  { %v9503_v21 = vmul.f32 -1.442695, %v8688_v20 }
 0x606   :  { %11471 = vpow2.f32 %v9504_v17 }
 0x607   :  { %11473 = vpow2.f32 %v9503_v21 }
 0x610   :  { %v11472_v22 = vpop.eup %11471 }
 0x611   :  { %v11474_v24 = vpop.eup %11473  ;;  %v8703_v25 = vadd.f32 1.0, %v11472_v22 }
 0x612   :  { %v8702_v16 = vadd.f32 1.0, %v11474_v24 }
 0x613   :  { %11475 = vrcp.f32 %v8703_v25 }
 0x614   :  { %11477 = vrcp.f32 %v8702_v16 }
 0x61d   :  { %v11476_v27 = vpop.eup %11475 }
 0x61e   :  { %v11478_v23 = vpop.eup %11477  ;;  %8710 = vst.msk [vmem:[#allocation11 + $0x8] sm:$0xff] %vm8708_vm1, %v11476_v27 }
 0x61f   :  { %8709 = vst.msk [vmem:[#allocation11] sm:$0xff] %vm8708_vm1, %v11478_v23 }
 0x620   :  { %11600 = shalt.err (!%p11597_p2)
}
 0x621   :  { %s11601_s13 = scalar_lea.hbm %s11924_s7, 256 }
 0x622   :  { %p11602_p3 = scmp.ne.s32.totalorder %s11924_s7, %s11601_s13  ;;  %p11605_p4 = scmp.lt.u32.totalorder %s11601_s13, %s11924_s7 }
 0x624   :  { %p11607_p5 = pnand %p11605_p4, %p11602_p3 }
 0x626   :  { %11610 = shalt.err (!%p11607_p5)
}
 0x627   :  { %s11629_s6 = smov 128   ;;  %s11630_s16 = smov 8  }
 0x628   :  { %8722 = dma.vmem_to_hbm [thread:$0]  %s8717_s9, 256, %s11924_s7, [#allocation4], %s11629_s6, %s11629_s6, %s11630_s16  }
 0x629   :  { %11617 = dma.done.wait [#allocation4], 256  }
 0x62a   :  { %11618 = vsyncadd [#allocation4], 4294967040 }
 0x62b   :  { %8726 = vsyncpa [#allocation3], 1 }
 0x62c   :  { %8727 = vsyncpa [#allocation6], 1 }
 0x62d   :  { %8728 = vsyncpa [#allocation9], 1 }
 0x62e   :  { %8729 = vsyncpa [#allocation4], 1 }

</bundles_post_ra>
